<compile_context>
chip_gen: v7x
topology: tpu7x:2x2x1
jax: 0.10.0
libtpu: 0.0.40
codegen_flags: <defaults>
</compile_context>

<pallas_src>
import functools

import jax
import jax.numpy as jnp
from jax import lax
from jax.experimental import pallas as pl
from jax.experimental.pallas import tpu as pltpu

special = ['<pad>', '<unk>', '<bos>', '<eos>', '<sep>', '<cls>', '<mask>']
BOS = special.index('<bos>')  # = 2
LANE = 128
SUBLANE = 8


# ----------------------------- Pallas kernels ------------------------------ #

def _recurrence_kernel(src_x_ref, dec_x_ref,
                       enc_wih_ref, enc_whh_ref, enc_bih_ref, enc_bhh_ref,
                       dec_wih_ref, dec_whh_ref, dec_bih_ref, dec_bhh_ref,
                       hs_ref, gi_enc_ref, gi_dec_ref,
                       *, batch, src_len, dec_len, hidden):
    """Encoder GRU + decoder GRU (teacher forcing), decoder hiddens out.

    src_x_ref : [S*Bp, Ep]   bf16 time-major pre-gathered source embeddings
    dec_x_ref : [(T-1)*Bp, Ep] bf16 time-major decoder-input embeddings
    *_wih     : [Ep, 3*Hp]   bf16 fused (r,z,n) input weights
    *_whh     : [Hp, 3*Hp]   bf16 fused recurrent weights
    *_bih/bhh : [1, 3*Hp]    f32 fused biases
    hs_ref    : [(T-1)*Bp, Hp] bf16 (output: staged decoder hiddens)
    gi_*_ref  : VMEM f32 scratch slabs for precomputed input-side gates
    """
    H = hidden

    # Input-side gates for every timestep: one batched bf16 MXU matmul per RNN
    # (input bias folded in), staged into f32 VMEM scratch.
    gi_enc_ref[...] = (
        jnp.dot(src_x_ref[...], enc_wih_ref[...],
                preferred_element_type=jnp.float32) + enc_bih_ref[...])
    gi_dec_ref[...] = (
        jnp.dot(dec_x_ref[...], dec_wih_ref[...],
                preferred_element_type=jnp.float32) + dec_bih_ref[...])

    def gru_step(h, t, gi_ref, whh_ref, bhh_ref):
        # Only the true serial dependency (h @ Whh) lives inside the loop:
        # ONE fused [B,H]@[H,3H] matmul per step; lane-aligned gate slices.
        row0 = pl.multiple_of(t * batch, batch)
        gi = gi_ref[pl.ds(row0, batch), :]
        hh = jnp.dot(h.astype(jnp.bfloat16), whh_ref[...],
                     preferred_element_type=jnp.float32) + bhh_ref[...]
        r = jax.nn.sigmoid(gi[:, :H] + hh[:, :H])
        z = jax.nn.sigmoid(gi[:, H:2 * H] + hh[:, H:2 * H])
        n = jnp.tanh(gi[:, 2 * H:] + r * hh[:, 2 * H:])   # PyTorch: r*(h@Whn+bhn)
        return (1.0 - z) * n + z * h                        # f32 state update

    # -------- encoder recurrence --------
    h0 = jnp.zeros((batch, H), jnp.float32)
    h_enc = lax.fori_loop(
        0, src_len,
        lambda t, h: gru_step(h, t, gi_enc_ref, enc_whh_ref, enc_bhh_ref),
        h0, unroll=True)

    # -------- decoder recurrence (full teacher forcing) --------
    def dec_body(t, h):
        h = gru_step(h, t, gi_dec_ref, dec_whh_ref, dec_bhh_ref)
        row0 = pl.multiple_of(t * batch, batch)
        hs_ref[pl.ds(row0, batch), :] = h.astype(hs_ref.dtype)
        return h

    lax.fori_loop(0, dec_len, dec_body, h_enc, unroll=True)


def _projection_kernel(hs_ref, wo_ref, bo_ref, out_ref):
    """One (Tm, Hp) x (Hp, Tn) tile of the hoisted vocab projection."""
    out_ref[...] = (
        jnp.dot(hs_ref[...], wo_ref[...], preferred_element_type=jnp.float32)
        + bo_ref[...])


# ----------------------------- helpers ------------------------------------- #

def _round_up(x, m):
    return ((x + m - 1) // m) * m


def _pick_tile(total, candidates, cap):
    if total <= cap:
        return total
    for c in candidates:
        if total % c == 0:
            return c
    return total


def _fuse_gate_weights(w3, in_pad, h_pad, dtype):
    """[3, in, H] per-gate -> padded, fused [in_pad, 3*h_pad]."""
    _, in_dim, h = w3.shape
    w = jnp.pad(w3, ((0, 0), (0, in_pad - in_dim), (0, h_pad - h)))
    return jnp.concatenate([w[0], w[1], w[2]], axis=1).astype(dtype)


def _fuse_gate_bias(b3, h_pad):
    """[3, 1, H] per-gate -> padded, fused [1, 3*h_pad] (kept in f32)."""
    _, _, h = b3.shape
    b = jnp.pad(b3, ((0, 0), (0, 0), (0, h_pad - h)))
    return jnp.concatenate([b[0], b[1], b[2]], axis=1).astype(jnp.float32)


# ----------------------------- Model wrapper ------------------------------- #

def init_params(key, vocab_size, emb_size, hidden_size, out_vocab_size):
    ks = jax.random.split(key, 11)
    s = 0.1
    n = jax.random.normal
    return {
        "embedding": n(ks[0], (vocab_size, emb_size), jnp.float32) * s,
        # encoder GRU, per-gate (r, z, n) layout
        "enc_wih": n(ks[1], (3, emb_size, hidden_size), jnp.float32) * s,
        "enc_whh": n(ks[2], (3, hidden_size, hidden_size), jnp.float32) * s,
        "enc_bih": n(ks[3], (3, 1, hidden_size), jnp.float32) * s,
        "enc_bhh": n(ks[4], (3, 1, hidden_size), jnp.float32) * s,
        # decoder GRU
        "dec_wih": n(ks[5], (3, emb_size, hidden_size), jnp.float32) * s,
        "dec_whh": n(ks[6], (3, hidden_size, hidden_size), jnp.float32) * s,
        "dec_bih": n(ks[7], (3, 1, hidden_size), jnp.float32) * s,
        "dec_bhh": n(ks[8], (3, 1, hidden_size), jnp.float32) * s,
        # decoder output projection
        "dec_wo": n(ks[9], (hidden_size, out_vocab_size), jnp.float32) * s,
        "dec_bo": n(ks[10], (1, out_vocab_size), jnp.float32) * s,
    }


def seq2seq_forward(params, source, target, teacher_forcing=1.0):
    """Mirrors Seq2Seq.forward with teacher_forcing=1.0 (deterministic).
    Returns decoder_outputs [B, T, V] with row t=0 kept zero."""
    del teacher_forcing  # fused kernel implements the teacher-forced schedule
    B, S = source.shape
    _, T = target.shape
    assert T >= 2, "decoder needs at least one step (T >= 2)"
    E = params["embedding"].shape[1]
    H = params["enc_whh"].shape[-1]
    V = params["dec_wo"].shape[1]

    # Pad everything to (8, 128)-aligned shapes; slice back in the wrapper.
    Bp = _round_up(B, SUBLANE)
    Ep = _round_up(E, LANE)
    Hp = _round_up(H, LANE)
    Vp = _round_up(V, LANE)

    emb = jnp.pad(params["embedding"], ((0, 0), (0, Ep - E))).astype(jnp.bfloat16)

    # Batched embedding gathers (outside the kernel), time-major flatten.
    src_tok = jnp.pad(source, ((0, Bp - B), (0, 0)))
    dec_tok = jnp.concatenate(
        [jnp.full((B, 1), BOS, target.dtype), target[:, 1:T - 1]], axis=1)
    dec_tok = jnp.pad(dec_tok, ((0, Bp - B), (0, 0)))

    src_x = jnp.take(emb, src_tok, axis=0)                      # [Bp, S, Ep]
    src_x = jnp.transpose(src_x, (1, 0, 2)).reshape(S * Bp, Ep)
    dec_x = jnp.take(emb, dec_tok, axis=0)                      # [Bp, T-1, Ep]
    dec_x = jnp.transpose(dec_x, (1, 0, 2)).reshape((T - 1) * Bp, Ep)

    enc_wih = _fuse_gate_weights(params["enc_wih"], Ep, Hp, jnp.bfloat16)
    enc_whh = _fuse_gate_weights(params["enc_whh"], Hp, Hp, jnp.bfloat16)
    enc_bih = _fuse_gate_bias(params["enc_bih"], Hp)
    enc_bhh = _fuse_gate_bias(params["enc_bhh"], Hp)
    dec_wih = _fuse_gate_weights(params["dec_wih"], Ep, Hp, jnp.bfloat16)
    dec_whh = _fuse_gate_weights(params["dec_whh"], Hp, Hp, jnp.bfloat16)
    dec_bih = _fuse_gate_bias(params["dec_bih"], Hp)
    dec_bhh = _fuse_gate_bias(params["dec_bhh"], Hp)

    wo = jnp.pad(params["dec_wo"], ((0, Hp - H), (0, Vp - V))).astype(jnp.bfloat16)
    bo = jnp.pad(params["dec_bo"], ((0, 0), (0, Vp - V))).astype(jnp.float32)

    rows = (T - 1) * Bp
    vmem = pl.BlockSpec(memory_space=pltpu.MemorySpace.VMEM)

    # ---- kernel 1: gridless fused encoder+decoder recurrence -> hiddens ----
    rec_kernel = functools.partial(
        _recurrence_kernel, batch=Bp, src_len=S, dec_len=T - 1, hidden=Hp)
    hs = pl.pallas_call(
        rec_kernel,
        out_shape=jax.ShapeDtypeStruct((rows, Hp), jnp.bfloat16),
        in_specs=[vmem] * 10,
        out_specs=vmem,
        scratch_shapes=[pltpu.VMEM((S * Bp, 3 * Hp), jnp.float32),
                        pltpu.VMEM((rows, 3 * Hp), jnp.float32)],
        compiler_params=pltpu.CompilerParams(
            vmem_limit_bytes=32 * 1024 * 1024),
    )(src_x, dec_x,
      enc_wih, enc_whh, enc_bih, enc_bhh,
      dec_wih, dec_whh, dec_bih, dec_bhh)

    # ---- kernel 2: tiled, pipelined vocab projection -----------------------
    tm = _pick_tile(rows, (256, 128, 64, 32, 16, 8), cap=256)
    tn = _pick_tile(Vp, (512, 256, 128), cap=512)
    logits_pad = pl.pallas_call(
        _projection_kernel,
        out_shape=jax.ShapeDtypeStruct((rows, Vp), jnp.float32),
        grid=(rows // tm, Vp // tn),
        in_specs=[pl.BlockSpec((tm, Hp), lambda i, j: (i, 0)),
                  pl.BlockSpec((Hp, tn), lambda i, j: (0, j)),
                  pl.BlockSpec((1, tn), lambda i, j: (0, j))],
        out_specs=pl.BlockSpec((tm, tn), lambda i, j: (i, j)),
        compiler_params=pltpu.CompilerParams(
            dimension_semantics=("parallel", "parallel"),
            vmem_limit_bytes=32 * 1024 * 1024),
    )(hs, wo, bo)

    logits = logits_pad.reshape(T - 1, Bp, Vp)[:, :B, :V]
    logits = jnp.transpose(logits, (1, 0, 2))                    # [B, T-1, V]
    return jnp.concatenate([jnp.zeros((B, 1, V), jnp.float32), logits], axis=1)


# -------------------------- pure-JAX reference ------------------------------ #

def _gru_cell_ref(x, h, wih, whh, bih, bhh):
    dots = lambda a, b: jnp.dot(a, b, preferred_element_type=jnp.float32)
    i_r, i_z, i_n = (dots(x, wih[g]) + bih[g] for g in range(3))
    h_r, h_z, h_n = (dots(h, whh[g]) + bhh[g] for g in range(3))
    r = jax.nn.sigmoid(i_r + h_r)
    z = jax.nn.sigmoid(i_z + h_z)
    n = jnp.tanh(i_n + r * h_n)
    return (1.0 - z) * n + z * h


def seq2seq_reference(params, source, target):
    B, S = source.shape
    _, T = target.shape
    H = params["enc_whh"].shape[-1]
    V = params["dec_wo"].shape[1]
    emb = params["embedding"]
    h = jnp.zeros((B, H), jnp.float32)
    for t in range(S):
        x = jnp.take(emb, source[:, t], axis=0)
        h = _gru_cell_ref(x, h, params["enc_wih"], params["enc_whh"],
                          params["enc_bih"], params["enc_bhh"])
    dec_in = jnp.full((B,), BOS, jnp.int32)
    outs = [jnp.zeros((B, V), jnp.float32)]
    for t in range(1, T):
        x = jnp.take(emb, dec_in, axis=0)
        h = _gru_cell_ref(x, h, params["dec_wih"], params["dec_whh"],
                          params["dec_bih"], params["dec_bhh"])
        outs.append(jnp.dot(h, params["dec_wo"],
                            preferred_element_type=jnp.float32)
                    + params["dec_bo"])
        dec_in = target[:, t]                  # teacher forcing
    return jnp.stack(outs, axis=1)


# ---------------------------------- main ----------------------------------- #

if __name__ == "__main__":
    vocab_size = 30          # shared source/target vocab
    emb_size = 16
    hidden_size = 32
    out_vocab_size = vocab_size
    B, S, T = 2, 8, 8

    key = jax.random.PRNGKey(0)
    kp, ks, kt = jax.random.split(key, 3)
    params = init_params(kp, vocab_size, emb_size, hidden_size, out_vocab_size)
    source = jax.random.randint(ks, (B, S), len(special), vocab_size, dtype=jnp.int32)
    target = jax.random.randint(kt, (B, T), len(special), vocab_size, dtype=jnp.int32)

    fwd = jax.jit(seq2seq_forward)
    out = jax.block_until_ready(fwd(params, source, target))

    assert out.shape == (B, T, out_vocab_size)
    assert bool(jnp.all(out[:, 0, :] == 0.0))
    assert bool(jnp.all(jnp.isfinite(out)))

    ref = jax.block_until_ready(seq2seq_reference(params, source, target))
    # bf16 matmuls inside the kernel -> tolerance loosened vs the f32 reference
    assert bool(jnp.allclose(out, ref, atol=2e-2, rtol=2e-2)), (
        f"max abs err {float(jnp.max(jnp.abs(out - ref)))}")

    print("KERNEL_OK")
</pallas_src>

<mosaic_0001>
module attributes {stable_mosaic.version = 11 : i64} {
  func.func @_projection_kernel(%arg0: i32, %arg1: i32, %arg2: memref<56x128xbf16, #tpu.memory_space<vmem>>, %arg3: memref<128x128xbf16, #tpu.memory_space<vmem>>, %arg4: memref<1x128xf32, #tpu.memory_space<vmem>>, %arg5: memref<56x128xf32, #tpu.memory_space<vmem>>) attributes {dimension_semantics = [#tpu.dimension_semantics<parallel>, #tpu.dimension_semantics<parallel>], iteration_bounds = array<i64: 1, 1>, scalar_prefetch = 0 : i64, scratch_operands = 0 : i64, tpu.core_type = #tpu.core_type<tc>, window_params = [{transform_indices = @transform_0, window_bounds = array<i64: 56, 128>}, {transform_indices = @transform_1, window_bounds = array<i64: 128, 128>}, {transform_indices = @transform_2, window_bounds = array<i64: 1, 128>}, {transform_indices = @transform_3, window_bounds = array<i64: 56, 128>}]} {
    %c0 = arith.constant 0 : index
    %c0_0 = arith.constant 0 : index
    %0 = vector.load %arg2[%c0, %c0_0] : memref<56x128xbf16, #tpu.memory_space<vmem>>, vector<56x128xbf16>
    %c0_1 = arith.constant 0 : index
    %c0_2 = arith.constant 0 : index
    %1 = vector.load %arg3[%c0_1, %c0_2] : memref<128x128xbf16, #tpu.memory_space<vmem>>, vector<128x128xbf16>
    %cst = arith.constant dense<0.000000e+00> : vector<56x128xf32>
    %2 = tpu.matmul %0, %1, %cst {dimension_numbers = #tpu.dot_dimension_numbers<[1], [0], [0], [1], [0, 0, 1, 1], [], []>} : vector<56x128xbf16>, vector<128x128xbf16>, vector<56x128xf32> -> vector<56x128xf32>
    %c0_3 = arith.constant 0 : index
    %c0_4 = arith.constant 0 : index
    %3 = vector.load %arg4[%c0_3, %c0_4] : memref<1x128xf32, #tpu.memory_space<vmem>>, vector<1x128xf32>
    %4 = vector.broadcast %3 : vector<1x128xf32> to vector<56x128xf32>
    %5 = arith.addf %2, %4 : vector<56x128xf32>
    %c0_5 = arith.constant 0 : index
    %c0_6 = arith.constant 0 : index
    %6 = vector.load %arg5[%c0_5, %c0_6] : memref<56x128xf32, #tpu.memory_space<vmem>>, vector<56x128xf32>
    tpu.vector_store %arg5[%c0_5, %c0_6], %5 {strides = array<i32>} : memref<56x128xf32, #tpu.memory_space<vmem>>, vector<56x128xf32>,
    return
  }
  func.func @transform_0(%arg0: i32, %arg1: i32) -> (i32, i32) {
    %c0_i32 = arith.constant 0 : i32
    %c0_i32_0 = arith.constant 0 : i32
    return %arg0, %c0_i32 : i32, i32
  }
  func.func @transform_1(%arg0: i32, %arg1: i32) -> (i32, i32) {
    %c0_i32 = arith.constant 0 : i32
    %c0_i32_0 = arith.constant 0 : i32
    return %c0_i32, %arg1 : i32, i32
  }
  func.func @transform_2(%arg0: i32, %arg1: i32) -> (i32, i32) {
    %c0_i32 = arith.constant 0 : i32
    %c0_i32_0 = arith.constant 0 : i32
    return %c0_i32, %arg1 : i32, i32
  }
  func.func @transform_3(%arg0: i32, %arg1: i32) -> (i32, i32) {
    %c0_i32 = arith.constant 0 : i32
    return %arg0, %arg1 : i32, i32
  }
}

module attributes {stable_mosaic.version = 11 : i64} {
  func.func @_recurrence_kernel(%arg0: memref<64x128xbf16, #tpu.memory_space<vmem>>, %arg1: memref<56x128xbf16, #tpu.memory_space<vmem>>, %arg2: memref<128x384xbf16, #tpu.memory_space<vmem>>, %arg3: memref<128x384xbf16, #tpu.memory_space<vmem>>, %arg4: memref<1x384xf32, #tpu.memory_space<vmem>>, %arg5: memref<1x384xf32, #tpu.memory_space<vmem>>, %arg6: memref<128x384xbf16, #tpu.memory_space<vmem>>, %arg7: memref<128x384xbf16, #tpu.memory_space<vmem>>, %arg8: memref<1x384xf32, #tpu.memory_space<vmem>>, %arg9: memref<1x384xf32, #tpu.memory_space<vmem>>, %arg10: memref<56x128xbf16, #tpu.memory_space<vmem>>, %arg11: memref<64x384xf32, #tpu.memory_space<vmem>>, %arg12: memref<56x384xf32, #tpu.memory_space<vmem>>) attributes {dimension_semantics = [], scalar_prefetch = 0 : i64, scratch_operands = 2 : i64, tpu.core_type = #tpu.core_type<tc>} {
    %c0 = arith.constant 0 : index
    %c0_0 = arith.constant 0 : index
    %0 = vector.load %arg0[%c0, %c0_0] : memref<64x128xbf16, #tpu.memory_space<vmem>>, vector<64x128xbf16>
    %c0_1 = arith.constant 0 : index
    %c0_2 = arith.constant 0 : index
    %1 = vector.load %arg2[%c0_1, %c0_2] : memref<128x384xbf16, #tpu.memory_space<vmem>>, vector<128x384xbf16>
    %cst = arith.constant dense<0.000000e+00> : vector<64x384xf32>
    %2 = tpu.matmul %0, %1, %cst {dimension_numbers = #tpu.dot_dimension_numbers<[1], [0], [0], [1], [0, 0, 1, 1], [], []>} : vector<64x128xbf16>, vector<128x384xbf16>, vector<64x384xf32> -> vector<64x384xf32>
    %c0_3 = arith.constant 0 : index
    %c0_4 = arith.constant 0 : index
    %3 = vector.load %arg4[%c0_3, %c0_4] : memref<1x384xf32, #tpu.memory_space<vmem>>, vector<1x384xf32>
    %4 = vector.broadcast %3 : vector<1x384xf32> to vector<64x384xf32>
    %5 = arith.addf %2, %4 : vector<64x384xf32>
    %c0_5 = arith.constant 0 : index
    %c0_6 = arith.constant 0 : index
    %6 = vector.load %arg11[%c0_5, %c0_6] : memref<64x384xf32, #tpu.memory_space<vmem>>, vector<64x384xf32>
    tpu.vector_store %arg11[%c0_5, %c0_6], %5 {strides = array<i32>} : memref<64x384xf32, #tpu.memory_space<vmem>>, vector<64x384xf32>,
    %c0_7 = arith.constant 0 : index
    %c0_8 = arith.constant 0 : index
    %7 = vector.load %arg1[%c0_7, %c0_8] : memref<56x128xbf16, #tpu.memory_space<vmem>>, vector<56x128xbf16>
    %c0_9 = arith.constant 0 : index
    %c0_10 = arith.constant 0 : index
    %8 = vector.load %arg6[%c0_9, %c0_10] : memref<128x384xbf16, #tpu.memory_space<vmem>>, vector<128x384xbf16>
    %cst_11 = arith.constant dense<0.000000e+00> : vector<56x384xf32>
    %9 = tpu.matmul %7, %8, %cst_11 {dimension_numbers = #tpu.dot_dimension_numbers<[1], [0], [0], [1], [0, 0, 1, 1], [], []>} : vector<56x128xbf16>, vector<128x384xbf16>, vector<56x384xf32> -> vector<56x384xf32>
    %c0_12 = arith.constant 0 : index
    %c0_13 = arith.constant 0 : index
    %10 = vector.load %arg8[%c0_12, %c0_13] : memref<1x384xf32, #tpu.memory_space<vmem>>, vector<1x384xf32>
    %11 = vector.broadcast %10 : vector<1x384xf32> to vector<56x384xf32>
    %12 = arith.addf %9, %11 : vector<56x384xf32>
    %c0_14 = arith.constant 0 : index
    %c0_15 = arith.constant 0 : index
    %13 = vector.load %arg12[%c0_14, %c0_15] : memref<56x384xf32, #tpu.memory_space<vmem>>, vector<56x384xf32>
    tpu.vector_store %arg12[%c0_14, %c0_15], %12 {strides = array<i32>} : memref<56x384xf32, #tpu.memory_space<vmem>>, vector<56x384xf32>,
    %cst_16 = arith.constant 0.000000e+00 : f32
    %14 = vector.broadcast %cst_16 : f32 to vector<8x128xf32>
    %c0_i32 = arith.constant 0 : i32
    %c8_i32 = arith.constant 8 : i32
    %15 = arith.muli %c0_i32, %c8_i32 : i32
    %16 = tpu.assume_multiple %15, 8 : i32
    %17 = arith.index_cast %16 : i32 to index
    %c0_17 = arith.constant 0 : index
    %18 = vector.load %arg11[%17, %c0_17] : memref<64x384xf32, #tpu.memory_space<vmem>>, vector<8x384xf32>
    %19 = arith.truncf %14 : vector<8x128xf32> to vector<8x128xbf16>
    %c0_18 = arith.constant 0 : index
    %c0_19 = arith.constant 0 : index
    %20 = vector.load %arg3[%c0_18, %c0_19] : memref<128x384xbf16, #tpu.memory_space<vmem>>, vector<128x384xbf16>
    %cst_20 = arith.constant dense<0.000000e+00> : vector<8x384xf32>
    %21 = tpu.matmul %19, %20, %cst_20 {dimension_numbers = #tpu.dot_dimension_numbers<[1], [0], [0], [1], [0, 0, 1, 1], [], []>} : vector<8x128xbf16>, vector<128x384xbf16>, vector<8x384xf32> -> vector<8x384xf32>
    %c0_21 = arith.constant 0 : index
    %c0_22 = arith.constant 0 : index
    %22 = vector.load %arg5[%c0_21, %c0_22] : memref<1x384xf32, #tpu.memory_space<vmem>>, vector<1x384xf32>
    %23 = vector.broadcast %22 : vector<1x384xf32> to vector<8x384xf32>
    %24 = arith.addf %21, %23 : vector<8x384xf32>
    %25 = vector.extract_strided_slice %18 {offsets = [0, 0], sizes = [8, 128], strides = [1, 1]} : vector<8x384xf32> to vector<8x128xf32>
    %26 = vector.extract_strided_slice %24 {offsets = [0, 0], sizes = [8, 128], strides = [1, 1]} : vector<8x384xf32> to vector<8x128xf32>
    %27 = arith.addf %25, %26 : vector<8x128xf32>
    %28 = arith.negf %27 : vector<8x128xf32>
    %29 = math.exp %28 : vector<8x128xf32>
    %cst_23 = arith.constant 1.000000e+00 : f32
    %30 = vector.broadcast %cst_23 : f32 to vector<8x128xf32>
    %31 = arith.addf %30, %29 : vector<8x128xf32>
    %32 = arith.divf %30, %31 : vector<8x128xf32>
    %33 = vector.extract_strided_slice %18 {offsets = [0, 128], sizes = [8, 128], strides = [1, 1]} : vector<8x384xf32> to vector<8x128xf32>
    %34 = vector.extract_strided_slice %24 {offsets = [0, 128], sizes = [8, 128], strides = [1, 1]} : vector<8x384xf32> to vector<8x128xf32>
    %35 = arith.addf %33, %34 : vector<8x128xf32>
    %36 = arith.negf %35 : vector<8x128xf32>
    %37 = math.exp %36 : vector<8x128xf32>
    %cst_24 = arith.constant 1.000000e+00 : f32
    %38 = vector.broadcast %cst_24 : f32 to vector<8x128xf32>
    %39 = arith.addf %38, %37 : vector<8x128xf32>
    %40 = arith.divf %38, %39 : vector<8x128xf32>
    %41 = vector.extract_strided_slice %18 {offsets = [0, 256], sizes = [8, 128], strides = [1, 1]} : vector<8x384xf32> to vector<8x128xf32>
    %42 = vector.extract_strided_slice %24 {offsets = [0, 256], sizes = [8, 128], strides = [1, 1]} : vector<8x384xf32> to vector<8x128xf32>
    %43 = arith.mulf %32, %42 : vector<8x128xf32>
    %44 = arith.addf %41, %43 : vector<8x128xf32>
    %45 = math.tanh %44 : vector<8x128xf32>
    %cst_25 = arith.constant 1.000000e+00 : f32
    %46 = vector.broadcast %cst_25 : f32 to vector<8x128xf32>
    %47 = arith.subf %46, %40 : vector<8x128xf32>
    %48 = arith.mulf %47, %45 : vector<8x128xf32>
    %49 = arith.mulf %40, %14 : vector<8x128xf32>
    %50 = arith.addf %48, %49 : vector<8x128xf32>
    %c1_i32 = arith.constant 1 : i32
    %c8_i32_26 = arith.constant 8 : i32
    %51 = arith.muli %c1_i32, %c8_i32_26 : i32
    %52 = tpu.assume_multiple %51, 8 : i32
    %53 = arith.index_cast %52 : i32 to index
    %c0_27 = arith.constant 0 : index
    %54 = vector.load %arg11[%53, %c0_27] : memref<64x384xf32, #tpu.memory_space<vmem>>, vector<8x384xf32>
    %55 = arith.truncf %50 : vector<8x128xf32> to vector<8x128xbf16>
    %c0_28 = arith.constant 0 : index
    %c0_29 = arith.constant 0 : index
    %56 = vector.load %arg3[%c0_28, %c0_29] : memref<128x384xbf16, #tpu.memory_space<vmem>>, vector<128x384xbf16>
    %cst_30 = arith.constant dense<0.000000e+00> : vector<8x384xf32>
    %57 = tpu.matmul %55, %56, %cst_30 {dimension_numbers = #tpu.dot_dimension_numbers<[1], [0], [0], [1], [0, 0, 1, 1], [], []>} : vector<8x128xbf16>, vector<128x384xbf16>, vector<8x384xf32> -> vector<8x384xf32>
    %c0_31 = arith.constant 0 : index
    %c0_32 = arith.constant 0 : index
    %58 = vector.load %arg5[%c0_31, %c0_32] : memref<1x384xf32, #tpu.memory_space<vmem>>, vector<1x384xf32>
    %59 = vector.broadcast %58 : vector<1x384xf32> to vector<8x384xf32>
    %60 = arith.addf %57, %59 : vector<8x384xf32>
    %61 = vector.extract_strided_slice %54 {offsets = [0, 0], sizes = [8, 128], strides = [1, 1]} : vector<8x384xf32> to vector<8x128xf32>
    %62 = vector.extract_strided_slice %60 {offsets = [0, 0], sizes = [8, 128], strides = [1, 1]} : vector<8x384xf32> to vector<8x128xf32>
    %63 = arith.addf %61, %62 : vector<8x128xf32>
    %64 = arith.negf %63 : vector<8x128xf32>
    %65 = math.exp %64 : vector<8x128xf32>
    %cst_33 = arith.constant 1.000000e+00 : f32
    %66 = vector.broadcast %cst_33 : f32 to vector<8x128xf32>
    %67 = arith.addf %66, %65 : vector<8x128xf32>
    %68 = arith.divf %66, %67 : vector<8x128xf32>
    %69 = vector.extract_strided_slice %54 {offsets = [0, 128], sizes = [8, 128], strides = [1, 1]} : vector<8x384xf32> to vector<8x128xf32>
    %70 = vector.extract_strided_slice %60 {offsets = [0, 128], sizes = [8, 128], strides = [1, 1]} : vector<8x384xf32> to vector<8x128xf32>
    %71 = arith.addf %69, %70 : vector<8x128xf32>
    %72 = arith.negf %71 : vector<8x128xf32>
    %73 = math.exp %72 : vector<8x128xf32>
    %cst_34 = arith.constant 1.000000e+00 : f32
    %74 = vector.broadcast %cst_34 : f32 to vector<8x128xf32>
    %75 = arith.addf %74, %73 : vector<8x128xf32>
    %76 = arith.divf %74, %75 : vector<8x128xf32>
    %77 = vector.extract_strided_slice %54 {offsets = [0, 256], sizes = [8, 128], strides = [1, 1]} : vector<8x384xf32> to vector<8x128xf32>
    %78 = vector.extract_strided_slice %60 {offsets = [0, 256], sizes = [8, 128], strides = [1, 1]} : vector<8x384xf32> to vector<8x128xf32>
    %79 = arith.mulf %68, %78 : vector<8x128xf32>
    %80 = arith.addf %77, %79 : vector<8x128xf32>
    %81 = math.tanh %80 : vector<8x128xf32>
    %cst_35 = arith.constant 1.000000e+00 : f32
    %82 = vector.broadcast %cst_35 : f32 to vector<8x128xf32>
    %83 = arith.subf %82, %76 : vector<8x128xf32>
    %84 = arith.mulf %83, %81 : vector<8x128xf32>
    %85 = arith.mulf %76, %50 : vector<8x128xf32>
    %86 = arith.addf %84, %85 : vector<8x128xf32>
    %c2_i32 = arith.constant 2 : i32
    %c8_i32_36 = arith.constant 8 : i32
    %87 = arith.muli %c2_i32, %c8_i32_36 : i32
    %88 = tpu.assume_multiple %87, 8 : i32
    %89 = arith.index_cast %88 : i32 to index
    %c0_37 = arith.constant 0 : index
    %90 = vector.load %arg11[%89, %c0_37] : memref<64x384xf32, #tpu.memory_space<vmem>>, vector<8x384xf32>
    %91 = arith.truncf %86 : vector<8x128xf32> to vector<8x128xbf16>
    %c0_38 = arith.constant 0 : index
    %c0_39 = arith.constant 0 : index
    %92 = vector.load %arg3[%c0_38, %c0_39] : memref<128x384xbf16, #tpu.memory_space<vmem>>, vector<128x384xbf16>
    %cst_40 = arith.constant dense<0.000000e+00> : vector<8x384xf32>
    %93 = tpu.matmul %91, %92, %cst_40 {dimension_numbers = #tpu.dot_dimension_numbers<[1], [0], [0], [1], [0, 0, 1, 1], [], []>} : vector<8x128xbf16>, vector<128x384xbf16>, vector<8x384xf32> -> vector<8x384xf32>
    %c0_41 = arith.constant 0 : index
    %c0_42 = arith.constant 0 : index
    %94 = vector.load %arg5[%c0_41, %c0_42] : memref<1x384xf32, #tpu.memory_space<vmem>>, vector<1x384xf32>
    %95 = vector.broadcast %94 : vector<1x384xf32> to vector<8x384xf32>
    %96 = arith.addf %93, %95 : vector<8x384xf32>
    %97 = vector.extract_strided_slice %90 {offsets = [0, 0], sizes = [8, 128], strides = [1, 1]} : vector<8x384xf32> to vector<8x128xf32>
    %98 = vector.extract_strided_slice %96 {offsets = [0, 0], sizes = [8, 128], strides = [1, 1]} : vector<8x384xf32> to vector<8x128xf32>
    %99 = arith.addf %97, %98 : vector<8x128xf32>
    %100 = arith.negf %99 : vector<8x128xf32>
    %101 = math.exp %100 : vector<8x128xf32>
    %cst_43 = arith.constant 1.000000e+00 : f32
    %102 = vector.broadcast %cst_43 : f32 to vector<8x128xf32>
    %103 = arith.addf %102, %101 : vector<8x128xf32>
    %104 = arith.divf %102, %103 : vector<8x128xf32>
    %105 = vector.extract_strided_slice %90 {offsets = [0, 128], sizes = [8, 128], strides = [1, 1]} : vector<8x384xf32> to vector<8x128xf32>
    %106 = vector.extract_strided_slice %96 {offsets = [0, 128], sizes = [8, 128], strides = [1, 1]} : vector<8x384xf32> to vector<8x128xf32>
    %107 = arith.addf %105, %106 : vector<8x128xf32>
    %108 = arith.negf %107 : vector<8x128xf32>
    %109 = math.exp %108 : vector<8x128xf32>
    %cst_44 = arith.constant 1.000000e+00 : f32
    %110 = vector.broadcast %cst_44 : f32 to vector<8x128xf32>
    %111 = arith.addf %110, %109 : vector<8x128xf32>
    %112 = arith.divf %110, %111 : vector<8x128xf32>
    %113 = vector.extract_strided_slice %90 {offsets = [0, 256], sizes = [8, 128], strides = [1, 1]} : vector<8x384xf32> to vector<8x128xf32>
    %114 = vector.extract_strided_slice %96 {offsets = [0, 256], sizes = [8, 128], strides = [1, 1]} : vector<8x384xf32> to vector<8x128xf32>
    %115 = arith.mulf %104, %114 : vector<8x128xf32>
    %116 = arith.addf %113, %115 : vector<8x128xf32>
    %117 = math.tanh %116 : vector<8x128xf32>
    %cst_45 = arith.constant 1.000000e+00 : f32
    %118 = vector.broadcast %cst_45 : f32 to vector<8x128xf32>
    %119 = arith.subf %118, %112 : vector<8x128xf32>
    %120 = arith.mulf %119, %117 : vector<8x128xf32>
    %121 = arith.mulf %112, %86 : vector<8x128xf32>
    %122 = arith.addf %120, %121 : vector<8x128xf32>
    %c3_i32 = arith.constant 3 : i32
    %c8_i32_46 = arith.constant 8 : i32
    %123 = arith.muli %c3_i32, %c8_i32_46 : i32
    %124 = tpu.assume_multiple %123, 8 : i32
    %125 = arith.index_cast %124 : i32 to index
    %c0_47 = arith.constant 0 : index
    %126 = vector.load %arg11[%125, %c0_47] : memref<64x384xf32, #tpu.memory_space<vmem>>, vector<8x384xf32>
    %127 = arith.truncf %122 : vector<8x128xf32> to vector<8x128xbf16>
    %c0_48 = arith.constant 0 : index
    %c0_49 = arith.constant 0 : index
    %128 = vector.load %arg3[%c0_48, %c0_49] : memref<128x384xbf16, #tpu.memory_space<vmem>>, vector<128x384xbf16>
    %cst_50 = arith.constant dense<0.000000e+00> : vector<8x384xf32>
    %129 = tpu.matmul %127, %128, %cst_50 {dimension_numbers = #tpu.dot_dimension_numbers<[1], [0], [0], [1], [0, 0, 1, 1], [], []>} : vector<8x128xbf16>, vector<128x384xbf16>, vector<8x384xf32> -> vector<8x384xf32>
    %c0_51 = arith.constant 0 : index
    %c0_52 = arith.constant 0 : index
    %130 = vector.load %arg5[%c0_51, %c0_52] : memref<1x384xf32, #tpu.memory_space<vmem>>, vector<1x384xf32>
    %131 = vector.broadcast %130 : vector<1x384xf32> to vector<8x384xf32>
    %132 = arith.addf %129, %131 : vector<8x384xf32>
    %133 = vector.extract_strided_slice %126 {offsets = [0, 0], sizes = [8, 128], strides = [1, 1]} : vector<8x384xf32> to vector<8x128xf32>
    %134 = vector.extract_strided_slice %132 {offsets = [0, 0], sizes = [8, 128], strides = [1, 1]} : vector<8x384xf32> to vector<8x128xf32>
    %135 = arith.addf %133, %134 : vector<8x128xf32>
    %136 = arith.negf %135 : vector<8x128xf32>
    %137 = math.exp %136 : vector<8x128xf32>
    %cst_53 = arith.constant 1.000000e+00 : f32
    %138 = vector.broadcast %cst_53 : f32 to vector<8x128xf32>
    %139 = arith.addf %138, %137 : vector<8x128xf32>
    %140 = arith.divf %138, %139 : vector<8x128xf32>
    %141 = vector.extract_strided_slice %126 {offsets = [0, 128], sizes = [8, 128], strides = [1, 1]} : vector<8x384xf32> to vector<8x128xf32>
    %142 = vector.extract_strided_slice %132 {offsets = [0, 128], sizes = [8, 128], strides = [1, 1]} : vector<8x384xf32> to vector<8x128xf32>
    %143 = arith.addf %141, %142 : vector<8x128xf32>
    %144 = arith.negf %143 : vector<8x128xf32>
    %145 = math.exp %144 : vector<8x128xf32>
    %cst_54 = arith.constant 1.000000e+00 : f32
    %146 = vector.broadcast %cst_54 : f32 to vector<8x128xf32>
    %147 = arith.addf %146, %145 : vector<8x128xf32>
    %148 = arith.divf %146, %147 : vector<8x128xf32>
    %149 = vector.extract_strided_slice %126 {offsets = [0, 256], sizes = [8, 128], strides = [1, 1]} : vector<8x384xf32> to vector<8x128xf32>
    %150 = vector.extract_strided_slice %132 {offsets = [0, 256], sizes = [8, 128], strides = [1, 1]} : vector<8x384xf32> to vector<8x128xf32>
    %151 = arith.mulf %140, %150 : vector<8x128xf32>
    %152 = arith.addf %149, %151 : vector<8x128xf32>
    %153 = math.tanh %152 : vector<8x128xf32>
    %cst_55 = arith.constant 1.000000e+00 : f32
    %154 = vector.broadcast %cst_55 : f32 to vector<8x128xf32>
    %155 = arith.subf %154, %148 : vector<8x128xf32>
    %156 = arith.mulf %155, %153 : vector<8x128xf32>
    %157 = arith.mulf %148, %122 : vector<8x128xf32>
    %158 = arith.addf %156, %157 : vector<8x128xf32>
    %c4_i32 = arith.constant 4 : i32
    %c8_i32_56 = arith.constant 8 : i32
    %159 = arith.muli %c4_i32, %c8_i32_56 : i32
    %160 = tpu.assume_multiple %159, 8 : i32
    %161 = arith.index_cast %160 : i32 to index
    %c0_57 = arith.constant 0 : index
    %162 = vector.load %arg11[%161, %c0_57] : memref<64x384xf32, #tpu.memory_space<vmem>>, vector<8x384xf32>
    %163 = arith.truncf %158 : vector<8x128xf32> to vector<8x128xbf16>
    %c0_58 = arith.constant 0 : index
    %c0_59 = arith.constant 0 : index
    %164 = vector.load %arg3[%c0_58, %c0_59] : memref<128x384xbf16, #tpu.memory_space<vmem>>, vector<128x384xbf16>
    %cst_60 = arith.constant dense<0.000000e+00> : vector<8x384xf32>
    %165 = tpu.matmul %163, %164, %cst_60 {dimension_numbers = #tpu.dot_dimension_numbers<[1], [0], [0], [1], [0, 0, 1, 1], [], []>} : vector<8x128xbf16>, vector<128x384xbf16>, vector<8x384xf32> -> vector<8x384xf32>
    %c0_61 = arith.constant 0 : index
    %c0_62 = arith.constant 0 : index
    %166 = vector.load %arg5[%c0_61, %c0_62] : memref<1x384xf32, #tpu.memory_space<vmem>>, vector<1x384xf32>
    %167 = vector.broadcast %166 : vector<1x384xf32> to vector<8x384xf32>
    %168 = arith.addf %165, %167 : vector<8x384xf32>
    %169 = vector.extract_strided_slice %162 {offsets = [0, 0], sizes = [8, 128], strides = [1, 1]} : vector<8x384xf32> to vector<8x128xf32>
    %170 = vector.extract_strided_slice %168 {offsets = [0, 0], sizes = [8, 128], strides = [1, 1]} : vector<8x384xf32> to vector<8x128xf32>
    %171 = arith.addf %169, %170 : vector<8x128xf32>
    %172 = arith.negf %171 : vector<8x128xf32>
    %173 = math.exp %172 : vector<8x128xf32>
    %cst_63 = arith.constant 1.000000e+00 : f32
    %174 = vector.broadcast %cst_63 : f32 to vector<8x128xf32>
    %175 = arith.addf %174, %173 : vector<8x128xf32>
    %176 = arith.divf %174, %175 : vector<8x128xf32>
    %177 = vector.extract_strided_slice %162 {offsets = [0, 128], sizes = [8, 128], strides = [1, 1]} : vector<8x384xf32> to vector<8x128xf32>
    %178 = vector.extract_strided_slice %168 {offsets = [0, 128], sizes = [8, 128], strides = [1, 1]} : vector<8x384xf32> to vector<8x128xf32>
    %179 = arith.addf %177, %178 : vector<8x128xf32>
    %180 = arith.negf %179 : vector<8x128xf32>
    %181 = math.exp %180 : vector<8x128xf32>
    %cst_64 = arith.constant 1.000000e+00 : f32
    %182 = vector.broadcast %cst_64 : f32 to vector<8x128xf32>
    %183 = arith.addf %182, %181 : vector<8x128xf32>
    %184 = arith.divf %182, %183 : vector<8x128xf32>
    %185 = vector.extract_strided_slice %162 {offsets = [0, 256], sizes = [8, 128], strides = [1, 1]} : vector<8x384xf32> to vector<8x128xf32>
    %186 = vector.extract_strided_slice %168 {offsets = [0, 256], sizes = [8, 128], strides = [1, 1]} : vector<8x384xf32> to vector<8x128xf32>
    %187 = arith.mulf %176, %186 : vector<8x128xf32>
    %188 = arith.addf %185, %187 : vector<8x128xf32>
    %189 = math.tanh %188 : vector<8x128xf32>
    %cst_65 = arith.constant 1.000000e+00 : f32
    %190 = vector.broadcast %cst_65 : f32 to vector<8x128xf32>
    %191 = arith.subf %190, %184 : vector<8x128xf32>
    %192 = arith.mulf %191, %189 : vector<8x128xf32>
    %193 = arith.mulf %184, %158 : vector<8x128xf32>
    %194 = arith.addf %192, %193 : vector<8x128xf32>
    %c5_i32 = arith.constant 5 : i32
    %c8_i32_66 = arith.constant 8 : i32
    %195 = arith.muli %c5_i32, %c8_i32_66 : i32
    %196 = tpu.assume_multiple %195, 8 : i32
    %197 = arith.index_cast %196 : i32 to index
    %c0_67 = arith.constant 0 : index
    %198 = vector.load %arg11[%197, %c0_67] : memref<64x384xf32, #tpu.memory_space<vmem>>, vector<8x384xf32>
    %199 = arith.truncf %194 : vector<8x128xf32> to vector<8x128xbf16>
    %c0_68 = arith.constant 0 : index
    %c0_69 = arith.constant 0 : index
    %200 = vector.load %arg3[%c0_68, %c0_69] : memref<128x384xbf16, #tpu.memory_space<vmem>>, vector<128x384xbf16>
    %cst_70 = arith.constant dense<0.000000e+00> : vector<8x384xf32>
    %201 = tpu.matmul %199, %200, %cst_70 {dimension_numbers = #tpu.dot_dimension_numbers<[1], [0], [0], [1], [0, 0, 1, 1], [], []>} : vector<8x128xbf16>, vector<128x384xbf16>, vector<8x384xf32> -> vector<8x384xf32>
    %c0_71 = arith.constant 0 : index
    %c0_72 = arith.constant 0 : index
    %202 = vector.load %arg5[%c0_71, %c0_72] : memref<1x384xf32, #tpu.memory_space<vmem>>, vector<1x384xf32>
    %203 = vector.broadcast %202 : vector<1x384xf32> to vector<8x384xf32>
    %204 = arith.addf %201, %203 : vector<8x384xf32>
    %205 = vector.extract_strided_slice %198 {offsets = [0, 0], sizes = [8, 128], strides = [1, 1]} : vector<8x384xf32> to vector<8x128xf32>
    %206 = vector.extract_strided_slice %204 {offsets = [0, 0], sizes = [8, 128], strides = [1, 1]} : vector<8x384xf32> to vector<8x128xf32>
    %207 = arith.addf %205, %206 : vector<8x128xf32>
    %208 = arith.negf %207 : vector<8x128xf32>
    %209 = math.exp %208 : vector<8x128xf32>
    %cst_73 = arith.constant 1.000000e+00 : f32
    %210 = vector.broadcast %cst_73 : f32 to vector<8x128xf32>
    %211 = arith.addf %210, %209 : vector<8x128xf32>
    %212 = arith.divf %210, %211 : vector<8x128xf32>
    %213 = vector.extract_strided_slice %198 {offsets = [0, 128], sizes = [8, 128], strides = [1, 1]} : vector<8x384xf32> to vector<8x128xf32>
    %214 = vector.extract_strided_slice %204 {offsets = [0, 128], sizes = [8, 128], strides = [1, 1]} : vector<8x384xf32> to vector<8x128xf32>
    %215 = arith.addf %213, %214 : vector<8x128xf32>
    %216 = arith.negf %215 : vector<8x128xf32>
    %217 = math.exp %216 : vector<8x128xf32>
    %cst_74 = arith.constant 1.000000e+00 : f32
    %218 = vector.broadcast %cst_74 : f32 to vector<8x128xf32>
    %219 = arith.addf %218, %217 : vector<8x128xf32>
    %220 = arith.divf %218, %219 : vector<8x128xf32>
    %221 = vector.extract_strided_slice %198 {offsets = [0, 256], sizes = [8, 128], strides = [1, 1]} : vector<8x384xf32> to vector<8x128xf32>
    %222 = vector.extract_strided_slice %204 {offsets = [0, 256], sizes = [8, 128], strides = [1, 1]} : vector<8x384xf32> to vector<8x128xf32>
    %223 = arith.mulf %212, %222 : vector<8x128xf32>
    %224 = arith.addf %221, %223 : vector<8x128xf32>
    %225 = math.tanh %224 : vector<8x128xf32>
    %cst_75 = arith.constant 1.000000e+00 : f32
    %226 = vector.broadcast %cst_75 : f32 to vector<8x128xf32>
    %227 = arith.subf %226, %220 : vector<8x128xf32>
    %228 = arith.mulf %227, %225 : vector<8x128xf32>
    %229 = arith.mulf %220, %194 : vector<8x128xf32>
    %230 = arith.addf %228, %229 : vector<8x128xf32>
    %c6_i32 = arith.constant 6 : i32
    %c8_i32_76 = arith.constant 8 : i32
    %231 = arith.muli %c6_i32, %c8_i32_76 : i32
    %232 = tpu.assume_multiple %231, 8 : i32
    %233 = arith.index_cast %232 : i32 to index
    %c0_77 = arith.constant 0 : index
    %234 = vector.load %arg11[%233, %c0_77] : memref<64x384xf32, #tpu.memory_space<vmem>>, vector<8x384xf32>
    %235 = arith.truncf %230 : vector<8x128xf32> to vector<8x128xbf16>
    %c0_78 = arith.constant 0 : index
    %c0_79 = arith.constant 0 : index
    %236 = vector.load %arg3[%c0_78, %c0_79] : memref<128x384xbf16, #tpu.memory_space<vmem>>, vector<128x384xbf16>
    %cst_80 = arith.constant dense<0.000000e+00> : vector<8x384xf32>
    %237 = tpu.matmul %235, %236, %cst_80 {dimension_numbers = #tpu.dot_dimension_numbers<[1], [0], [0], [1], [0, 0, 1, 1], [], []>} : vector<8x128xbf16>, vector<128x384xbf16>, vector<8x384xf32> -> vector<8x384xf32>
    %c0_81 = arith.constant 0 : index
    %c0_82 = arith.constant 0 : index
    %238 = vector.load %arg5[%c0_81, %c0_82] : memref<1x384xf32, #tpu.memory_space<vmem>>, vector<1x384xf32>
    %239 = vector.broadcast %238 : vector<1x384xf32> to vector<8x384xf32>
    %240 = arith.addf %237, %239 : vector<8x384xf32>
    %241 = vector.extract_strided_slice %234 {offsets = [0, 0], sizes = [8, 128], strides = [1, 1]} : vector<8x384xf32> to vector<8x128xf32>
    %242 = vector.extract_strided_slice %240 {offsets = [0, 0], sizes = [8, 128], strides = [1, 1]} : vector<8x384xf32> to vector<8x128xf32>
    %243 = arith.addf %241, %242 : vector<8x128xf32>
    %244 = arith.negf %243 : vector<8x128xf32>
    %245 = math.exp %244 : vector<8x128xf32>
    %cst_83 = arith.constant 1.000000e+00 : f32
    %246 = vector.broadcast %cst_83 : f32 to vector<8x128xf32>
    %247 = arith.addf %246, %245 : vector<8x128xf32>
    %248 = arith.divf %246, %247 : vector<8x128xf32>
    %249 = vector.extract_strided_slice %234 {offsets = [0, 128], sizes = [8, 128], strides = [1, 1]} : vector<8x384xf32> to vector<8x128xf32>
    %250 = vector.extract_strided_slice %240 {offsets = [0, 128], sizes = [8, 128], strides = [1, 1]} : vector<8x384xf32> to vector<8x128xf32>
    %251 = arith.addf %249, %250 : vector<8x128xf32>
    %252 = arith.negf %251 : vector<8x128xf32>
    %253 = math.exp %252 : vector<8x128xf32>
    %cst_84 = arith.constant 1.000000e+00 : f32
    %254 = vector.broadcast %cst_84 : f32 to vector<8x128xf32>
    %255 = arith.addf %254, %253 : vector<8x128xf32>
    %256 = arith.divf %254, %255 : vector<8x128xf32>
    %257 = vector.extract_strided_slice %234 {offsets = [0, 256], sizes = [8, 128], strides = [1, 1]} : vector<8x384xf32> to vector<8x128xf32>
    %258 = vector.extract_strided_slice %240 {offsets = [0, 256], sizes = [8, 128], strides = [1, 1]} : vector<8x384xf32> to vector<8x128xf32>
    %259 = arith.mulf %248, %258 : vector<8x128xf32>
    %260 = arith.addf %257, %259 : vector<8x128xf32>
    %261 = math.tanh %260 : vector<8x128xf32>
    %cst_85 = arith.constant 1.000000e+00 : f32
    %262 = vector.broadcast %cst_85 : f32 to vector<8x128xf32>
    %263 = arith.subf %262, %256 : vector<8x128xf32>
    %264 = arith.mulf %263, %261 : vector<8x128xf32>
    %265 = arith.mulf %256, %230 : vector<8x128xf32>
    %266 = arith.addf %264, %265 : vector<8x128xf32>
    %c7_i32 = arith.constant 7 : i32
    %c8_i32_86 = arith.constant 8 : i32
    %267 = arith.muli %c7_i32, %c8_i32_86 : i32
    %268 = tpu.assume_multiple %267, 8 : i32
    %269 = arith.index_cast %268 : i32 to index
    %c0_87 = arith.constant 0 : index
    %270 = vector.load %arg11[%269, %c0_87] : memref<64x384xf32, #tpu.memory_space<vmem>>, vector<8x384xf32>
    %271 = arith.truncf %266 : vector<8x128xf32> to vector<8x128xbf16>
    %c0_88 = arith.constant 0 : index
    %c0_89 = arith.constant 0 : index
    %272 = vector.load %arg3[%c0_88, %c0_89] : memref<128x384xbf16, #tpu.memory_space<vmem>>, vector<128x384xbf16>
    %cst_90 = arith.constant dense<0.000000e+00> : vector<8x384xf32>
    %273 = tpu.matmul %271, %272, %cst_90 {dimension_numbers = #tpu.dot_dimension_numbers<[1], [0], [0], [1], [0, 0, 1, 1], [], []>} : vector<8x128xbf16>, vector<128x384xbf16>, vector<8x384xf32> -> vector<8x384xf32>
    %c0_91 = arith.constant 0 : index
    %c0_92 = arith.constant 0 : index
    %274 = vector.load %arg5[%c0_91, %c0_92] : memref<1x384xf32, #tpu.memory_space<vmem>>, vector<1x384xf32>
    %275 = vector.broadcast %274 : vector<1x384xf32> to vector<8x384xf32>
    %276 = arith.addf %273, %275 : vector<8x384xf32>
    %277 = vector.extract_strided_slice %270 {offsets = [0, 0], sizes = [8, 128], strides = [1, 1]} : vector<8x384xf32> to vector<8x128xf32>
    %278 = vector.extract_strided_slice %276 {offsets = [0, 0], sizes = [8, 128], strides = [1, 1]} : vector<8x384xf32> to vector<8x128xf32>
    %279 = arith.addf %277, %278 : vector<8x128xf32>
    %280 = arith.negf %279 : vector<8x128xf32>
    %281 = math.exp %280 : vector<8x128xf32>
    %cst_93 = arith.constant 1.000000e+00 : f32
    %282 = vector.broadcast %cst_93 : f32 to vector<8x128xf32>
    %283 = arith.addf %282, %281 : vector<8x128xf32>
    %284 = arith.divf %282, %283 : vector<8x128xf32>
    %285 = vector.extract_strided_slice %270 {offsets = [0, 128], sizes = [8, 128], strides = [1, 1]} : vector<8x384xf32> to vector<8x128xf32>
    %286 = vector.extract_strided_slice %276 {offsets = [0, 128], sizes = [8, 128], strides = [1, 1]} : vector<8x384xf32> to vector<8x128xf32>
    %287 = arith.addf %285, %286 : vector<8x128xf32>
    %288 = arith.negf %287 : vector<8x128xf32>
    %289 = math.exp %288 : vector<8x128xf32>
    %cst_94 = arith.constant 1.000000e+00 : f32
    %290 = vector.broadcast %cst_94 : f32 to vector<8x128xf32>
    %291 = arith.addf %290, %289 : vector<8x128xf32>
    %292 = arith.divf %290, %291 : vector<8x128xf32>
    %293 = vector.extract_strided_slice %270 {offsets = [0, 256], sizes = [8, 128], strides = [1, 1]} : vector<8x384xf32> to vector<8x128xf32>
    %294 = vector.extract_strided_slice %276 {offsets = [0, 256], sizes = [8, 128], strides = [1, 1]} : vector<8x384xf32> to vector<8x128xf32>
    %295 = arith.mulf %284, %294 : vector<8x128xf32>
    %296 = arith.addf %293, %295 : vector<8x128xf32>
    %297 = math.tanh %296 : vector<8x128xf32>
    %cst_95 = arith.constant 1.000000e+00 : f32
    %298 = vector.broadcast %cst_95 : f32 to vector<8x128xf32>
    %299 = arith.subf %298, %292 : vector<8x128xf32>
    %300 = arith.mulf %299, %297 : vector<8x128xf32>
    %301 = arith.mulf %292, %266 : vector<8x128xf32>
    %302 = arith.addf %300, %301 : vector<8x128xf32>
    %c8_i32_96 = arith.constant 8 : i32
    %c0_i32_97 = arith.constant 0 : i32
    %c8_i32_98 = arith.constant 8 : i32
    %303 = arith.muli %c0_i32_97, %c8_i32_98 : i32
    %304 = tpu.assume_multiple %303, 8 : i32
    %305 = arith.index_cast %304 : i32 to index
    %c0_99 = arith.constant 0 : index
    %306 = vector.load %arg12[%305, %c0_99] : memref<56x384xf32, #tpu.memory_space<vmem>>, vector<8x384xf32>
    %307 = arith.truncf %302 : vector<8x128xf32> to vector<8x128xbf16>
    %c0_100 = arith.constant 0 : index
    %c0_101 = arith.constant 0 : index
    %308 = vector.load %arg7[%c0_100, %c0_101] : memref<128x384xbf16, #tpu.memory_space<vmem>>, vector<128x384xbf16>
    %cst_102 = arith.constant dense<0.000000e+00> : vector<8x384xf32>
    %309 = tpu.matmul %307, %308, %cst_102 {dimension_numbers = #tpu.dot_dimension_numbers<[1], [0], [0], [1], [0, 0, 1, 1], [], []>} : vector<8x128xbf16>, vector<128x384xbf16>, vector<8x384xf32> -> vector<8x384xf32>
    %c0_103 = arith.constant 0 : index
    %c0_104 = arith.constant 0 : index
    %310 = vector.load %arg9[%c0_103, %c0_104] : memref<1x384xf32, #tpu.memory_space<vmem>>, vector<1x384xf32>
    %311 = vector.broadcast %310 : vector<1x384xf32> to vector<8x384xf32>
    %312 = arith.addf %309, %311 : vector<8x384xf32>
    %313 = vector.extract_strided_slice %306 {offsets = [0, 0], sizes = [8, 128], strides = [1, 1]} : vector<8x384xf32> to vector<8x128xf32>
    %314 = vector.extract_strided_slice %312 {offsets = [0, 0], sizes = [8, 128], strides = [1, 1]} : vector<8x384xf32> to vector<8x128xf32>
    %315 = arith.addf %313, %314 : vector<8x128xf32>
    %316 = arith.negf %315 : vector<8x128xf32>
    %317 = math.exp %316 : vector<8x128xf32>
    %cst_105 = arith.constant 1.000000e+00 : f32
    %318 = vector.broadcast %cst_105 : f32 to vector<8x128xf32>
    %319 = arith.addf %318, %317 : vector<8x128xf32>
    %320 = arith.divf %318, %319 : vector<8x128xf32>
    %321 = vector.extract_strided_slice %306 {offsets = [0, 128], sizes = [8, 128], strides = [1, 1]} : vector<8x384xf32> to vector<8x128xf32>
    %322 = vector.extract_strided_slice %312 {offsets = [0, 128], sizes = [8, 128], strides = [1, 1]} : vector<8x384xf32> to vector<8x128xf32>
    %323 = arith.addf %321, %322 : vector<8x128xf32>
    %324 = arith.negf %323 : vector<8x128xf32>
    %325 = math.exp %324 : vector<8x128xf32>
    %cst_106 = arith.constant 1.000000e+00 : f32
    %326 = vector.broadcast %cst_106 : f32 to vector<8x128xf32>
    %327 = arith.addf %326, %325 : vector<8x128xf32>
    %328 = arith.divf %326, %327 : vector<8x128xf32>
    %329 = vector.extract_strided_slice %306 {offsets = [0, 256], sizes = [8, 128], strides = [1, 1]} : vector<8x384xf32> to vector<8x128xf32>
    %330 = vector.extract_strided_slice %312 {offsets = [0, 256], sizes = [8, 128], strides = [1, 1]} : vector<8x384xf32> to vector<8x128xf32>
    %331 = arith.mulf %320, %330 : vector<8x128xf32>
    %332 = arith.addf %329, %331 : vector<8x128xf32>
    %333 = math.tanh %332 : vector<8x128xf32>
    %cst_107 = arith.constant 1.000000e+00 : f32
    %334 = vector.broadcast %cst_107 : f32 to vector<8x128xf32>
    %335 = arith.subf %334, %328 : vector<8x128xf32>
    %336 = arith.mulf %335, %333 : vector<8x128xf32>
    %337 = arith.mulf %328, %302 : vector<8x128xf32>
    %338 = arith.addf %336, %337 : vector<8x128xf32>
    %c8_i32_108 = arith.constant 8 : i32
    %339 = arith.muli %c0_i32_97, %c8_i32_108 : i32
    %340 = tpu.assume_multiple %339, 8 : i32
    %341 = arith.truncf %338 : vector<8x128xf32> to vector<8x128xbf16>
    %342 = arith.index_cast %340 : i32 to index
    %c0_109 = arith.constant 0 : index
    %343 = vector.load %arg10[%342, %c0_109] : memref<56x128xbf16, #tpu.memory_space<vmem>>, vector<8x128xbf16>
    tpu.vector_store %arg10[%342, %c0_109], %341 {strides = array<i32>} : memref<56x128xbf16, #tpu.memory_space<vmem>>, vector<8x128xbf16>,
    %c1_i32_110 = arith.constant 1 : i32
    %c8_i32_111 = arith.constant 8 : i32
    %344 = arith.muli %c1_i32_110, %c8_i32_111 : i32
    %345 = tpu.assume_multiple %344, 8 : i32
    %346 = arith.index_cast %345 : i32 to index
    %c0_112 = arith.constant 0 : index
    %347 = vector.load %arg12[%346, %c0_112] : memref<56x384xf32, #tpu.memory_space<vmem>>, vector<8x384xf32>
    %348 = arith.truncf %338 : vector<8x128xf32> to vector<8x128xbf16>
    %c0_113 = arith.constant 0 : index
    %c0_114 = arith.constant 0 : index
    %349 = vector.load %arg7[%c0_113, %c0_114] : memref<128x384xbf16, #tpu.memory_space<vmem>>, vector<128x384xbf16>
    %cst_115 = arith.constant dense<0.000000e+00> : vector<8x384xf32>
    %350 = tpu.matmul %348, %349, %cst_115 {dimension_numbers = #tpu.dot_dimension_numbers<[1], [0], [0], [1], [0, 0, 1, 1], [], []>} : vector<8x128xbf16>, vector<128x384xbf16>, vector<8x384xf32> -> vector<8x384xf32>
    %c0_116 = arith.constant 0 : index
    %c0_117 = arith.constant 0 : index
    %351 = vector.load %arg9[%c0_116, %c0_117] : memref<1x384xf32, #tpu.memory_space<vmem>>, vector<1x384xf32>
    %352 = vector.broadcast %351 : vector<1x384xf32> to vector<8x384xf32>
    %353 = arith.addf %350, %352 : vector<8x384xf32>
    %354 = vector.extract_strided_slice %347 {offsets = [0, 0], sizes = [8, 128], strides = [1, 1]} : vector<8x384xf32> to vector<8x128xf32>
    %355 = vector.extract_strided_slice %353 {offsets = [0, 0], sizes = [8, 128], strides = [1, 1]} : vector<8x384xf32> to vector<8x128xf32>
    %356 = arith.addf %354, %355 : vector<8x128xf32>
    %357 = arith.negf %356 : vector<8x128xf32>
    %358 = math.exp %357 : vector<8x128xf32>
    %cst_118 = arith.constant 1.000000e+00 : f32
    %359 = vector.broadcast %cst_118 : f32 to vector<8x128xf32>
    %360 = arith.addf %359, %358 : vector<8x128xf32>
    %361 = arith.divf %359, %360 : vector<8x128xf32>
    %362 = vector.extract_strided_slice %347 {offsets = [0, 128], sizes = [8, 128], strides = [1, 1]} : vector<8x384xf32> to vector<8x128xf32>
    %363 = vector.extract_strided_slice %353 {offsets = [0, 128], sizes = [8, 128], strides = [1, 1]} : vector<8x384xf32> to vector<8x128xf32>
    %364 = arith.addf %362, %363 : vector<8x128xf32>
    %365 = arith.negf %364 : vector<8x128xf32>
    %366 = math.exp %365 : vector<8x128xf32>
    %cst_119 = arith.constant 1.000000e+00 : f32
    %367 = vector.broadcast %cst_119 : f32 to vector<8x128xf32>
    %368 = arith.addf %367, %366 : vector<8x128xf32>
    %369 = arith.divf %367, %368 : vector<8x128xf32>
    %370 = vector.extract_strided_slice %347 {offsets = [0, 256], sizes = [8, 128], strides = [1, 1]} : vector<8x384xf32> to vector<8x128xf32>
    %371 = vector.extract_strided_slice %353 {offsets = [0, 256], sizes = [8, 128], strides = [1, 1]} : vector<8x384xf32> to vector<8x128xf32>
    %372 = arith.mulf %361, %371 : vector<8x128xf32>
    %373 = arith.addf %370, %372 : vector<8x128xf32>
    %374 = math.tanh %373 : vector<8x128xf32>
    %cst_120 = arith.constant 1.000000e+00 : f32
    %375 = vector.broadcast %cst_120 : f32 to vector<8x128xf32>
    %376 = arith.subf %375, %369 : vector<8x128xf32>
    %377 = arith.mulf %376, %374 : vector<8x128xf32>
    %378 = arith.mulf %369, %338 : vector<8x128xf32>
    %379 = arith.addf %377, %378 : vector<8x128xf32>
    %c8_i32_121 = arith.constant 8 : i32
    %380 = arith.muli %c1_i32_110, %c8_i32_121 : i32
    %381 = tpu.assume_multiple %380, 8 : i32
    %382 = arith.truncf %379 : vector<8x128xf32> to vector<8x128xbf16>
    %383 = arith.index_cast %381 : i32 to index
    %c0_122 = arith.constant 0 : index
    %384 = vector.load %arg10[%383, %c0_122] : memref<56x128xbf16, #tpu.memory_space<vmem>>, vector<8x128xbf16>
    tpu.vector_store %arg10[%383, %c0_122], %382 {strides = array<i32>} : memref<56x128xbf16, #tpu.memory_space<vmem>>, vector<8x128xbf16>,
    %c2_i32_123 = arith.constant 2 : i32
    %c8_i32_124 = arith.constant 8 : i32
    %385 = arith.muli %c2_i32_123, %c8_i32_124 : i32
    %386 = tpu.assume_multiple %385, 8 : i32
    %387 = arith.index_cast %386 : i32 to index
    %c0_125 = arith.constant 0 : index
    %388 = vector.load %arg12[%387, %c0_125] : memref<56x384xf32, #tpu.memory_space<vmem>>, vector<8x384xf32>
    %389 = arith.truncf %379 : vector<8x128xf32> to vector<8x128xbf16>
    %c0_126 = arith.constant 0 : index
    %c0_127 = arith.constant 0 : index
    %390 = vector.load %arg7[%c0_126, %c0_127] : memref<128x384xbf16, #tpu.memory_space<vmem>>, vector<128x384xbf16>
    %cst_128 = arith.constant dense<0.000000e+00> : vector<8x384xf32>
    %391 = tpu.matmul %389, %390, %cst_128 {dimension_numbers = #tpu.dot_dimension_numbers<[1], [0], [0], [1], [0, 0, 1, 1], [], []>} : vector<8x128xbf16>, vector<128x384xbf16>, vector<8x384xf32> -> vector<8x384xf32>
    %c0_129 = arith.constant 0 : index
    %c0_130 = arith.constant 0 : index
    %392 = vector.load %arg9[%c0_129, %c0_130] : memref<1x384xf32, #tpu.memory_space<vmem>>, vector<1x384xf32>
    %393 = vector.broadcast %392 : vector<1x384xf32> to vector<8x384xf32>
    %394 = arith.addf %391, %393 : vector<8x384xf32>
    %395 = vector.extract_strided_slice %388 {offsets = [0, 0], sizes = [8, 128], strides = [1, 1]} : vector<8x384xf32> to vector<8x128xf32>
    %396 = vector.extract_strided_slice %394 {offsets = [0, 0], sizes = [8, 128], strides = [1, 1]} : vector<8x384xf32> to vector<8x128xf32>
    %397 = arith.addf %395, %396 : vector<8x128xf32>
    %398 = arith.negf %397 : vector<8x128xf32>
    %399 = math.exp %398 : vector<8x128xf32>
    %cst_131 = arith.constant 1.000000e+00 : f32
    %400 = vector.broadcast %cst_131 : f32 to vector<8x128xf32>
    %401 = arith.addf %400, %399 : vector<8x128xf32>
    %402 = arith.divf %400, %401 : vector<8x128xf32>
    %403 = vector.extract_strided_slice %388 {offsets = [0, 128], sizes = [8, 128], strides = [1, 1]} : vector<8x384xf32> to vector<8x128xf32>
    %404 = vector.extract_strided_slice %394 {offsets = [0, 128], sizes = [8, 128], strides = [1, 1]} : vector<8x384xf32> to vector<8x128xf32>
    %405 = arith.addf %403, %404 : vector<8x128xf32>
    %406 = arith.negf %405 : vector<8x128xf32>
    %407 = math.exp %406 : vector<8x128xf32>
    %cst_132 = arith.constant 1.000000e+00 : f32
    %408 = vector.broadcast %cst_132 : f32 to vector<8x128xf32>
    %409 = arith.addf %408, %407 : vector<8x128xf32>
    %410 = arith.divf %408, %409 : vector<8x128xf32>
    %411 = vector.extract_strided_slice %388 {offsets = [0, 256], sizes = [8, 128], strides = [1, 1]} : vector<8x384xf32> to vector<8x128xf32>
    %412 = vector.extract_strided_slice %394 {offsets = [0, 256], sizes = [8, 128], strides = [1, 1]} : vector<8x384xf32> to vector<8x128xf32>
    %413 = arith.mulf %402, %412 : vector<8x128xf32>
    %414 = arith.addf %411, %413 : vector<8x128xf32>
    %415 = math.tanh %414 : vector<8x128xf32>
    %cst_133 = arith.constant 1.000000e+00 : f32
    %416 = vector.broadcast %cst_133 : f32 to vector<8x128xf32>
    %417 = arith.subf %416, %410 : vector<8x128xf32>
    %418 = arith.mulf %417, %415 : vector<8x128xf32>
    %419 = arith.mulf %410, %379 : vector<8x128xf32>
    %420 = arith.addf %418, %419 : vector<8x128xf32>
    %c8_i32_134 = arith.constant 8 : i32
    %421 = arith.muli %c2_i32_123, %c8_i32_134 : i32
    %422 = tpu.assume_multiple %421, 8 : i32
    %423 = arith.truncf %420 : vector<8x128xf32> to vector<8x128xbf16>
    %424 = arith.index_cast %422 : i32 to index
    %c0_135 = arith.constant 0 : index
    %425 = vector.load %arg10[%424, %c0_135] : memref<56x128xbf16, #tpu.memory_space<vmem>>, vector<8x128xbf16>
    tpu.vector_store %arg10[%424, %c0_135], %423 {strides = array<i32>} : memref<56x128xbf16, #tpu.memory_space<vmem>>, vector<8x128xbf16>,
    %c3_i32_136 = arith.constant 3 : i32
    %c8_i32_137 = arith.constant 8 : i32
    %426 = arith.muli %c3_i32_136, %c8_i32_137 : i32
    %427 = tpu.assume_multiple %426, 8 : i32
    %428 = arith.index_cast %427 : i32 to index
    %c0_138 = arith.constant 0 : index
    %429 = vector.load %arg12[%428, %c0_138] : memref<56x384xf32, #tpu.memory_space<vmem>>, vector<8x384xf32>
    %430 = arith.truncf %420 : vector<8x128xf32> to vector<8x128xbf16>
    %c0_139 = arith.constant 0 : index
    %c0_140 = arith.constant 0 : index
    %431 = vector.load %arg7[%c0_139, %c0_140] : memref<128x384xbf16, #tpu.memory_space<vmem>>, vector<128x384xbf16>
    %cst_141 = arith.constant dense<0.000000e+00> : vector<8x384xf32>
    %432 = tpu.matmul %430, %431, %cst_141 {dimension_numbers = #tpu.dot_dimension_numbers<[1], [0], [0], [1], [0, 0, 1, 1], [], []>} : vector<8x128xbf16>, vector<128x384xbf16>, vector<8x384xf32> -> vector<8x384xf32>
    %c0_142 = arith.constant 0 : index
    %c0_143 = arith.constant 0 : index
    %433 = vector.load %arg9[%c0_142, %c0_143] : memref<1x384xf32, #tpu.memory_space<vmem>>, vector<1x384xf32>
    %434 = vector.broadcast %433 : vector<1x384xf32> to vector<8x384xf32>
    %435 = arith.addf %432, %434 : vector<8x384xf32>
    %436 = vector.extract_strided_slice %429 {offsets = [0, 0], sizes = [8, 128], strides = [1, 1]} : vector<8x384xf32> to vector<8x128xf32>
    %437 = vector.extract_strided_slice %435 {offsets = [0, 0], sizes = [8, 128], strides = [1, 1]} : vector<8x384xf32> to vector<8x128xf32>
    %438 = arith.addf %436, %437 : vector<8x128xf32>
    %439 = arith.negf %438 : vector<8x128xf32>
    %440 = math.exp %439 : vector<8x128xf32>
    %cst_144 = arith.constant 1.000000e+00 : f32
    %441 = vector.broadcast %cst_144 : f32 to vector<8x128xf32>
    %442 = arith.addf %441, %440 : vector<8x128xf32>
    %443 = arith.divf %441, %442 : vector<8x128xf32>
    %444 = vector.extract_strided_slice %429 {offsets = [0, 128], sizes = [8, 128], strides = [1, 1]} : vector<8x384xf32> to vector<8x128xf32>
    %445 = vector.extract_strided_slice %435 {offsets = [0, 128], sizes = [8, 128], strides = [1, 1]} : vector<8x384xf32> to vector<8x128xf32>
    %446 = arith.addf %444, %445 : vector<8x128xf32>
    %447 = arith.negf %446 : vector<8x128xf32>
    %448 = math.exp %447 : vector<8x128xf32>
    %cst_145 = arith.constant 1.000000e+00 : f32
    %449 = vector.broadcast %cst_145 : f32 to vector<8x128xf32>
    %450 = arith.addf %449, %448 : vector<8x128xf32>
    %451 = arith.divf %449, %450 : vector<8x128xf32>
    %452 = vector.extract_strided_slice %429 {offsets = [0, 256], sizes = [8, 128], strides = [1, 1]} : vector<8x384xf32> to vector<8x128xf32>
    %453 = vector.extract_strided_slice %435 {offsets = [0, 256], sizes = [8, 128], strides = [1, 1]} : vector<8x384xf32> to vector<8x128xf32>
    %454 = arith.mulf %443, %453 : vector<8x128xf32>
    %455 = arith.addf %452, %454 : vector<8x128xf32>
    %456 = math.tanh %455 : vector<8x128xf32>
    %cst_146 = arith.constant 1.000000e+00 : f32
    %457 = vector.broadcast %cst_146 : f32 to vector<8x128xf32>
    %458 = arith.subf %457, %451 : vector<8x128xf32>
    %459 = arith.mulf %458, %456 : vector<8x128xf32>
    %460 = arith.mulf %451, %420 : vector<8x128xf32>
    %461 = arith.addf %459, %460 : vector<8x128xf32>
    %c8_i32_147 = arith.constant 8 : i32
    %462 = arith.muli %c3_i32_136, %c8_i32_147 : i32
    %463 = tpu.assume_multiple %462, 8 : i32
    %464 = arith.truncf %461 : vector<8x128xf32> to vector<8x128xbf16>
    %465 = arith.index_cast %463 : i32 to index
    %c0_148 = arith.constant 0 : index
    %466 = vector.load %arg10[%465, %c0_148] : memref<56x128xbf16, #tpu.memory_space<vmem>>, vector<8x128xbf16>
    tpu.vector_store %arg10[%465, %c0_148], %464 {strides = array<i32>} : memref<56x128xbf16, #tpu.memory_space<vmem>>, vector<8x128xbf16>,
    %c4_i32_149 = arith.constant 4 : i32
    %c8_i32_150 = arith.constant 8 : i32
    %467 = arith.muli %c4_i32_149, %c8_i32_150 : i32
    %468 = tpu.assume_multiple %467, 8 : i32
    %469 = arith.index_cast %468 : i32 to index
    %c0_151 = arith.constant 0 : index
    %470 = vector.load %arg12[%469, %c0_151] : memref<56x384xf32, #tpu.memory_space<vmem>>, vector<8x384xf32>
    %471 = arith.truncf %461 : vector<8x128xf32> to vector<8x128xbf16>
    %c0_152 = arith.constant 0 : index
    %c0_153 = arith.constant 0 : index
    %472 = vector.load %arg7[%c0_152, %c0_153] : memref<128x384xbf16, #tpu.memory_space<vmem>>, vector<128x384xbf16>
    %cst_154 = arith.constant dense<0.000000e+00> : vector<8x384xf32>
    %473 = tpu.matmul %471, %472, %cst_154 {dimension_numbers = #tpu.dot_dimension_numbers<[1], [0], [0], [1], [0, 0, 1, 1], [], []>} : vector<8x128xbf16>, vector<128x384xbf16>, vector<8x384xf32> -> vector<8x384xf32>
    %c0_155 = arith.constant 0 : index
    %c0_156 = arith.constant 0 : index
    %474 = vector.load %arg9[%c0_155, %c0_156] : memref<1x384xf32, #tpu.memory_space<vmem>>, vector<1x384xf32>
    %475 = vector.broadcast %474 : vector<1x384xf32> to vector<8x384xf32>
    %476 = arith.addf %473, %475 : vector<8x384xf32>
    %477 = vector.extract_strided_slice %470 {offsets = [0, 0], sizes = [8, 128], strides = [1, 1]} : vector<8x384xf32> to vector<8x128xf32>
    %478 = vector.extract_strided_slice %476 {offsets = [0, 0], sizes = [8, 128], strides = [1, 1]} : vector<8x384xf32> to vector<8x128xf32>
    %479 = arith.addf %477, %478 : vector<8x128xf32>
    %480 = arith.negf %479 : vector<8x128xf32>
    %481 = math.exp %480 : vector<8x128xf32>
    %cst_157 = arith.constant 1.000000e+00 : f32
    %482 = vector.broadcast %cst_157 : f32 to vector<8x128xf32>
    %483 = arith.addf %482, %481 : vector<8x128xf32>
    %484 = arith.divf %482, %483 : vector<8x128xf32>
    %485 = vector.extract_strided_slice %470 {offsets = [0, 128], sizes = [8, 128], strides = [1, 1]} : vector<8x384xf32> to vector<8x128xf32>
    %486 = vector.extract_strided_slice %476 {offsets = [0, 128], sizes = [8, 128], strides = [1, 1]} : vector<8x384xf32> to vector<8x128xf32>
    %487 = arith.addf %485, %486 : vector<8x128xf32>
    %488 = arith.negf %487 : vector<8x128xf32>
    %489 = math.exp %488 : vector<8x128xf32>
    %cst_158 = arith.constant 1.000000e+00 : f32
    %490 = vector.broadcast %cst_158 : f32 to vector<8x128xf32>
    %491 = arith.addf %490, %489 : vector<8x128xf32>
    %492 = arith.divf %490, %491 : vector<8x128xf32>
    %493 = vector.extract_strided_slice %470 {offsets = [0, 256], sizes = [8, 128], strides = [1, 1]} : vector<8x384xf32> to vector<8x128xf32>
    %494 = vector.extract_strided_slice %476 {offsets = [0, 256], sizes = [8, 128], strides = [1, 1]} : vector<8x384xf32> to vector<8x128xf32>
    %495 = arith.mulf %484, %494 : vector<8x128xf32>
    %496 = arith.addf %493, %495 : vector<8x128xf32>
    %497 = math.tanh %496 : vector<8x128xf32>
    %cst_159 = arith.constant 1.000000e+00 : f32
    %498 = vector.broadcast %cst_159 : f32 to vector<8x128xf32>
    %499 = arith.subf %498, %492 : vector<8x128xf32>
    %500 = arith.mulf %499, %497 : vector<8x128xf32>
    %501 = arith.mulf %492, %461 : vector<8x128xf32>
    %502 = arith.addf %500, %501 : vector<8x128xf32>
    %c8_i32_160 = arith.constant 8 : i32
    %503 = arith.muli %c4_i32_149, %c8_i32_160 : i32
    %504 = tpu.assume_multiple %503, 8 : i32
    %505 = arith.truncf %502 : vector<8x128xf32> to vector<8x128xbf16>
    %506 = arith.index_cast %504 : i32 to index
    %c0_161 = arith.constant 0 : index
    %507 = vector.load %arg10[%506, %c0_161] : memref<56x128xbf16, #tpu.memory_space<vmem>>, vector<8x128xbf16>
    tpu.vector_store %arg10[%506, %c0_161], %505 {strides = array<i32>} : memref<56x128xbf16, #tpu.memory_space<vmem>>, vector<8x128xbf16>,
    %c5_i32_162 = arith.constant 5 : i32
    %c8_i32_163 = arith.constant 8 : i32
    %508 = arith.muli %c5_i32_162, %c8_i32_163 : i32
    %509 = tpu.assume_multiple %508, 8 : i32
    %510 = arith.index_cast %509 : i32 to index
    %c0_164 = arith.constant 0 : index
    %511 = vector.load %arg12[%510, %c0_164] : memref<56x384xf32, #tpu.memory_space<vmem>>, vector<8x384xf32>
    %512 = arith.truncf %502 : vector<8x128xf32> to vector<8x128xbf16>
    %c0_165 = arith.constant 0 : index
    %c0_166 = arith.constant 0 : index
    %513 = vector.load %arg7[%c0_165, %c0_166] : memref<128x384xbf16, #tpu.memory_space<vmem>>, vector<128x384xbf16>
    %cst_167 = arith.constant dense<0.000000e+00> : vector<8x384xf32>
    %514 = tpu.matmul %512, %513, %cst_167 {dimension_numbers = #tpu.dot_dimension_numbers<[1], [0], [0], [1], [0, 0, 1, 1], [], []>} : vector<8x128xbf16>, vector<128x384xbf16>, vector<8x384xf32> -> vector<8x384xf32>
    %c0_168 = arith.constant 0 : index
    %c0_169 = arith.constant 0 : index
    %515 = vector.load %arg9[%c0_168, %c0_169] : memref<1x384xf32, #tpu.memory_space<vmem>>, vector<1x384xf32>
    %516 = vector.broadcast %515 : vector<1x384xf32> to vector<8x384xf32>
    %517 = arith.addf %514, %516 : vector<8x384xf32>
    %518 = vector.extract_strided_slice %511 {offsets = [0, 0], sizes = [8, 128], strides = [1, 1]} : vector<8x384xf32> to vector<8x128xf32>
    %519 = vector.extract_strided_slice %517 {offsets = [0, 0], sizes = [8, 128], strides = [1, 1]} : vector<8x384xf32> to vector<8x128xf32>
    %520 = arith.addf %518, %519 : vector<8x128xf32>
    %521 = arith.negf %520 : vector<8x128xf32>
    %522 = math.exp %521 : vector<8x128xf32>
    %cst_170 = arith.constant 1.000000e+00 : f32
    %523 = vector.broadcast %cst_170 : f32 to vector<8x128xf32>
    %524 = arith.addf %523, %522 : vector<8x128xf32>
    %525 = arith.divf %523, %524 : vector<8x128xf32>
    %526 = vector.extract_strided_slice %511 {offsets = [0, 128], sizes = [8, 128], strides = [1, 1]} : vector<8x384xf32> to vector<8x128xf32>
    %527 = vector.extract_strided_slice %517 {offsets = [0, 128], sizes = [8, 128], strides = [1, 1]} : vector<8x384xf32> to vector<8x128xf32>
    %528 = arith.addf %526, %527 : vector<8x128xf32>
    %529 = arith.negf %528 : vector<8x128xf32>
    %530 = math.exp %529 : vector<8x128xf32>
    %cst_171 = arith.constant 1.000000e+00 : f32
    %531 = vector.broadcast %cst_171 : f32 to vector<8x128xf32>
    %532 = arith.addf %531, %530 : vector<8x128xf32>
    %533 = arith.divf %531, %532 : vector<8x128xf32>
    %534 = vector.extract_strided_slice %511 {offsets = [0, 256], sizes = [8, 128], strides = [1, 1]} : vector<8x384xf32> to vector<8x128xf32>
    %535 = vector.extract_strided_slice %517 {offsets = [0, 256], sizes = [8, 128], strides = [1, 1]} : vector<8x384xf32> to vector<8x128xf32>
    %536 = arith.mulf %525, %535 : vector<8x128xf32>
    %537 = arith.addf %534, %536 : vector<8x128xf32>
    %538 = math.tanh %537 : vector<8x128xf32>
    %cst_172 = arith.constant 1.000000e+00 : f32
    %539 = vector.broadcast %cst_172 : f32 to vector<8x128xf32>
    %540 = arith.subf %539, %533 : vector<8x128xf32>
    %541 = arith.mulf %540, %538 : vector<8x128xf32>
    %542 = arith.mulf %533, %502 : vector<8x128xf32>
    %543 = arith.addf %541, %542 : vector<8x128xf32>
    %c8_i32_173 = arith.constant 8 : i32
    %544 = arith.muli %c5_i32_162, %c8_i32_173 : i32
    %545 = tpu.assume_multiple %544, 8 : i32
    %546 = arith.truncf %543 : vector<8x128xf32> to vector<8x128xbf16>
    %547 = arith.index_cast %545 : i32 to index
    %c0_174 = arith.constant 0 : index
    %548 = vector.load %arg10[%547, %c0_174] : memref<56x128xbf16, #tpu.memory_space<vmem>>, vector<8x128xbf16>
    tpu.vector_store %arg10[%547, %c0_174], %546 {strides = array<i32>} : memref<56x128xbf16, #tpu.memory_space<vmem>>, vector<8x128xbf16>,
    %c6_i32_175 = arith.constant 6 : i32
    %c8_i32_176 = arith.constant 8 : i32
    %549 = arith.muli %c6_i32_175, %c8_i32_176 : i32
    %550 = tpu.assume_multiple %549, 8 : i32
    %551 = arith.index_cast %550 : i32 to index
    %c0_177 = arith.constant 0 : index
    %552 = vector.load %arg12[%551, %c0_177] : memref<56x384xf32, #tpu.memory_space<vmem>>, vector<8x384xf32>
    %553 = arith.truncf %543 : vector<8x128xf32> to vector<8x128xbf16>
    %c0_178 = arith.constant 0 : index
    %c0_179 = arith.constant 0 : index
    %554 = vector.load %arg7[%c0_178, %c0_179] : memref<128x384xbf16, #tpu.memory_space<vmem>>, vector<128x384xbf16>
    %cst_180 = arith.constant dense<0.000000e+00> : vector<8x384xf32>
    %555 = tpu.matmul %553, %554, %cst_180 {dimension_numbers = #tpu.dot_dimension_numbers<[1], [0], [0], [1], [0, 0, 1, 1], [], []>} : vector<8x128xbf16>, vector<128x384xbf16>, vector<8x384xf32> -> vector<8x384xf32>
    %c0_181 = arith.constant 0 : index
    %c0_182 = arith.constant 0 : index
    %556 = vector.load %arg9[%c0_181, %c0_182] : memref<1x384xf32, #tpu.memory_space<vmem>>, vector<1x384xf32>
    %557 = vector.broadcast %556 : vector<1x384xf32> to vector<8x384xf32>
    %558 = arith.addf %555, %557 : vector<8x384xf32>
    %559 = vector.extract_strided_slice %552 {offsets = [0, 0], sizes = [8, 128], strides = [1, 1]} : vector<8x384xf32> to vector<8x128xf32>
    %560 = vector.extract_strided_slice %558 {offsets = [0, 0], sizes = [8, 128], strides = [1, 1]} : vector<8x384xf32> to vector<8x128xf32>
    %561 = arith.addf %559, %560 : vector<8x128xf32>
    %562 = arith.negf %561 : vector<8x128xf32>
    %563 = math.exp %562 : vector<8x128xf32>
    %cst_183 = arith.constant 1.000000e+00 : f32
    %564 = vector.broadcast %cst_183 : f32 to vector<8x128xf32>
    %565 = arith.addf %564, %563 : vector<8x128xf32>
    %566 = arith.divf %564, %565 : vector<8x128xf32>
    %567 = vector.extract_strided_slice %552 {offsets = [0, 128], sizes = [8, 128], strides = [1, 1]} : vector<8x384xf32> to vector<8x128xf32>
    %568 = vector.extract_strided_slice %558 {offsets = [0, 128], sizes = [8, 128], strides = [1, 1]} : vector<8x384xf32> to vector<8x128xf32>
    %569 = arith.addf %567, %568 : vector<8x128xf32>
    %570 = arith.negf %569 : vector<8x128xf32>
    %571 = math.exp %570 : vector<8x128xf32>
    %cst_184 = arith.constant 1.000000e+00 : f32
    %572 = vector.broadcast %cst_184 : f32 to vector<8x128xf32>
    %573 = arith.addf %572, %571 : vector<8x128xf32>
    %574 = arith.divf %572, %573 : vector<8x128xf32>
    %575 = vector.extract_strided_slice %552 {offsets = [0, 256], sizes = [8, 128], strides = [1, 1]} : vector<8x384xf32> to vector<8x128xf32>
    %576 = vector.extract_strided_slice %558 {offsets = [0, 256], sizes = [8, 128], strides = [1, 1]} : vector<8x384xf32> to vector<8x128xf32>
    %577 = arith.mulf %566, %576 : vector<8x128xf32>
    %578 = arith.addf %575, %577 : vector<8x128xf32>
    %579 = math.tanh %578 : vector<8x128xf32>
    %cst_185 = arith.constant 1.000000e+00 : f32
    %580 = vector.broadcast %cst_185 : f32 to vector<8x128xf32>
    %581 = arith.subf %580, %574 : vector<8x128xf32>
    %582 = arith.mulf %581, %579 : vector<8x128xf32>
    %583 = arith.mulf %574, %543 : vector<8x128xf32>
    %584 = arith.addf %582, %583 : vector<8x128xf32>
    %c8_i32_186 = arith.constant 8 : i32
    %585 = arith.muli %c6_i32_175, %c8_i32_186 : i32
    %586 = tpu.assume_multiple %585, 8 : i32
    %587 = arith.truncf %584 : vector<8x128xf32> to vector<8x128xbf16>
    %588 = arith.index_cast %586 : i32 to index
    %c0_187 = arith.constant 0 : index
    %589 = vector.load %arg10[%588, %c0_187] : memref<56x128xbf16, #tpu.memory_space<vmem>>, vector<8x128xbf16>
    tpu.vector_store %arg10[%588, %c0_187], %587 {strides = array<i32>} : memref<56x128xbf16, #tpu.memory_space<vmem>>, vector<8x128xbf16>,
    %c7_i32_188 = arith.constant 7 : i32
    return
  }
}

</mosaic_0001>

<bundles_post_ra>
// kernel: seq2seq_forward.3
= control target key start
LH: loop header
LB: loop body
LE: loop exit
PB: predicated region body
PF: predicated region fallthrough
CT: control target
= control target key end

     0   :  { %s347_s1 = inlined_call_operand.vmem [shape: bf16[128,128], index: 1, kind: input, shape index: {}]   ;;  %s348_s0 = inlined_call_operand.vmem [shape: bf16[56,128], index: 0, kind: input, shape index: {}]   ;;  %s349_s2 = inlined_call_operand.vmem [shape: f32[1,128], index: 2, kind: input, shape index: {}]   ;;  %s350_s3 = inlined_call_operand.vmem [shape: f32[56,128], index: 3, kind: output, shape index: {}]  }
   0x1   :  { %v255_v0 = vld [vmem:[%s347_s1] sm:$0xff]   ;;  %v256_v1 = vld [vmem:[%s347_s1 + $0x8] sm:$0xff]   ;;  %v257_v2 = vld [vmem:[%s347_s1 + $0x10] sm:$0xff]  }
   0x2   :  { %215 = vmatprep.subr.bf16.mxu0 %v255_v0  ;;  %239 = vmatprep.subr.bf16.mxu1 %v255_v0  ;;  %v258_v3 = vld [vmem:[%s347_s1 + $0x18] sm:$0xff]   ;;  %v263_v4 = vld [vmem:[%s348_s0] sm:$0xff]   ;;  %v264_v5 = vld [vmem:[%s348_s0 + $0x10] sm:$0xff]  }
   0x3   :  { %216 = vmatpush3.bf16.msra.mxu0 %v255_v0  ;;  %247 = vmatpush3.bf16.msra.mxu1 %v255_v0  ;;  %v259_v6 = vld [vmem:[%s347_s1 + $0x20] sm:$0xff]   ;;  %v260_v7 = vld [vmem:[%s347_s1 + $0x28] sm:$0xff]   ;;  %v261_v8 = vld [vmem:[%s347_s1 + $0x30] sm:$0xff]  }
   0x4   :  { %217 = vmatprep.subr.bf16.mxu0 %v256_v1  ;;  %240 = vmatprep.subr.bf16.mxu1 %v256_v1  ;;  %v262_v9 = vld [vmem:[%s347_s1 + $0x38] sm:$0xff]   ;;  %v265_v10 = vld [vmem:[%s348_s0 + $0x8] sm:$0xff]   ;;  %v190_v12 = vld [vmem:[%s349_s2] ss:$0 sm:$0xff] }
   0x5   :  { %231 = vmatprep.mubr.bf16.mxu0 %v263_v4  ;;  %235 = vmatprep.mubr.bf16.mxu1 %v264_v5  ;;  %v266_v11 = vld [vmem:[%s348_s0 + $0x18] ss:$0 sps:$4 sm:$0xff]  }
   0x7   :  { %218 = vmatpush3.bf16.msra.mxu0 %v256_v1  ;;  %248 = vmatpush3.bf16.msra.mxu1 %v256_v1 }
   0x8   :  { %219 = vmatprep.subr.bf16.mxu0 %v257_v2  ;;  %241 = vmatprep.subr.bf16.mxu1 %v257_v2 }
   0xb   :  { %220 = vmatpush3.bf16.msra.mxu0 %v257_v2  ;;  %249 = vmatpush3.bf16.msra.mxu1 %v257_v2 }
   0xc   :  { %221 = vmatprep.subr.bf16.mxu0 %v258_v3  ;;  %242 = vmatprep.subr.bf16.mxu1 %v258_v3 }
   0xf   :  { %222 = vmatpush3.bf16.msra.mxu0 %v258_v3  ;;  %250 = vmatpush3.bf16.msra.mxu1 %v258_v3 }
  0x10   :  { %223 = vmatprep.subr.bf16.mxu0 %v259_v6  ;;  %243 = vmatprep.subr.bf16.mxu1 %v259_v6 }
  0x13   :  { %224 = vmatpush3.bf16.msra.mxu0 %v259_v6  ;;  %251 = vmatpush3.bf16.msra.mxu1 %v259_v6 }
  0x14   :  { %225 = vmatprep.subr.bf16.mxu0 %v260_v7  ;;  %244 = vmatprep.subr.bf16.mxu1 %v260_v7 }
  0x17   :  { %226 = vmatpush3.bf16.msra.mxu0 %v260_v7  ;;  %252 = vmatpush3.bf16.msra.mxu1 %v260_v7 }
  0x18   :  { %227 = vmatprep.subr.bf16.mxu0 %v261_v8  ;;  %245 = vmatprep.subr.bf16.mxu1 %v261_v8 }
  0x1b   :  { %228 = vmatpush3.bf16.msra.mxu0 %v261_v8  ;;  %253 = vmatpush3.bf16.msra.mxu1 %v261_v8 }
  0x1c   :  { %229 = vmatprep.subr.bf16.mxu0 %v262_v9  ;;  %246 = vmatprep.subr.bf16.mxu1 %v262_v9 }
  0x1f   :  { %230 = vmatpush3.bf16.msra.mxu0 %v262_v9  ;;  %254 = vmatpush3.bf16.msra.mxu1 %v262_v9 }
  0x22   :  { %232 = vmatmul.mubr.bf16.vlgmr.msra.gmra.mrb[0].mxu0 %v265_v10  ;;  %236 = vmatmul.mubr.bf16.vlgmr.msra.gmra.mrb[0].mxu1 %v266_v11 }
  0xf5   :  { %v233_v13 = vpop.f32.mrb[0].mxu0  ;;  %v237_v14 = vpop.f32.mrb[0].mxu1 }
  0xf6   :  { %v158_v15 = vadd.f32 %v233_v13, %v190_v12  ;;  %v174_v16 = vadd.f32 %v237_v14, %v190_v12  ;;  %v149_v17 = vpop.f32.mrb[1].mxu0  ;;  %v165_v18 = vpop.f32.mrb[1].mxu1 }
  0xf7   :  { %v150_v19 = vadd.f32 %v190_v12, %v149_v17  ;;  %v166_v20 = vadd.f32 %v190_v12, %v165_v18  ;;  %v234_v21 = vpop.f32.mrb[2].mxu0  ;;  %v238_v22 = vpop.f32.mrb[2].mxu1 }
  0xf8   :  { %181 = vst [vmem:[%s350_s3 + $0x10] sm:$0xff] %v158_v15  ;;  %185 = vst [vmem:[%s350_s3 + $0x30] sm:$0xff] %v174_v16  ;;  %v161_v23 = vadd.f32 %v234_v21, %v190_v12  ;;  %v152_v24 = vpop.f32.mrb[3].mxu0  ;;  %v168_v25 = vpop.f32.mrb[3].mxu1 }
  0xf9   :  { %179 = vst [vmem:[%s350_s3] sm:$0xff] %v150_v19  ;;  %183 = vst [vmem:[%s350_s3 + $0x20] sm:$0xff] %v166_v20  ;;  %v153_v26 = vadd.f32 %v190_v12, %v152_v24  ;;  %v169_v27 = vadd.f32 %v190_v12, %v168_v25 }
  0xfa   :  { %182 = vst [vmem:[%s350_s3 + $0x18] sm:$0xff] %v161_v23 }
  0xfb   :  { %180 = vst [vmem:[%s350_s3 + $0x8] sm:$0xff] %v153_v26  ;;  %184 = vst [vmem:[%s350_s3 + $0x28] sm:$0xff] %v169_v27 }

// kernel: seq2seq_forward.2
= control target key start
LH: loop header
LB: loop body
LE: loop exit
PB: predicated region body
PF: predicated region fallthrough
CT: control target
= control target key end

     0   :  { %v6628_v1 = vmov 0   ;;  %v6630_v63 = vmov 0.0   ;;  %vm5030_vm0 = vmmov 0   ;;  %s6617_s2 = inlined_call_operand.vmem [shape: bf16[128,384], index: 2, kind: input, shape index: {}]   ;;  %s6618_s0 = inlined_call_operand.vmem [shape: bf16[64,128], index: 0, kind: input, shape index: {}]   ;;  %s6619_s6 = inlined_call_operand.vmem [shape: bf16[128,384], index: 6, kind: input, shape index: {}]   ;;  %s6620_s1 = inlined_call_operand.vmem [shape: bf16[56,128], index: 1, kind: input, shape index: {}]   ;;  %s6621_s3 = inlined_call_operand.vmem [shape: bf16[128,384], index: 3, kind: input, shape index: {}]   ;;  %s6622_s4 = inlined_call_operand.vmem [shape: f32[1,384], index: 4, kind: input, shape index: {}]   ;;  %s6623_s8 = inlined_call_operand.vmem [shape: f32[1,384], index: 8, kind: input, shape index: {}]   ;;  %s6624_s5 = inlined_call_operand.vmem [shape: f32[1,384], index: 5, kind: input, shape index: {}]   ;;  %s6625_s7 = inlined_call_operand.vmem [shape: bf16[128,384], index: 7, kind: input, shape index: {}]   ;;  %s6626_s9 = inlined_call_operand.vmem [shape: f32[1,384], index: 9, kind: input, shape index: {}]   ;;  %s6627_s10 = inlined_call_operand.vmem [shape: bf16[56,128], index: 10, kind: output, shape index: {}]  }
   0x1   :  { %v4645_v0 = vld [vmem:[%s6617_s2 + $0x4] ss:$12 sps:$4 sm:$0xff]   ;;  %277 = vmatprep.mubr.bf16.mxu0 %v6628_v1  ;;  %v4647_v2 = vld [vmem:[%s6617_s2] ss:$12 sps:$4 sm:$0xff]   ;;  %v4648_v3 = vld [vmem:[%s6617_s2 + $0x1c] ss:$12 sps:$4 sm:$0xff]  }
   0x2   :  { %245 = vmatprep.subr.bf16.mxu0 %v4645_v0  ;;  %v4650_v4 = vld [vmem:[%s6617_s2 + $0x18] ss:$12 sps:$4 sm:$0xff]   ;;  %v4651_v5 = vld [vmem:[%s6617_s2 + $0x34] ss:$12 sps:$4 sm:$0xff]   ;;  %v4653_v6 = vld [vmem:[%s6617_s2 + $0x30] ss:$12 sps:$4 sm:$0xff]  }
   0x3   :  { %246 = vmatpush1.bf16.msra.mxu0 %v4647_v2  ;;  %v4654_v7 = vld [vmem:[%s6617_s2 + $0x4c] ss:$12 sps:$4 sm:$0xff]   ;;  %v4666_v8 = vld [vmem:[%s6617_s2 + $0x8] ss:$12 sps:$4 sm:$0xff]   ;;  %v4657_v10 = vld [vmem:[%s6617_s2 + $0x64] ss:$12 sps:$4 sm:$0xff]  }
   0x4   :  { %247 = vmatprep.subr.bf16.mxu0 %v4648_v3  ;;  %v4656_v9 = vld [vmem:[%s6617_s2 + $0x48] ss:$12 sps:$4 sm:$0xff]   ;;  %4286 = vmatprep.subr.bf16.mxu1 %v4666_v8  ;;  %v4670_v11 = vld [vmem:[%s6617_s2 + $0x20] ss:$12 sps:$4 sm:$0xff]   ;;  %v4675_v14 = vld [vmem:[%s6617_s2 + $0x38] ss:$12 sps:$4 sm:$0xff]  }
   0x5   :  { %4287 = vmatpush3.bf16.msra.mxu1 %v4666_v8  ;;  %v4671_v12 = vld [vmem:[%s6618_s0] sm:$0xff]   ;;  %v4660_v15 = vld [vmem:[%s6617_s2 + $0x7c] ss:$12 sps:$4 sm:$0xff]   ;;  %v4667_v21 = vld [vmem:[%s6617_s2 + $0xac] ss:$12 sps:$4 sm:$0xff]  }
   0x6   :  { %v4659_v13 = vld [vmem:[%s6617_s2 + $0x60] ss:$12 sps:$4 sm:$0xff]   ;;  %4288 = vmatprep.subr.bf16.mxu1 %v4670_v11  ;;  %4302 = vmatprep.mubr.bf16.mxu1 %v4671_v12  ;;  %v4679_v16 = vld [vmem:[%s6617_s2 + $0x50] ss:$12 sps:$4 sm:$0xff]   ;;  %v4662_v17 = vld [vmem:[%s6617_s2 + $0x78] ss:$12 sps:$4 sm:$0xff]  }
   0x7   :  { %248 = vmatpush1.bf16.msra.mxu0 %v4650_v4  ;;  %v4663_v18 = vld [vmem:[%s6617_s2 + $0x94] ss:$12 sps:$4 sm:$0xff]   ;;  %v4665_v20 = vld [vmem:[%s6617_s2 + $0x90] ss:$12 sps:$4 sm:$0xff]   ;;  %v4693_v25 = vld [vmem:[%s6617_s2 + $0x98] ss:$12 sps:$4 sm:$0xff]  }
   0x8   :  { %249 = vmatprep.subr.bf16.mxu0 %v4651_v5  ;;  %v4684_v19 = vld [vmem:[%s6617_s2 + $0x68] ss:$12 sps:$4 sm:$0xff]   ;;  %v4688_v22 = vld [vmem:[%s6617_s2 + $0x80] ss:$12 sps:$4 sm:$0xff]   ;;  %v4674_v24 = vld [vmem:[%s6619_s6 + $0x4] ss:$12 sps:$4 sm:$0xff]  }
   0x9   :  { %4289 = vmatpush3.bf16.msra.mxu1 %v4670_v11  ;;  %v4669_v23 = vld [vmem:[%s6617_s2 + $0xa8] ss:$12 sps:$4 sm:$0xff]   ;;  %v4672_v26 = vld [vmem:[%s6619_s6] ss:$12 sps:$4 sm:$0xff]   ;;  %v4697_v28 = vld [vmem:[%s6617_s2 + $0xb0] ss:$12 sps:$4 sm:$0xff]  }
   0xa   :  { %4290 = vmatprep.subr.bf16.mxu1 %v4675_v14  ;;  %v4678_v27 = vld [vmem:[%s6619_s6 + $0x1c] ss:$12 sps:$4 sm:$0xff]   ;;  %v4676_v29 = vld [vmem:[%s6619_s6 + $0x18] ss:$12 sps:$4 sm:$0xff]   ;;  %v4683_v30 = vld [vmem:[%s6619_s6 + $0x34] ss:$12 sps:$4 sm:$0xff]  }
   0xb   :  { %250 = vmatpush1.bf16.msra.mxu0 %v4653_v6  ;;  %v4680_v31 = vld [vmem:[%s6618_s0 + $0x8] sm:$0xff]   ;;  %v4681_v33 = vld [vmem:[%s6619_s6 + $0x30] ss:$12 sps:$4 sm:$0xff]   ;;  %v4711_v39 = vld [vmem:[%s6619_s6 + $0x38] ss:$12 sps:$4 sm:$0xff]  }
   0xc   :  { %251 = vmatprep.subr.bf16.mxu0 %v4654_v7  ;;  %v4702_v32 = vld [vmem:[%s6619_s6 + $0x8] ss:$12 sps:$4 sm:$0xff]   ;;  %v4687_v34 = vld [vmem:[%s6619_s6 + $0x4c] ss:$12 sps:$4 sm:$0xff]   ;;  %v4692_v38 = vld [vmem:[%s6619_s6 + $0x64] ss:$12 sps:$4 sm:$0xff]  }
   0xd   :  { %4291 = vmatpush3.bf16.msra.mxu1 %v4675_v14  ;;  %v4685_v35 = vld [vmem:[%s6619_s6 + $0x48] ss:$12 sps:$4 sm:$0xff]   ;;  %v4706_v36 = vld [vmem:[%s6619_s6 + $0x20] ss:$12 sps:$4 sm:$0xff]   ;;  %v4694_v42 = vld [vmem:[%s6619_s6 + $0x78] ss:$12 sps:$4 sm:$0xff]  }
   0xe   :  { %4292 = vmatprep.subr.bf16.mxu1 %v4679_v16  ;;  %v4689_v37 = vld [vmem:[%s6618_s0 + $0x10] sm:$0xff]   ;;  %v4690_v40 = vld [vmem:[%s6619_s6 + $0x60] ss:$12 sps:$4 sm:$0xff]   ;;  %v4696_v41 = vld [vmem:[%s6619_s6 + $0x7c] ss:$12 sps:$4 sm:$0xff]  }
   0xf   :  { %252 = vmatpush1.bf16.msra.mxu0 %v4656_v9  ;;  %v4698_v43 = vld [vmem:[%s6618_s0 + $0x18] sm:$0xff]   ;;  %v4707_v45 = vld [vmem:[%s6620_s1] sm:$0xff]   ;;  %v4720_v47 = vld [vmem:[%s6619_s6 + $0x68] ss:$12 sps:$4 sm:$0xff]  }
  0x10   :  { %253 = vmatprep.subr.bf16.mxu0 %v4657_v10  ;;  %v4715_v44 = vld [vmem:[%s6619_s6 + $0x50] ss:$12 sps:$4 sm:$0xff]   ;;  %v4701_v46 = vld [vmem:[%s6619_s6 + $0x94] ss:$12 sps:$4 sm:$0xff]   ;;  %v4705_v49 = vld [vmem:[%s6619_s6 + $0xac] ss:$12 sps:$4 sm:$0xff]  }
  0x11   :  { %4293 = vmatpush3.bf16.msra.mxu1 %v4679_v16  ;;  %v4699_v48 = vld [vmem:[%s6619_s6 + $0x90] ss:$12 sps:$4 sm:$0xff]   ;;  %v4724_v50 = vld [vmem:[%s6619_s6 + $0x80] ss:$12 sps:$4 sm:$0xff]   ;;  %v4703_v51 = vld [vmem:[%s6619_s6 + $0xa8] ss:$12 sps:$4 sm:$0xff]  }
  0x12   :  { %4294 = vmatprep.subr.bf16.mxu1 %v4684_v19  ;;  %v5247_v52 = vld [vmem:[%s6621_s3 + $0x4] ss:$12 sps:$4 sm:$0xff]   ;;  %v5255_v54 = vld [vmem:[%s6621_s3] ss:$12 sps:$4 sm:$0xff]   ;;  %v5261_v55 = vld [vmem:[%s6621_s3 + $0x1c] ss:$12 sps:$4 sm:$0xff]  }
  0x13   :  { %254 = vmatpush1.bf16.msra.mxu0 %v4659_v13  ;;  %v4729_v53 = vld [vmem:[%s6619_s6 + $0x98] ss:$12 sps:$4 sm:$0xff]   ;;  %v4733_v56 = vld [vmem:[%s6619_s6 + $0xb0] ss:$12 sps:$4 sm:$0xff]   ;;  %v5277_v58 = vld [vmem:[%s6621_s3 + $0x34] ss:$12 sps:$4 sm:$0xff]  }
  0x14   :  { %255 = vmatprep.subr.bf16.mxu0 %v4660_v15  ;;  %v5270_v57 = vld [vmem:[%s6621_s3 + $0x18] ss:$12 sps:$4 sm:$0xff]   ;;  %v4716_v59 = vld [vmem:[%s6620_s1 + $0x8] sm:$0xff]   ;;  %v5286_v60 = vld [vmem:[%s6621_s3 + $0x30] ss:$12 sps:$4 sm:$0xff]  }
  0x15   :  { %4295 = vmatpush3.bf16.msra.mxu1 %v4684_v19  ;;  %v5292_v61 = vld [vmem:[%s6621_s3 + $0x4c] ss:$12 sps:$4 sm:$0xff]   ;;  %v5297_v62 = vld [vmem:[%s6621_s3 + $0x8] ss:$12 sps:$4 sm:$0xff]   ;;  %v5314_v3 = vld [vmem:[%s6621_s3 + $0x64] ss:$12 sps:$4 sm:$0xff]   ;;  %v78_v19 = vlaneseq }
  0x16   :  { %4296 = vmatprep.subr.bf16.mxu1 %v4688_v22  ;;  %v5304_v0 = vld [vmem:[%s6621_s3 + $0x48] ss:$12 sps:$4 sm:$0xff]   ;;  %v5320_v4 = vld [vmem:[%s6621_s3 + $0x20] ss:$12 sps:$4 sm:$0xff]   ;;  %v5339_v7 = vld [vmem:[%s6621_s3 + $0x38] ss:$12 sps:$4 sm:$0xff]  }
  0x17   :  { %256 = vmatpush1.bf16.msra.mxu0 %v4662_v17  ;;  %v4725_v2 = vld [vmem:[%s6620_s1 + $0x10] sm:$0xff]   ;;  %v5327_v5 = vld [vmem:[%s6621_s3 + $0x60] ss:$12 sps:$4 sm:$0xff]   ;;  %v5333_v6 = vld [vmem:[%s6621_s3 + $0x7c] ss:$12 sps:$4 sm:$0xff]  }
  0x18   :  { %257 = vmatprep.subr.bf16.mxu0 %v4663_v18  ;;  %v4734_v8 = vld [vmem:[%s6620_s1 + $0x18] ss:$0 sps:$4 sm:$0xff]   ;;  %v5356_v10 = vld [vmem:[%s6621_s3 + $0x94] ss:$12 sps:$4 sm:$0xff]   ;;  %v5362_v11 = vld [vmem:[%s6621_s3 + $0x50] ss:$12 sps:$4 sm:$0xff]  }
  0x19   :  { %4297 = vmatpush3.bf16.msra.mxu1 %v4688_v22  ;;  %v5349_v9 = vld [vmem:[%s6621_s3 + $0x78] ss:$12 sps:$4 sm:$0xff]   ;;  %v5383_v14 = vld [vmem:[%s6621_s3 + $0x68] ss:$12 sps:$4 sm:$0xff]   ;;  %v5398_v16 = vld [vmem:[%s6621_s3 + $0x80] ss:$12 sps:$4 sm:$0xff]  }
  0x1a   :  { %4298 = vmatprep.subr.bf16.mxu1 %v4693_v25  ;;  %v5377_v13 = vld [vmem:[%s6621_s3 + $0xac] ss:$12 sps:$4 sm:$0xff]   ;;  %v5390_v15 = vld [vmem:[%s6621_s3 + $0xa8] ss:$12 sps:$4 sm:$0xff]   ;;  %v5418_v18 = vld [vmem:[%s6621_s3 + $0xb0] ss:$12 sps:$4 sm:$0xff]  }
  0x1b   :  { %258 = vmatpush1.bf16.msra.mxu0 %v4665_v20  ;;  %v5407_v17 = vld [vmem:[%s6621_s3 + $0x98] ss:$12 sps:$4 sm:$0xff]   ;;  %v79_v20 = vshrl.u32 %v78_v19, 7  ;;  %v76_v22 = vld [vmem:[%s6622_s4] sm:$0x7] }
  0x1c   :  { %259 = vmatprep.subr.bf16.mxu0 %v4667_v21 }
  0x1d   :  { %4299 = vmatpush3.bf16.msra.mxu1 %v4693_v25  ;;  %v5456_v21 = vsub.s32 0, %v79_v20 }
  0x1e   :  { %4300 = vmatprep.subr.bf16.mxu1 %v4697_v28 }
  0x1f   :  { %260 = vmatpush1.bf16.msra.mxu0 %v4669_v23  ;;  %6637 = vst [vmem:[#allocation4_spill] sm:$0xff] %v5456_v21  ;;  %v5461_v23 = vsub.s32 1, %v79_v20  ;;  %v5466_v25 = vrot.slane %v76_v22, %v5456_v21 }
  0x20   :  { %613 = vmatprep.subr.bf16.mxu0 %v4674_v24 }
  0x21   :  { %4301 = vmatpush3.bf16.msra.mxu1 %v4697_v28  ;;  %6638 = vst [vmem:[#allocation5_spill] sm:$0xff] %v5461_v23 }
  0x22   :  { %278 = vmatmul.mubr.bf16.vlgmr.msra.gmra.mrb[0].mxu0 %v4671_v12  ;;  %4310 = vmatprep.subr.bf16.mxu1 %v4702_v32  ;;  %v5371_v12 = vld [vmem:[%s6621_s3 + $0x90] ss:$12 sps:$4 sm:$0xff]  }
  0x23   :  { %614 = vmatpush1.bf16.msra.mxu0 %v4672_v26  ;;  %287 = vmatprep.mubr.bf16.mxu0 %v6628_v1 }
  0x24   :  { %615 = vmatprep.subr.bf16.mxu0 %v4678_v27  ;;  %4303 = vmatmul.mubr.bf16.vlgmr.msra.gmra.mrb[0].mxu1 %v4680_v31  ;;  %v5471_v27 = vrot.slane %v76_v22, %v5461_v23 }
  0x25   :  { %4311 = vmatpush3.bf16.msra.mxu1 %v4702_v32  ;;  %4306 = vmatprep.mubr.bf16.mxu1 %v4689_v37 }
  0x26   :  { %4312 = vmatprep.subr.bf16.mxu1 %v4706_v36 }
  0x27   :  { %616 = vmatpush1.bf16.msra.mxu0 %v4676_v29 }
  0x28   :  { %617 = vmatprep.subr.bf16.mxu0 %v4683_v30 }
  0x29   :  { %4313 = vmatpush3.bf16.msra.mxu1 %v4706_v36 }
  0x2a   :  { %288 = vmatmul.mubr.bf16.gmra.mrb[4].mxu0 %v4680_v31  ;;  %4314 = vmatprep.subr.bf16.mxu1 %v4711_v39  ;;  %v5476_v31 = vsub.s32 2, %v79_v20 }
  0x2b   :  { %618 = vmatpush1.bf16.msra.mxu0 %v4681_v33  ;;  %297 = vmatprep.mubr.bf16.mxu0 %v6628_v1 }
  0x2c   :  { %619 = vmatprep.subr.bf16.mxu0 %v4687_v34  ;;  %4307 = vmatmul.mubr.bf16.gmra.mrb[4].mxu1 %v4698_v43  ;;  %v5482_v33 = vrot.slane %v76_v22, %v5476_v31 }
  0x2d   :  { %4315 = vmatpush3.bf16.msra.mxu1 %v4711_v39  ;;  %4326 = vmatprep.mubr.bf16.mxu1 %v4707_v45 }
  0x2e   :  { %4316 = vmatprep.subr.bf16.mxu1 %v4715_v44 }
  0x2f   :  { %620 = vmatpush1.bf16.msra.mxu0 %v4685_v35 }
  0x30   :  { %621 = vmatprep.subr.bf16.mxu0 %v4692_v38 }
  0x31   :  { %4317 = vmatpush3.bf16.msra.mxu1 %v4715_v44 }
  0x32   :  { %298 = vmatmul.mubr.bf16.gmra.mrb[8].mxu0 %v4689_v37  ;;  %4318 = vmatprep.subr.bf16.mxu1 %v4720_v47 }
  0x33   :  { %622 = vmatpush1.bf16.msra.mxu0 %v4690_v40  ;;  %307 = vmatprep.mubr.bf16.mxu0 %v6628_v1 }
  0x34   :  { %623 = vmatprep.subr.bf16.mxu0 %v4696_v41 }
  0x35   :  { %4319 = vmatpush3.bf16.msra.mxu1 %v4720_v47 }
  0x36   :  { %4320 = vmatprep.subr.bf16.mxu1 %v4724_v50 }
  0x37   :  { %624 = vmatpush1.bf16.msra.mxu0 %v4694_v42 }
  0x38   :  { %625 = vmatprep.subr.bf16.mxu0 %v4701_v46 }
  0x39   :  { %4321 = vmatpush3.bf16.msra.mxu1 %v4724_v50 }
  0x3a   :  { %308 = vmatmul.mubr.bf16.gmra.mrb[12].mxu0 %v4698_v43  ;;  %4322 = vmatprep.subr.bf16.mxu1 %v4729_v53 }
  0x3b   :  { %626 = vmatpush1.bf16.msra.mxu0 %v4699_v48  ;;  %645 = vmatprep.mubr.bf16.mxu0 %v6628_v1 }
  0x3c   :  { %627 = vmatprep.subr.bf16.mxu0 %v4705_v49 }
  0x3d   :  { %4323 = vmatpush3.bf16.msra.mxu1 %v4729_v53 }
  0x3e   :  { %4324 = vmatprep.subr.bf16.mxu1 %v4733_v56 }
  0x3f   :  { %628 = vmatpush1.bf16.msra.mxu0 %v4703_v51 }
  0x40   :  { %952 = vmatprep.subr.bf16.mxu0 %v5247_v52 }
  0x41   :  { %4325 = vmatpush3.bf16.msra.mxu1 %v4733_v56 }
  0x42   :  { %646 = vmatmul.mubr.bf16.vlgmr.msra.gmra.mrb[16].mxu0 %v4707_v45  ;;  %4334 = vmatprep.subr.bf16.mxu1 %v6630_v63 }
  0x43   :  { %953 = vmatpush1.bf16.msra.mxu0 %v5255_v54  ;;  %655 = vmatprep.mubr.bf16.mxu0 %v6628_v1 }
  0x44   :  { %954 = vmatprep.subr.bf16.mxu0 %v5261_v55  ;;  %4327 = vmatmul.mubr.bf16.vlgmr.msra.gmra.mrb[8].mxu1 %v4716_v59 }
  0x45   :  { %4335 = vmatpush3.bf16.msra.mxu1 %v5297_v62  ;;  %4330 = vmatprep.mubr.bf16.mxu1 %v4725_v2 }
  0x46   :  { %4336 = vmatprep.subr.bf16.mxu1 %v6630_v63 }
  0x47   :  { %955 = vmatpush1.bf16.msra.mxu0 %v5270_v57 }
  0x48   :  { %956 = vmatprep.subr.bf16.mxu0 %v5277_v58 }
  0x49   :  { %4337 = vmatpush3.bf16.msra.mxu1 %v5320_v4 }
  0x4a   :  { %656 = vmatmul.mubr.bf16.gmra.mrb[20].mxu0 %v4716_v59  ;;  %4338 = vmatprep.subr.bf16.mxu1 %v6630_v63 }
  0x4b   :  { %957 = vmatpush1.bf16.msra.mxu0 %v5286_v60  ;;  %665 = vmatprep.mubr.bf16.mxu0 %v6628_v1 }
  0x4c   :  { %958 = vmatprep.subr.bf16.mxu0 %v5292_v61  ;;  %4331 = vmatmul.mubr.bf16.gmra.mrb[12].mxu1 %v4734_v8 }
  0x4d   :  { %4339 = vmatpush3.bf16.msra.mxu1 %v5339_v7  ;;  %4350 = vmatprep.mubr.msk.bf16.mxu1 %vm5030_vm0, %v6630_v63 }
  0x4e   :  { %4340 = vmatprep.subr.bf16.mxu1 %v6630_v63 }
  0x4f   :  { %959 = vmatpush1.bf16.msra.mxu0 %v5304_v0 }
  0x50   :  { %960 = vmatprep.subr.bf16.mxu0 %v5314_v3 }
  0x51   :  { %4341 = vmatpush3.bf16.msra.mxu1 %v5362_v11 }
  0x52   :  { %666 = vmatmul.mubr.bf16.gmra.mrb[24].mxu0 %v4725_v2  ;;  %4342 = vmatprep.subr.bf16.mxu1 %v6630_v63 }
  0x53   :  { %961 = vmatpush1.bf16.msra.mxu0 %v5327_v5  ;;  %675 = vmatprep.mubr.bf16.mxu0 %v6628_v1 }
  0x54   :  { %962 = vmatprep.subr.bf16.mxu0 %v5333_v6 }
  0x55   :  { %4343 = vmatpush3.bf16.msra.mxu1 %v5383_v14 }
  0x56   :  { %4344 = vmatprep.subr.bf16.mxu1 %v6630_v63 }
  0x57   :  { %963 = vmatpush1.bf16.msra.mxu0 %v5349_v9 }
  0x58   :  { %964 = vmatprep.subr.bf16.mxu0 %v5356_v10 }
  0x59   :  { %4345 = vmatpush3.bf16.msra.mxu1 %v5398_v16 }
  0x5a   :  { %676 = vmatmul.mubr.bf16.gmra.mrb[28].mxu0 %v4734_v8  ;;  %4346 = vmatprep.subr.bf16.mxu1 %v6630_v63 }
  0x5b   :  { %965 = vmatpush1.bf16.msra.mxu0 %v5371_v12  ;;  %984 = vmatprep.mubr.bf16.mxu0 %v6628_v1 }
  0x5c   :  { %966 = vmatprep.subr.bf16.mxu0 %v5377_v13 }
  0x5d   :  { %4347 = vmatpush3.bf16.msra.mxu1 %v5407_v17 }
  0x5e   :  { %4348 = vmatprep.subr.bf16.mxu1 %v6630_v63 }
  0x5f   :  { %967 = vmatpush1.bf16.msra.mxu0 %v5390_v15 }
  0x60   :  { %1061 = vmatprep.subr.bf16.mxu0 %v5247_v52 }
  0x61   :  { %4349 = vmatpush3.bf16.msra.mxu1 %v5418_v18 }
  0x62   :  { %985 = vmatmul.mubr.bf16.vlgmr.msra.gmra.mrb[32].mxu0 %v6628_v1  ;;  %4354 = vmatprep.subr.bf16.mxu1 %v6630_v63 }
  0x63   :  { %1062 = vmatpush1.bf16.msra.mxu0 %v5255_v54  ;;  %1093 = vmatprep.mubr.bf16.mxu0 %v6628_v1 }
  0x64   :  { %1063 = vmatprep.subr.bf16.mxu0 %v5261_v55  ;;  %4351 = vmatmul.mubr.bf16.vlgmr.msra.gmra.mrb[16].mxu1 %v6628_v1 }
  0x65   :  { %4355 = vmatpush3.bf16.msra.mxu1 %v5297_v62  ;;  %4370 = vmatprep.mubr.msk.bf16.mxu1 %vm5030_vm0, %v6630_v63 }
  0x66   :  { %4356 = vmatprep.subr.bf16.mxu1 %v6630_v63 }
  0x67   :  { %1064 = vmatpush1.bf16.msra.mxu0 %v5270_v57 }
  0x68   :  { %1065 = vmatprep.subr.bf16.mxu0 %v5277_v58 }
  0x69   :  { %4357 = vmatpush3.bf16.msra.mxu1 %v5320_v4 }
  0x6a   :  { %4358 = vmatprep.subr.bf16.mxu1 %v6630_v63 }
  0x6b   :  { %1066 = vmatpush1.bf16.msra.mxu0 %v5286_v60 }
  0x6c   :  { %1067 = vmatprep.subr.bf16.mxu0 %v5292_v61 }
  0x6d   :  { %4359 = vmatpush3.bf16.msra.mxu1 %v5339_v7 }
  0x6e   :  { %4360 = vmatprep.subr.bf16.mxu1 %v6630_v63 }
  0x6f   :  { %1068 = vmatpush1.bf16.msra.mxu0 %v5304_v0 }
  0x70   :  { %1069 = vmatprep.subr.bf16.mxu0 %v5314_v3 }
  0x71   :  { %4361 = vmatpush3.bf16.msra.mxu1 %v5362_v11 }
  0x72   :  { %4362 = vmatprep.subr.bf16.mxu1 %v6630_v63 }
  0x73   :  { %1070 = vmatpush1.bf16.msra.mxu0 %v5327_v5 }
  0x74   :  { %1071 = vmatprep.subr.bf16.mxu0 %v5333_v6 }
  0x75   :  { %4363 = vmatpush3.bf16.msra.mxu1 %v5383_v14 }
  0x76   :  { %4364 = vmatprep.subr.bf16.mxu1 %v6630_v63 }
  0x77   :  { %1072 = vmatpush1.bf16.msra.mxu0 %v5349_v9 }
  0x78   :  { %1073 = vmatprep.subr.bf16.mxu0 %v5356_v10 }
  0x79   :  { %4365 = vmatpush3.bf16.msra.mxu1 %v5398_v16 }
  0x7a   :  { %4366 = vmatprep.subr.bf16.mxu1 %v6630_v63 }
  0x7b   :  { %1074 = vmatpush1.bf16.msra.mxu0 %v5371_v12 }
  0x7c   :  { %1075 = vmatprep.subr.bf16.mxu0 %v5377_v13 }
  0x7d   :  { %4367 = vmatpush3.bf16.msra.mxu1 %v5407_v17 }
  0x7e   :  { %4368 = vmatprep.subr.bf16.mxu1 %v6630_v63 }
  0x7f   :  { %1076 = vmatpush1.bf16.msra.mxu0 %v5390_v15 }
  0x80   :  { %1170 = vmatprep.subr.bf16.mxu0 %v5247_v52 }
  0x81   :  { %4369 = vmatpush3.bf16.msra.mxu1 %v5418_v18 }
  0x82   :  { %4374 = vmatprep.subr.bf16.mxu1 %v6630_v63 }
  0xf5   :  { %v5463_v24 = vpop.f32.mrb[0].mxu0 }
  0xf6   :  { %v5468_v26 = vpop.f32.mrb[1].mxu0 }
  0xf7   :  { %v283_v28 = vpop.f32.mrb[2].mxu0  ;;  %v4304_v39 = vpop.f32.mrb[0].mxu1 }
  0xf8   :  { %v5474_v29 = vadd.f32 %v283_v28, %v5466_v25  ;;  %v285_v30 = vpop.f32.mrb[3].mxu0  ;;  %v5494_v42 = vadd.f32 %v4304_v39, %v5482_v33  ;;  %v5496_v43 = vpop.f32.mrb[1].mxu1 }
  0xf9   :  { %v5479_v32 = vadd.f32 %v285_v30, %v5471_v27  ;;  %v4305_v45 = vpop.f32.mrb[2].mxu1 }
  0xfa   :  { %v5502_v46 = vadd.f32 %v4305_v45, %v5482_v33  ;;  %v355_v47 = vpop.f32.mrb[3].mxu1 }
  0xfb   :  { %v5505_v48 = vadd.f32 %v355_v47, %v5482_v33 }
  0xfd   :  { %v289_v34 = vpop.f32.mrb[4].mxu0 }
  0xfe   :  { %v5485_v35 = vadd.f32 %v289_v34, %v5466_v25  ;;  %v291_v36 = vpop.f32.mrb[5].mxu0 }
  0xff   :  { %v5488_v37 = vadd.f32 %v291_v36, %v5471_v27  ;;  %v293_v38 = vpop.f32.mrb[6].mxu0  ;;  %v4308_v59 = vpop.f32.mrb[4].mxu1 }
 0x100   :  { %v5491_v40 = vadd.f32 %v293_v38, %v5466_v25  ;;  %v295_v41 = vpop.f32.mrb[7].mxu0  ;;  %v5517_v19 = vadd.f32 %v4308_v59, %v5482_v33  ;;  %v368_v20 = vpop.f32.mrb[5].mxu1 }
 0x101   :  { %v5499_v44 = vadd.f32 %v295_v41, %v5471_v27  ;;  %v5523_v28 = vadd.f32 %v368_v20, %v5482_v33  ;;  %v4309_v30 = vpop.f32.mrb[6].mxu1 }
 0x102   :  { %6639 = vst [vmem:[#allocation6_spill] sm:$0xff] %v5517_v19  ;;  %v5526_v34 = vadd.f32 %v4309_v30, %v5482_v33  ;;  %v371_v36 = vpop.f32.mrb[7].mxu1 }
 0x103   :  { %v5529_v38 = vadd.f32 %v371_v36, %v5482_v33 }
 0x104   :  { %6640 = vst [vmem:[#allocation7_spill] sm:$0xff] %v5526_v34 }
 0x105   :  { %v299_v49 = vpop.f32.mrb[8].mxu0  ;;  %6641 = vst [vmem:[#allocation8_spill] sm:$0xff] %v5529_v38 }
 0x106   :  { %v5508_v50 = vadd.f32 %v299_v49, %v5466_v25  ;;  %v301_v51 = vpop.f32.mrb[9].mxu0 }
 0x107   :  { %v5511_v53 = vadd.f32 %v301_v51, %v5471_v27  ;;  %v303_v56 = vpop.f32.mrb[10].mxu0 }
 0x108   :  { %v5514_v2 = vadd.f32 %v303_v56, %v5466_v25  ;;  %v305_v8 = vpop.f32.mrb[11].mxu0 }
 0x109   :  { %v5520_v22 = vadd.f32 %v305_v8, %v5471_v27 }
 0x10d   :  { %v309_v39 = vpop.f32.mrb[12].mxu0 }
 0x10e   :  { %v5532_v41 = vadd.f32 %v309_v39, %v5466_v25  ;;  %v311_v45 = vpop.f32.mrb[13].mxu0  ;;  %v446_v39 = vld [vmem:[%s6623_s8] sm:$0x7] }
 0x10f   :  { %v5535_v47 = vadd.f32 %v311_v45, %v5471_v27  ;;  %v313_v49 = vpop.f32.mrb[14].mxu0  ;;  %v5555_v45 = vrot.slane %v446_v39, %v5476_v31 }
 0x110   :  { %6642 = vst [vmem:[#allocation9_spill] sm:$0xff] %v5532_v41  ;;  %v5538_v51 = vadd.f32 %v313_v49, %v5466_v25  ;;  %v315_v56 = vpop.f32.mrb[15].mxu0 }
 0x111   :  { %6643 = vst [vmem:[#allocation10_spill] sm:$0xff] %v5535_v47  ;;  %v5541_v59 = vadd.f32 %v315_v56, %v5471_v27  ;;  %6650 = vst [vmem:[#allocation17_spill] sm:$0xff] %v5555_v45 }
 0x112   :  { %6644 = vst [vmem:[#allocation11_spill] sm:$0xff] %v5538_v51 }
 0x113   :  { %6645 = vst [vmem:[#allocation12_spill] sm:$0xff] %v5541_v59 }
 0x115   :  { %v5543_v8 = vpop.f32.mrb[16].mxu0 }
 0x116   :  { %6646 = vst [vmem:[#allocation13_spill] sm:$0xff] %v5543_v8  ;;  %v5545_v20 = vpop.f32.mrb[17].mxu0 }
 0x117   :  { %6647 = vst [vmem:[#allocation14_spill] sm:$0xff] %v5545_v20  ;;  %v5547_v30 = vpop.f32.mrb[18].mxu0  ;;  %v4328_v63 = vpop.f32.mrb[8].mxu1 }
 0x118   :  { %6648 = vst [vmem:[#allocation15_spill] sm:$0xff] %v5547_v30  ;;  %v5549_v36 = vpop.f32.mrb[19].mxu0  ;;  %v5566_v30 = vadd.f32 %v4328_v63, %v5555_v45 }
 0x119   :  { %6649 = vst [vmem:[#allocation16_spill] sm:$0xff] %v5549_v36  ;;  %v5568_v36 = vpop.f32.mrb[9].mxu1 }
 0x11a   :  { %6655 = vst [vmem:[#allocation22_spill] sm:$0xff] %v5566_v30  ;;  %6656 = vst [vmem:[#allocation23_spill] sm:$0xff] %v5568_v36  ;;  %v4329_v20 = vpop.f32.mrb[10].mxu1 }
 0x11b   :  { %v5571_v34 = vadd.f32 %v4329_v20, %v5555_v45  ;;  %v721_v39 = vpop.f32.mrb[11].mxu1 }
 0x11c   :  { %v5574_v59 = vadd.f32 %v721_v39, %v5555_v45 }
 0x11d   :  { %v5557_v49 = vpop.f32.mrb[20].mxu0  ;;  %6657 = vst [vmem:[#allocation24_spill] sm:$0xff] %v5571_v34 }
 0x11e   :  { %6651 = vst [vmem:[#allocation18_spill] sm:$0xff] %v5557_v49  ;;  %v5559_v1 = vpop.f32.mrb[21].mxu0  ;;  %6658 = vst [vmem:[#allocation25_spill] sm:$0xff] %v5574_v59 }
 0x11f   :  { %6652 = vst [vmem:[#allocation19_spill] sm:$0xff] %v5559_v1  ;;  %v5561_v56 = vpop.f32.mrb[22].mxu0 }
 0x120   :  { %6653 = vst [vmem:[#allocation20_spill] sm:$0xff] %v5561_v56  ;;  %v5563_v8 = vpop.f32.mrb[23].mxu0 }
 0x121   :  { %6654 = vst [vmem:[#allocation21_spill] sm:$0xff] %v5563_v8  ;;  %v4332_v8 = vpop.f32.mrb[12].mxu1 }
 0x122   :  { %v5585_v63 = vadd.f32 %v4332_v8, %v5555_v45  ;;  %v734_v30 = vpop.f32.mrb[13].mxu1 }
 0x123   :  { %v5588_v20 = vadd.f32 %v734_v30, %v5555_v45  ;;  %v4333_v34 = vpop.f32.mrb[14].mxu1  ;;  %v280_v30 = vadd.f32 %v5463_v24, %v5466_v25 }
 0x124   :  { %6663 = vst [vmem:[#allocation30_spill] sm:$0xff] %v5585_v63  ;;  %v737_v36 = vpop.f32.mrb[15].mxu1 }
 0x125   :  { %v5576_v49 = vpop.f32.mrb[24].mxu0  ;;  %6664 = vst [vmem:[#allocation31_spill] sm:$0xff] %v5588_v20  ;;  %v5591_v39 = vadd.f32 %v737_v36, %v5555_v45  ;;  %v282_v36 = vadd.f32 %v5468_v26, %v5471_v27 }
 0x126   :  { %6659 = vst [vmem:[#allocation26_spill] sm:$0xff] %v5576_v49  ;;  %v5578_v1 = vpop.f32.mrb[25].mxu0 }
 0x127   :  { %6660 = vst [vmem:[#allocation27_spill] sm:$0xff] %v5578_v1  ;;  %v5580_v56 = vpop.f32.mrb[26].mxu0  ;;  %6665 = vst [vmem:[#allocation32_spill] sm:$0xff] %v5591_v39  ;;  %v807_v1 = vld [vmem:[%s6624_s5] sm:$0x7] }
 0x128   :  { %6661 = vst [vmem:[#allocation28_spill] sm:$0xff] %v5580_v56  ;;  %v5582_v51 = vpop.f32.mrb[27].mxu0  ;;  %v5597_v56 = vrot.slane %v807_v1, %v5456_v21 }
 0x129   :  { %6662 = vst [vmem:[#allocation29_spill] sm:$0xff] %v5582_v51  ;;  %v5600_v51 = vrot.slane %v807_v1, %v5461_v23 }
 0x135   :  { %v986_v8 = vpop.f32.mrb[32].mxu0 }
 0x136   :  { %v987_v34 = vadd.f32 %v986_v8, %v5597_v56  ;;  %v988_v63 = vpop.f32.mrb[33].mxu0  ;;  %v5609_v8 = vrot.slane %v807_v1, %v5476_v31 }
 0x137   :  { %v989_v39 = vadd.f32 %v988_v63, %v5600_v51  ;;  %v990_v20 = vpop.f32.mrb[34].mxu0  ;;  %v1027_v19 = vpop.f32.mrb[16].mxu1 }
 0x138   :  { %v1033_v49 = vadd.f32 %v987_v34, %v280_v30  ;;  %v991_v59 = vpop.f32.mrb[35].mxu0  ;;  %v4352_v47 = vpop.f32.mrb[17].mxu1  ;;  %v1028_v63 = vadd.f32 %v1027_v19, %v5609_v8 }
 0x139   :  { %v1040_v45 = vadd.f32 %v989_v39, %v282_v36  ;;  %v1030_v41 = vpop.f32.mrb[18].mxu1 }
 0x13a   :  { %v3923_v21 = vmul.f32 -1.442695, %v1033_v49  ;;  %v4353_v38 = vpop.f32.mrb[19].mxu1 }
 0x13b   :  { %v3924_v23 = vmul.f32 -1.442695, %v1040_v45 }
 0x13c   :  { %4853 = vpow2.f32 %v3923_v21  ;;  %v353_v21 = vadd.f32 %v5496_v43, %v5482_v33  ;;  %v6666_v33 = vmov 0.0   ;;  %v6667_v43 = vmov 0  }
 0x13d   :  { %4855 = vpow2.f32 %v3924_v23 }
 0x146   :  { %v4854_v24 = vpop.eup %4853 }
 0x147   :  { %v1037_v25 = vadd.f32 1.0, %v4854_v24  ;;  %v4856_v26 = vpop.eup %4855 }
 0x148   :  { %v1044_v27 = vadd.f32 1.0, %v4856_v26 }
 0x149   :  { %4857 = vrcp.f32 %v1037_v25 }
 0x14a   :  { %4859 = vrcp.f32 %v1044_v27 }
 0x153   :  { %v4858_v59 = vpop.eup %4857 }
 0x154   :  { %v1047_v45 = vmul.f32 %v4858_v59, %v1028_v63  ;;  %v4860_v38 = vpop.eup %4859 }
 0x155   :  { %v1050_v23 = vsub.f32 1.0, %v4860_v38  ;;  %v1052_v20 = vmul.f32 0.0, %v4860_v38 }
 0x156   :  { %v1048_v47 = vadd.f32 %v1047_v45, %v353_v21 }
 0x158   :  { %4861 = vtanh.f32 %v1048_v47 }
 0x162   :  { %v4862_v41 = vpop.eup %4861 }
 0x163   :  { %v1051_v49 = vmul.f32 %v4862_v41, %v1050_v23 }
 0x165   :  { %v5614_v39 = vadd.f32 %v1052_v20, %v1051_v49 }
 0x167   :  { %v1060_v1 = vpack.c.bf16 %v5614_v39, %v5614_v39 }
 0x169   :  { %1094 = vmatmul.mubr.bf16.vlgmr.msra.gmra.mrb[36].mxu0 %v1060_v1  ;;  %4371 = vmatmul.mubr.bf16.vlgmr.msra.gmra.mrb[20].mxu1 %v1060_v1 }
 0x16a   :  { %1171 = vmatpush1.bf16.msra.mxu0 %v5255_v54  ;;  %4375 = vmatpush3.bf16.msra.mxu1 %v5297_v62 }
 0x16b   :  { %1172 = vmatprep.subr.bf16.mxu0 %v5261_v55  ;;  %4376 = vmatprep.subr.bf16.mxu1 %v6666_v33 }
 0x16c   :  { %1202 = vmatprep.mubr.bf16.mxu0 %v6667_v43  ;;  %4390 = vmatprep.mubr.msk.bf16.mxu1 %vm5030_vm0, %v6666_v33 }
 0x16e   :  { %1173 = vmatpush1.bf16.msra.mxu0 %v5270_v57  ;;  %4377 = vmatpush3.bf16.msra.mxu1 %v5320_v4 }
 0x16f   :  { %1174 = vmatprep.subr.bf16.mxu0 %v5277_v58  ;;  %4378 = vmatprep.subr.bf16.mxu1 %v6666_v33 }
 0x172   :  { %1175 = vmatpush1.bf16.msra.mxu0 %v5286_v60  ;;  %4379 = vmatpush3.bf16.msra.mxu1 %v5339_v7 }
 0x173   :  { %1176 = vmatprep.subr.bf16.mxu0 %v5292_v61  ;;  %4380 = vmatprep.subr.bf16.mxu1 %v6666_v33 }
 0x176   :  { %1177 = vmatpush1.bf16.msra.mxu0 %v5304_v0  ;;  %4381 = vmatpush3.bf16.msra.mxu1 %v5362_v11 }
 0x177   :  { %1178 = vmatprep.subr.bf16.mxu0 %v5314_v3  ;;  %4382 = vmatprep.subr.bf16.mxu1 %v6666_v33 }
 0x17a   :  { %1179 = vmatpush1.bf16.msra.mxu0 %v5327_v5  ;;  %4383 = vmatpush3.bf16.msra.mxu1 %v5383_v14 }
 0x17b   :  { %1180 = vmatprep.subr.bf16.mxu0 %v5333_v6  ;;  %4384 = vmatprep.subr.bf16.mxu1 %v6666_v33 }
 0x17e   :  { %1181 = vmatpush1.bf16.msra.mxu0 %v5349_v9  ;;  %4385 = vmatpush3.bf16.msra.mxu1 %v5398_v16 }
 0x17f   :  { %1182 = vmatprep.subr.bf16.mxu0 %v5356_v10  ;;  %4386 = vmatprep.subr.bf16.mxu1 %v6666_v33 }
 0x182   :  { %1183 = vmatpush1.bf16.msra.mxu0 %v5371_v12  ;;  %4387 = vmatpush3.bf16.msra.mxu1 %v5407_v17 }
 0x183   :  { %1184 = vmatprep.subr.bf16.mxu0 %v5377_v13  ;;  %4388 = vmatprep.subr.bf16.mxu1 %v6666_v33 }
 0x186   :  { %1185 = vmatpush1.bf16.msra.mxu0 %v5390_v15  ;;  %4389 = vmatpush3.bf16.msra.mxu1 %v5418_v18 }
 0x187   :  { %1279 = vmatprep.subr.bf16.mxu0 %v5247_v52  ;;  %4394 = vmatprep.subr.bf16.mxu1 %v6666_v33 }
 0x23c   :  { %v1095_v19 = vpop.f32.mrb[36].mxu0  ;;  %v1136_v30 = vpop.f32.mrb[20].mxu1 }
 0x23d   :  { %v1096_v34 = vadd.f32 %v1095_v19, %v5597_v56  ;;  %v1097_v36 = vpop.f32.mrb[37].mxu0  ;;  %v4372_v24 = vpop.f32.mrb[21].mxu1  ;;  %v1137_v1 = vadd.f32 %v1136_v30, %v5609_v8 }
 0x23e   :  { %v1098_v25 = vadd.f32 %v1097_v36, %v5600_v51  ;;  %v1099_v26 = vpop.f32.mrb[38].mxu0  ;;  %v1139_v27 = vpop.f32.mrb[22].mxu1 }
 0x23f   :  { %v1142_v63 = vadd.f32 %v1096_v34, %v5474_v29  ;;  %v1100_v59 = vpop.f32.mrb[39].mxu0  ;;  %v4373_v21 = vpop.f32.mrb[23].mxu1 }
 0x240   :  { %v1149_v45 = vadd.f32 %v1098_v25, %v5479_v32 }
 0x241   :  { %v3925_v47 = vmul.f32 -1.442695, %v1142_v63 }
 0x242   :  { %v3926_v38 = vmul.f32 -1.442695, %v1149_v45 }
 0x243   :  { %4863 = vpow2.f32 %v3925_v47 }
 0x244   :  { %4865 = vpow2.f32 %v3926_v38 }
 0x24d   :  { %v4864_v23 = vpop.eup %4863 }
 0x24e   :  { %v1146_v41 = vadd.f32 1.0, %v4864_v23  ;;  %v4866_v49 = vpop.eup %4865 }
 0x24f   :  { %v1153_v20 = vadd.f32 1.0, %v4866_v49 }
 0x250   :  { %4867 = vrcp.f32 %v1146_v41 }
 0x251   :  { %4869 = vrcp.f32 %v1153_v20 }
 0x25a   :  { %v4868_v19 = vpop.eup %4867 }
 0x25b   :  { %v1156_v36 = vmul.f32 %v4868_v19, %v1137_v1  ;;  %v4870_v34 = vpop.eup %4869 }
 0x25c   :  { %v1159_v24 = vsub.f32 1.0, %v4870_v34  ;;  %v1161_v26 = vmul.f32 %v4870_v34, %v5614_v39 }
 0x25d   :  { %v1157_v29 = vadd.f32 %v1156_v36, %v5505_v48 }
 0x25f   :  { %4871 = vtanh.f32 %v1157_v29 }
 0x269   :  { %v4872_v32 = vpop.eup %4871 }
 0x26a   :  { %v1160_v25 = vmul.f32 %v4872_v32, %v1159_v24 }
 0x26c   :  { %v5660_v27 = vadd.f32 %v1161_v26, %v1160_v25 }
 0x26e   :  { %v1169_v63 = vpack.c.bf16 %v5660_v27, %v5660_v27 }
 0x270   :  { %1203 = vmatmul.mubr.bf16.vlgmr.msra.gmra.mrb[40].mxu0 %v1169_v63  ;;  %4391 = vmatmul.mubr.bf16.vlgmr.msra.gmra.mrb[24].mxu1 %v1169_v63 }
 0x271   :  { %1280 = vmatpush1.bf16.msra.mxu0 %v5255_v54  ;;  %4395 = vmatpush3.bf16.msra.mxu1 %v5297_v62 }
 0x272   :  { %1281 = vmatprep.subr.bf16.mxu0 %v5261_v55  ;;  %4396 = vmatprep.subr.bf16.mxu1 %v6666_v33 }
 0x273   :  { %1311 = vmatprep.mubr.bf16.mxu0 %v6667_v43  ;;  %4410 = vmatprep.mubr.msk.bf16.mxu1 %vm5030_vm0, %v6666_v33 }
 0x275   :  { %1282 = vmatpush1.bf16.msra.mxu0 %v5270_v57  ;;  %4397 = vmatpush3.bf16.msra.mxu1 %v5320_v4 }
 0x276   :  { %1283 = vmatprep.subr.bf16.mxu0 %v5277_v58  ;;  %4398 = vmatprep.subr.bf16.mxu1 %v6666_v33 }
 0x279   :  { %1284 = vmatpush1.bf16.msra.mxu0 %v5286_v60  ;;  %4399 = vmatpush3.bf16.msra.mxu1 %v5339_v7 }
 0x27a   :  { %1285 = vmatprep.subr.bf16.mxu0 %v5292_v61  ;;  %4400 = vmatprep.subr.bf16.mxu1 %v6666_v33 }
 0x27d   :  { %1286 = vmatpush1.bf16.msra.mxu0 %v5304_v0  ;;  %4401 = vmatpush3.bf16.msra.mxu1 %v5362_v11 }
 0x27e   :  { %1287 = vmatprep.subr.bf16.mxu0 %v5314_v3  ;;  %4402 = vmatprep.subr.bf16.mxu1 %v6666_v33 }
 0x281   :  { %1288 = vmatpush1.bf16.msra.mxu0 %v5327_v5  ;;  %4403 = vmatpush3.bf16.msra.mxu1 %v5383_v14 }
 0x282   :  { %1289 = vmatprep.subr.bf16.mxu0 %v5333_v6  ;;  %4404 = vmatprep.subr.bf16.mxu1 %v6666_v33 }
 0x285   :  { %1290 = vmatpush1.bf16.msra.mxu0 %v5349_v9  ;;  %4405 = vmatpush3.bf16.msra.mxu1 %v5398_v16 }
 0x286   :  { %1291 = vmatprep.subr.bf16.mxu0 %v5356_v10  ;;  %4406 = vmatprep.subr.bf16.mxu1 %v6666_v33 }
 0x289   :  { %1292 = vmatpush1.bf16.msra.mxu0 %v5371_v12  ;;  %4407 = vmatpush3.bf16.msra.mxu1 %v5407_v17 }
 0x28a   :  { %1293 = vmatprep.subr.bf16.mxu0 %v5377_v13  ;;  %4408 = vmatprep.subr.bf16.mxu1 %v6666_v33 }
 0x28d   :  { %1294 = vmatpush1.bf16.msra.mxu0 %v5390_v15  ;;  %4409 = vmatpush3.bf16.msra.mxu1 %v5418_v18 }
 0x28e   :  { %1388 = vmatprep.subr.bf16.mxu0 %v5247_v52  ;;  %4414 = vmatprep.subr.bf16.mxu1 %v6666_v33 }
 0x343   :  { %v1204_v48 = vpop.f32.mrb[40].mxu0  ;;  %v1245_v39 = vpop.f32.mrb[24].mxu1 }
 0x344   :  { %v1205_v30 = vadd.f32 %v1204_v48, %v5597_v56  ;;  %v1206_v59 = vpop.f32.mrb[41].mxu0  ;;  %v4392_v21 = vpop.f32.mrb[25].mxu1  ;;  %v1246_v32 = vadd.f32 %v1245_v39, %v5609_v8 }
 0x345   :  { %v1207_v45 = vadd.f32 %v1206_v59, %v5600_v51  ;;  %v1208_v47 = vpop.f32.mrb[42].mxu0  ;;  %v1248_v38 = vpop.f32.mrb[26].mxu1 }
 0x346   :  { %v1251_v23 = vadd.f32 %v1205_v30, %v5485_v35  ;;  %v1209_v41 = vpop.f32.mrb[43].mxu0  ;;  %v4393_v49 = vpop.f32.mrb[27].mxu1 }
 0x347   :  { %v1258_v20 = vadd.f32 %v1207_v45, %v5488_v37 }
 0x348   :  { %v3927_v1 = vmul.f32 -1.442695, %v1251_v23 }
 0x349   :  { %v3928_v19 = vmul.f32 -1.442695, %v1258_v20 }
 0x34a   :  { %4873 = vpow2.f32 %v3927_v1 }
 0x34b   :  { %4875 = vpow2.f32 %v3928_v19 }
 0x354   :  { %v4874_v36 = vpop.eup %4873 }
 0x355   :  { %v1255_v29 = vadd.f32 1.0, %v4874_v36  ;;  %v4876_v34 = vpop.eup %4875 }
 0x356   :  { %v1262_v24 = vadd.f32 1.0, %v4876_v34 }
 0x357   :  { %4877 = vrcp.f32 %v1255_v29 }
 0x358   :  { %4879 = vrcp.f32 %v1262_v24 }
 0x361   :  { %v4878_v25 = vpop.eup %4877 }
 0x362   :  { %v1265_v26 = vmul.f32 %v4878_v25, %v1246_v32  ;;  %v4880_v63 = vpop.eup %4879 }
 0x363   :  { %v1268_v48 = vsub.f32 1.0, %v4880_v63  ;;  %v1270_v59 = vmul.f32 %v4880_v63, %v5660_v27 }
 0x364   :  { %v1266_v35 = vadd.f32 %v1265_v26, %v5494_v42 }
 0x366   :  { %4881 = vtanh.f32 %v1266_v35 }
 0x370   :  { %v4882_v37 = vpop.eup %4881 }
 0x371   :  { %v1269_v30 = vmul.f32 %v4882_v37, %v1268_v48 }
 0x373   :  { %v5706_v21 = vadd.f32 %v1270_v59, %v1269_v30 }
 0x375   :  { %v1278_v45 = vpack.c.bf16 %v5706_v21, %v5706_v21 }
 0x377   :  { %1312 = vmatmul.mubr.bf16.vlgmr.msra.gmra.mrb[44].mxu0 %v1278_v45  ;;  %4411 = vmatmul.mubr.bf16.vlgmr.msra.gmra.mrb[28].mxu1 %v1278_v45 }
 0x378   :  { %1389 = vmatpush1.bf16.msra.mxu0 %v5255_v54  ;;  %4415 = vmatpush3.bf16.msra.mxu1 %v5297_v62 }
 0x379   :  { %1390 = vmatprep.subr.bf16.mxu0 %v5261_v55  ;;  %4416 = vmatprep.subr.bf16.mxu1 %v6666_v33 }
 0x37a   :  { %1420 = vmatprep.mubr.bf16.mxu0 %v6667_v43  ;;  %4430 = vmatprep.mubr.msk.bf16.mxu1 %vm5030_vm0, %v6666_v33 }
 0x37c   :  { %1391 = vmatpush1.bf16.msra.mxu0 %v5270_v57  ;;  %4417 = vmatpush3.bf16.msra.mxu1 %v5320_v4 }
 0x37d   :  { %1392 = vmatprep.subr.bf16.mxu0 %v5277_v58  ;;  %4418 = vmatprep.subr.bf16.mxu1 %v6666_v33 }
 0x380   :  { %1393 = vmatpush1.bf16.msra.mxu0 %v5286_v60  ;;  %4419 = vmatpush3.bf16.msra.mxu1 %v5339_v7 }
 0x381   :  { %1394 = vmatprep.subr.bf16.mxu0 %v5292_v61  ;;  %4420 = vmatprep.subr.bf16.mxu1 %v6666_v33 }
 0x384   :  { %1395 = vmatpush1.bf16.msra.mxu0 %v5304_v0  ;;  %4421 = vmatpush3.bf16.msra.mxu1 %v5362_v11 }
 0x385   :  { %1396 = vmatprep.subr.bf16.mxu0 %v5314_v3  ;;  %4422 = vmatprep.subr.bf16.mxu1 %v6666_v33 }
 0x388   :  { %1397 = vmatpush1.bf16.msra.mxu0 %v5327_v5  ;;  %4423 = vmatpush3.bf16.msra.mxu1 %v5383_v14 }
 0x389   :  { %1398 = vmatprep.subr.bf16.mxu0 %v5333_v6  ;;  %4424 = vmatprep.subr.bf16.mxu1 %v6666_v33 }
 0x38c   :  { %1399 = vmatpush1.bf16.msra.mxu0 %v5349_v9  ;;  %4425 = vmatpush3.bf16.msra.mxu1 %v5398_v16 }
 0x38d   :  { %1400 = vmatprep.subr.bf16.mxu0 %v5356_v10  ;;  %4426 = vmatprep.subr.bf16.mxu1 %v6666_v33 }
 0x390   :  { %1401 = vmatpush1.bf16.msra.mxu0 %v5371_v12  ;;  %4427 = vmatpush3.bf16.msra.mxu1 %v5407_v17 }
 0x391   :  { %1402 = vmatprep.subr.bf16.mxu0 %v5377_v13  ;;  %4428 = vmatprep.subr.bf16.mxu1 %v6666_v33 }
 0x394   :  { %1403 = vmatpush1.bf16.msra.mxu0 %v5390_v15  ;;  %4429 = vmatpush3.bf16.msra.mxu1 %v5418_v18 }
 0x395   :  { %1497 = vmatprep.subr.bf16.mxu0 %v5247_v52  ;;  %4434 = vmatprep.subr.bf16.mxu1 %v6666_v33 }
 0x44a   :  { %v1313_v42 = vpop.f32.mrb[44].mxu0  ;;  %v1354_v27 = vpop.f32.mrb[28].mxu1 }
 0x44b   :  { %v1314_v39 = vadd.f32 %v1313_v42, %v5597_v56  ;;  %v1315_v47 = vpop.f32.mrb[45].mxu0  ;;  %v4412_v38 = vpop.f32.mrb[29].mxu1  ;;  %v1355_v35 = vadd.f32 %v1354_v27, %v5609_v8 }
 0x44c   :  { %v1316_v23 = vadd.f32 %v1315_v47, %v5600_v51  ;;  %v1317_v41 = vpop.f32.mrb[46].mxu0  ;;  %v1357_v49 = vpop.f32.mrb[30].mxu1 }
 0x44d   :  { %v1360_v20 = vadd.f32 %v1314_v39, %v5491_v40  ;;  %v1318_v1 = vpop.f32.mrb[47].mxu0  ;;  %v4413_v19 = vpop.f32.mrb[31].mxu1 }
 0x44e   :  { %v1367_v36 = vadd.f32 %v1316_v23, %v5499_v44 }
 0x44f   :  { %v3929_v29 = vmul.f32 -1.442695, %v1360_v20 }
 0x450   :  { %v3930_v34 = vmul.f32 -1.442695, %v1367_v36 }
 0x451   :  { %4883 = vpow2.f32 %v3929_v29 }
 0x452   :  { %4885 = vpow2.f32 %v3930_v34 }
 0x45b   :  { %v4884_v24 = vpop.eup %4883 }
 0x45c   :  { %v1364_v32 = vadd.f32 1.0, %v4884_v24  ;;  %v4886_v25 = vpop.eup %4885 }
 0x45d   :  { %v1371_v26 = vadd.f32 1.0, %v4886_v25 }
 0x45e   :  { %4887 = vrcp.f32 %v1364_v32 }
 0x45f   :  { %4889 = vrcp.f32 %v1371_v26 }
 0x468   :  { %v4888_v63 = vpop.eup %4887 }
 0x469   :  { %v1374_v48 = vmul.f32 %v4888_v63, %v1355_v35  ;;  %v4890_v37 = vpop.eup %4889  ;;  %v5805_v63 = vld [vmem:[%s6621_s3] ss:$12 sps:$4 sm:$0xff]  }
 0x46a   :  { %v1377_v30 = vsub.f32 1.0, %v4890_v37  ;;  %v1379_v45 = vmul.f32 %v4890_v37, %v5706_v21  ;;  %v5850_v37 = vld [vmem:[%s6621_s3 + $0x48] ss:$12 sps:$4 sm:$0xff]  }
 0x46b   :  { %v1375_v40 = vadd.f32 %v1374_v48, %v5502_v46  ;;  %v5822_v48 = vld [vmem:[%s6621_s3 + $0x18] ss:$12 sps:$4 sm:$0xff]  }
 0x46d   :  { %4891 = vtanh.f32 %v1375_v40  ;;  %v5836_v40 = vld [vmem:[%s6621_s3 + $0x30] ss:$12 sps:$4 sm:$0xff]  }
 0x477   :  { %v4892_v44 = vpop.eup %4891 }
 0x478   :  { %v1378_v59 = vmul.f32 %v4892_v44, %v1377_v30 }
 0x47a   :  { %v5752_v42 = vadd.f32 %v1379_v45, %v1378_v59 }
 0x47c   :  { %v1387_v39 = vpack.c.bf16 %v5752_v42, %v5752_v42 }
 0x47e   :  { %1421 = vmatmul.mubr.bf16.vlgmr.msra.gmra.mrb[48].mxu0 %v1387_v39  ;;  %4431 = vmatmul.mubr.bf16.vlgmr.msra.gmra.mrb[32].mxu1 %v1387_v39 }
 0x47f   :  { %1498 = vmatpush1.bf16.msra.mxu0 %v5255_v54  ;;  %4435 = vmatpush3.bf16.msra.mxu1 %v5297_v62 }
 0x480   :  { %1499 = vmatprep.subr.bf16.mxu0 %v5261_v55  ;;  %4436 = vmatprep.subr.bf16.mxu1 %v6666_v33 }
 0x481   :  { %1529 = vmatprep.mubr.bf16.mxu0 %v6667_v43  ;;  %4450 = vmatprep.mubr.msk.bf16.mxu1 %vm5030_vm0, %v6666_v33 }
 0x483   :  { %1500 = vmatpush1.bf16.msra.mxu0 %v5270_v57  ;;  %4437 = vmatpush3.bf16.msra.mxu1 %v5320_v4 }
 0x484   :  { %1501 = vmatprep.subr.bf16.mxu0 %v5277_v58  ;;  %4438 = vmatprep.subr.bf16.mxu1 %v6666_v33 }
 0x487   :  { %1502 = vmatpush1.bf16.msra.mxu0 %v5286_v60  ;;  %4439 = vmatpush3.bf16.msra.mxu1 %v5339_v7 }
 0x488   :  { %1503 = vmatprep.subr.bf16.mxu0 %v5292_v61  ;;  %4440 = vmatprep.subr.bf16.mxu1 %v6666_v33 }
 0x48b   :  { %1504 = vmatpush1.bf16.msra.mxu0 %v5304_v0  ;;  %4441 = vmatpush3.bf16.msra.mxu1 %v5362_v11 }
 0x48c   :  { %1505 = vmatprep.subr.bf16.mxu0 %v5314_v3  ;;  %4442 = vmatprep.subr.bf16.mxu1 %v6666_v33 }
 0x48f   :  { %1506 = vmatpush1.bf16.msra.mxu0 %v5327_v5  ;;  %4443 = vmatpush3.bf16.msra.mxu1 %v5383_v14 }
 0x490   :  { %1507 = vmatprep.subr.bf16.mxu0 %v5333_v6  ;;  %4444 = vmatprep.subr.bf16.mxu1 %v6666_v33 }
 0x493   :  { %1508 = vmatpush1.bf16.msra.mxu0 %v5349_v9  ;;  %4445 = vmatpush3.bf16.msra.mxu1 %v5398_v16 }
 0x494   :  { %1509 = vmatprep.subr.bf16.mxu0 %v5356_v10  ;;  %4446 = vmatprep.subr.bf16.mxu1 %v6666_v33 }
 0x497   :  { %1510 = vmatpush1.bf16.msra.mxu0 %v5371_v12  ;;  %4447 = vmatpush3.bf16.msra.mxu1 %v5407_v17 }
 0x498   :  { %1511 = vmatprep.subr.bf16.mxu0 %v5377_v13  ;;  %4448 = vmatprep.subr.bf16.mxu1 %v6666_v33 }
 0x49b   :  { %1512 = vmatpush1.bf16.msra.mxu0 %v5390_v15  ;;  %4449 = vmatpush3.bf16.msra.mxu1 %v5418_v18 }
 0x49c   :  { %1606 = vmatprep.subr.bf16.mxu0 %v5247_v52  ;;  %4454 = vmatprep.subr.bf16.mxu1 %v6666_v33 }
 0x551   :  { %v1422_v54 = vpop.f32.mrb[48].mxu0  ;;  %v1463_v55 = vpop.f32.mrb[32].mxu1 }
 0x552   :  { %v1423_v57 = vadd.f32 %v1422_v54, %v5597_v56  ;;  %v1424_v58 = vpop.f32.mrb[49].mxu0  ;;  %v4432_v60 = vpop.f32.mrb[33].mxu1  ;;  %v1464_v19 = vadd.f32 %v1463_v55, %v5609_v8 }
 0x553   :  { %v1425_v61 = vadd.f32 %v1424_v58, %v5600_v51  ;;  %v1426_v0 = vpop.f32.mrb[50].mxu0  ;;  %v1466_v46 = vpop.f32.mrb[34].mxu1 }
 0x554   :  { %v1469_v21 = vadd.f32 %v1423_v57, %v5508_v50  ;;  %v1427_v27 = vpop.f32.mrb[51].mxu0  ;;  %v4433_v47 = vpop.f32.mrb[35].mxu1  ;;  %v6668_v57 = vld [vmem:[#allocation8_spill] sm:$0xff] }
 0x555   :  { %v1476_v38 = vadd.f32 %v1425_v61, %v5511_v53  ;;  %v5011_v27 = vld [vmem:[%s6621_s3 + $0x8] ss:$12 sps:$4 sm:$0xff]   ;;  %v5012_v47 = vld [vmem:[%s6621_s3 + $0x20] ss:$12 sps:$4 sm:$0xff]  }
 0x556   :  { %v3931_v23 = vmul.f32 -1.442695, %v1469_v21 }
 0x557   :  { %v3932_v52 = vmul.f32 -1.442695, %v1476_v38  ;;  %v5013_v38 = vld [vmem:[%s6621_s3 + $0x38] ss:$12 sps:$4 sm:$0xff]  }
 0x558   :  { %4893 = vpow2.f32 %v3931_v23  ;;  %v5014_v23 = vld [vmem:[%s6621_s3 + $0x50] ss:$12 sps:$4 sm:$0xff]  }
 0x559   :  { %4895 = vpow2.f32 %v3932_v52  ;;  %v5015_v52 = vld [vmem:[%s6621_s3 + $0x64] ss:$12 sps:$4 sm:$0xff]  }
 0x562   :  { %v4894_v41 = vpop.eup %4893 }
 0x563   :  { %v1473_v49 = vadd.f32 1.0, %v4894_v41  ;;  %v4896_v20 = vpop.eup %4895  ;;  %v5016_v41 = vld [vmem:[%s6621_s3 + $0x60] ss:$12 sps:$4 sm:$0xff]  }
 0x564   :  { %v1480_v1 = vadd.f32 1.0, %v4896_v20  ;;  %v5018_v20 = vld [vmem:[%s6621_s3 + $0x7c] ss:$12 sps:$4 sm:$0xff]  }
 0x565   :  { %4897 = vrcp.f32 %v1473_v49  ;;  %v5017_v49 = vld [vmem:[%s6621_s3 + $0x68] ss:$12 sps:$4 sm:$0xff]  }
 0x566   :  { %4899 = vrcp.f32 %v1480_v1  ;;  %v5019_v1 = vld [vmem:[%s6621_s3 + $0x78] ss:$12 sps:$4 sm:$0xff]  }
 0x56f   :  { %v4898_v36 = vpop.eup %4897 }
 0x570   :  { %v1483_v29 = vmul.f32 %v4898_v36, %v1464_v19  ;;  %v4900_v34 = vpop.eup %4899  ;;  %v5020_v19 = vld [vmem:[%s6621_s3 + $0x80] ss:$12 sps:$4 sm:$0xff]  }
 0x571   :  { %v1486_v24 = vsub.f32 1.0, %v4900_v34  ;;  %v1488_v25 = vmul.f32 %v4900_v34, %v5752_v42  ;;  %v5021_v36 = vld [vmem:[%s6621_s3 + $0x94] ss:$12 sps:$4 sm:$0xff]   ;;  %v5024_v34 = vld [vmem:[%s6621_s3 + $0xac] ss:$12 sps:$4 sm:$0xff]  }
 0x572   :  { %v1484_v50 = vadd.f32 %v1483_v29, %v5523_v28  ;;  %v5812_v28 = vld [vmem:[%s6621_s3 + $0x1c] ss:$12 sps:$4 sm:$0xff]  }
 0x573   :  { %v5022_v29 = vld [vmem:[%s6621_s3 + $0x90] ss:$12 sps:$4 sm:$0xff]  }
 0x574   :  { %4901 = vtanh.f32 %v1484_v50  ;;  %v5023_v50 = vld [vmem:[%s6621_s3 + $0x98] ss:$12 sps:$4 sm:$0xff]  }
 0x57e   :  { %v4902_v53 = vpop.eup %4901 }
 0x57f   :  { %v1487_v32 = vmul.f32 %v4902_v53, %v1486_v24  ;;  %v5025_v24 = vld [vmem:[%s6621_s3 + $0xa8] ss:$12 sps:$4 sm:$0xff]   ;;  %v5026_v53 = vld [vmem:[%s6621_s3 + $0xb0] ss:$12 sps:$4 sm:$0xff]  }
 0x581   :  { %v5798_v26 = vadd.f32 %v1488_v25, %v1487_v32 }
 0x583   :  { %v1496_v35 = vpack.c.bf16 %v5798_v26, %v5798_v26 }
 0x585   :  { %1530 = vmatmul.mubr.bf16.vlgmr.msra.gmra.mrb[52].mxu0 %v1496_v35  ;;  %4451 = vmatmul.mubr.bf16.vlgmr.msra.gmra.mrb[36].mxu1 %v1496_v35 }
 0x586   :  { %1607 = vmatpush1.bf16.msra.mxu0 %v5805_v63  ;;  %4455 = vmatpush3.bf16.msra.mxu1 %v5297_v62  ;;  %v5829_v62 = vld [vmem:[%s6621_s3 + $0x34] ss:$12 sps:$4 sm:$0xff]  }
 0x587   :  { %1608 = vmatprep.subr.bf16.mxu0 %v5812_v28  ;;  %4456 = vmatprep.subr.bf16.mxu1 %v6666_v33 }
 0x588   :  { %1638 = vmatprep.mubr.bf16.mxu0 %v6667_v43  ;;  %4470 = vmatprep.mubr.msk.bf16.mxu1 %vm5030_vm0, %v6666_v33 }
 0x58a   :  { %1609 = vmatpush1.bf16.msra.mxu0 %v5822_v48  ;;  %4457 = vmatpush3.bf16.msra.mxu1 %v5320_v4  ;;  %v5843_v4 = vld [vmem:[%s6621_s3 + $0x4c] ss:$12 sps:$4 sm:$0xff]  }
 0x58b   :  { %1610 = vmatprep.subr.bf16.mxu0 %v5829_v62  ;;  %4458 = vmatprep.subr.bf16.mxu1 %v6666_v33 }
 0x58e   :  { %1611 = vmatpush1.bf16.msra.mxu0 %v5836_v40  ;;  %4459 = vmatpush3.bf16.msra.mxu1 %v5339_v7 }
 0x58f   :  { %1612 = vmatprep.subr.bf16.mxu0 %v5843_v4  ;;  %4460 = vmatprep.subr.bf16.mxu1 %v6666_v33 }
 0x592   :  { %1613 = vmatpush1.bf16.msra.mxu0 %v5850_v37  ;;  %4461 = vmatpush3.bf16.msra.mxu1 %v5362_v11 }
 0x593   :  { %1614 = vmatprep.subr.bf16.mxu0 %v5314_v3  ;;  %4462 = vmatprep.subr.bf16.mxu1 %v6666_v33  ;;  %v5010_v3 = vld [vmem:[%s6621_s3 + $0x4] ss:$12 sps:$4 sm:$0xff]  }
 0x596   :  { %1615 = vmatpush1.bf16.msra.mxu0 %v5327_v5  ;;  %4463 = vmatpush3.bf16.msra.mxu1 %v5383_v14 }
 0x597   :  { %1616 = vmatprep.subr.bf16.mxu0 %v5333_v6  ;;  %4464 = vmatprep.subr.bf16.mxu1 %v6666_v33 }
 0x59a   :  { %1617 = vmatpush1.bf16.msra.mxu0 %v5349_v9  ;;  %4465 = vmatpush3.bf16.msra.mxu1 %v5398_v16 }
 0x59b   :  { %1618 = vmatprep.subr.bf16.mxu0 %v5356_v10  ;;  %4466 = vmatprep.subr.bf16.mxu1 %v6666_v33 }
 0x59e   :  { %1619 = vmatpush1.bf16.msra.mxu0 %v5371_v12  ;;  %4467 = vmatpush3.bf16.msra.mxu1 %v5407_v17 }
 0x59f   :  { %1620 = vmatprep.subr.bf16.mxu0 %v5377_v13  ;;  %4468 = vmatprep.subr.bf16.mxu1 %v6666_v33 }
 0x5a2   :  { %1621 = vmatpush1.bf16.msra.mxu0 %v5390_v15  ;;  %4469 = vmatpush3.bf16.msra.mxu1 %v5418_v18 }
 0x5a3   :  { %1715 = vmatprep.subr.bf16.mxu0 %v5010_v3  ;;  %4474 = vmatprep.subr.bf16.mxu1 %v6666_v33 }
 0x658   :  { %v1531_v5 = vpop.f32.mrb[52].mxu0  ;;  %v1572_v6 = vpop.f32.mrb[36].mxu1 }
 0x659   :  { %v1532_v7 = vadd.f32 %v1531_v5, %v5597_v56  ;;  %v1533_v9 = vpop.f32.mrb[53].mxu0  ;;  %v4452_v10 = vpop.f32.mrb[37].mxu1  ;;  %v1573_v39 = vadd.f32 %v1572_v6, %v5609_v8  ;;  %v6670_v5 = vld [vmem:[#allocation10_spill] sm:$0xff] }
 0x65a   :  { %v1534_v11 = vadd.f32 %v1533_v9, %v5600_v51  ;;  %v1535_v12 = vpop.f32.mrb[54].mxu0  ;;  %v1575_v13 = vpop.f32.mrb[38].mxu1 }
 0x65b   :  { %v1578_v14 = vadd.f32 %v1532_v7, %v5514_v2  ;;  %v1536_v15 = vpop.f32.mrb[55].mxu0  ;;  %v4453_v16 = vpop.f32.mrb[39].mxu1 }
 0x65c   :  { %v1585_v17 = vadd.f32 %v1534_v11, %v5520_v22 }
 0x65d   :  { %v3933_v18 = vmul.f32 -1.442695, %v1578_v14 }
 0x65e   :  { %v3934_v30 = vmul.f32 -1.442695, %v1585_v17  ;;  %v6671_v17 = vld [vmem:[#allocation6_spill] sm:$0xff] }
 0x65f   :  { %4903 = vpow2.f32 %v3933_v18 }
 0x660   :  { %4905 = vpow2.f32 %v3934_v30 }
 0x669   :  { %v4904_v44 = vpop.eup %4903 }
 0x66a   :  { %v1582_v59 = vadd.f32 1.0, %v4904_v44  ;;  %v4906_v45 = vpop.eup %4905 }
 0x66b   :  { %v1589_v42 = vadd.f32 1.0, %v4906_v45 }
 0x66c   :  { %4907 = vrcp.f32 %v1582_v59 }
 0x66d   :  { %4909 = vrcp.f32 %v1589_v42 }
 0x676   :  { %v4908_v54 = vpop.eup %4907 }
 0x677   :  { %v1592_v55 = vmul.f32 %v4908_v54, %v1573_v39  ;;  %v4910_v58 = vpop.eup %4909 }
 0x678   :  { %v1595_v60 = vsub.f32 1.0, %v4910_v58  ;;  %v1597_v0 = vmul.f32 %v4910_v58, %v5798_v26  ;;  %v5983_v58 = vld [vmem:[%s6625_s7 + $0x1c] ss:$12 sps:$4 sm:$0xff]  }
 0x679   :  { %v1593_v2 = vadd.f32 %v1592_v55, %v6668_v57  ;;  %v5968_v55 = vld [vmem:[%s6625_s7 + $0x4] ss:$12 sps:$4 sm:$0xff]   ;;  %v5973_v57 = vld [vmem:[%s6625_s7] ss:$12 sps:$4 sm:$0xff]  }
 0x67b   :  { %4911 = vtanh.f32 %v1593_v2  ;;  %v4752_v2 = vld [vmem:[%s6625_s7 + $0x8] ss:$12 sps:$4 sm:$0xff]  }
 0x685   :  { %v4912_v22 = vpop.eup %4911 }
 0x686   :  { %v1596_v61 = vmul.f32 %v4912_v22, %v1595_v60  ;;  %v5988_v60 = vld [vmem:[%s6625_s7 + $0x18] ss:$12 sps:$4 sm:$0xff]   ;;  %v4756_v22 = vld [vmem:[%s6625_s7 + $0x20] ss:$12 sps:$4 sm:$0xff]  }
 0x688   :  { %v5881_v46 = vadd.f32 %v1597_v0, %v1596_v61  ;;  %v5999_v61 = vld [vmem:[%s6625_s7 + $0x34] ss:$12 sps:$4 sm:$0xff]   ;;  %v6004_v0 = vld [vmem:[%s6625_s7 + $0x30] ss:$12 sps:$4 sm:$0xff]  }
 0x68a   :  { %v1605_v21 = vpack.c.bf16 %v5881_v46, %v5881_v46 }
 0x68c   :  { %1639 = vmatmul.mubr.bf16.vlgmr.msra.gmra.mrb[56].mxu0 %v1605_v21  ;;  %4471 = vmatmul.mubr.bf16.vlgmr.msra.gmra.mrb[40].mxu1 %v1605_v21  ;;  %v6015_v21 = vld [vmem:[%s6625_s7 + $0x4c] ss:$12 sps:$4 sm:$0xff]  }
 0x68d   :  { %1716 = vmatpush1.bf16.msra.mxu0 %v5805_v63  ;;  %4475 = vmatpush3.bf16.msra.mxu1 %v5011_v27  ;;  %v6020_v27 = vld [vmem:[%s6625_s7 + $0x48] ss:$12 sps:$4 sm:$0xff]  }
 0x68e   :  { %1717 = vmatprep.subr.bf16.mxu0 %v5812_v28  ;;  %4476 = vmatprep.subr.bf16.mxu1 %v6666_v33 }
 0x68f   :  { %1747 = vmatprep.mubr.bf16.mxu0 %v6667_v43  ;;  %4490 = vmatprep.mubr.msk.bf16.mxu1 %vm5030_vm0, %v6666_v33 }
 0x691   :  { %1718 = vmatpush1.bf16.msra.mxu0 %v5822_v48  ;;  %4477 = vmatpush3.bf16.msra.mxu1 %v5012_v47  ;;  %v4764_v47 = vld [vmem:[%s6625_s7 + $0x50] ss:$12 sps:$4 sm:$0xff]  }
 0x692   :  { %1719 = vmatprep.subr.bf16.mxu0 %v5829_v62  ;;  %4478 = vmatprep.subr.bf16.mxu1 %v6666_v33 }
 0x695   :  { %1720 = vmatpush1.bf16.msra.mxu0 %v5836_v40  ;;  %4479 = vmatpush3.bf16.msra.mxu1 %v5013_v38  ;;  %v6669_v40 = vld [vmem:[#allocation9_spill] sm:$0xff]  ;;  %v6031_v38 = vld [vmem:[%s6625_s7 + $0x64] ss:$12 sps:$4 sm:$0xff]  }
 0x696   :  { %1721 = vmatprep.subr.bf16.mxu0 %v5843_v4  ;;  %4480 = vmatprep.subr.bf16.mxu1 %v6666_v33 }
 0x699   :  { %1722 = vmatpush1.bf16.msra.mxu0 %v5850_v37  ;;  %4481 = vmatpush3.bf16.msra.mxu1 %v5014_v23  ;;  %v6036_v23 = vld [vmem:[%s6625_s7 + $0x60] ss:$12 sps:$4 sm:$0xff]  }
 0x69a   :  { %1723 = vmatprep.subr.bf16.mxu0 %v5015_v52  ;;  %4482 = vmatprep.subr.bf16.mxu1 %v6666_v33  ;;  %v4768_v52 = vld [vmem:[%s6625_s7 + $0x68] ss:$12 sps:$4 sm:$0xff]  }
 0x69d   :  { %1724 = vmatpush1.bf16.msra.mxu0 %v5016_v41  ;;  %4483 = vmatpush3.bf16.msra.mxu1 %v5017_v49  ;;  %v6046_v41 = vld [vmem:[%s6625_s7 + $0x7c] ss:$12 sps:$4 sm:$0xff]   ;;  %v6052_v49 = vld [vmem:[%s6625_s7 + $0x78] ss:$12 sps:$4 sm:$0xff]  }
 0x69e   :  { %1725 = vmatprep.subr.bf16.mxu0 %v5018_v20  ;;  %4484 = vmatprep.subr.bf16.mxu1 %v6666_v33  ;;  %v4772_v20 = vld [vmem:[%s6625_s7 + $0x80] ss:$12 sps:$4 sm:$0xff]  }
 0x6a1   :  { %1726 = vmatpush1.bf16.msra.mxu0 %v5019_v1  ;;  %4485 = vmatpush3.bf16.msra.mxu1 %v5020_v19  ;;  %v6061_v1 = vld [vmem:[%s6625_s7 + $0x94] ss:$12 sps:$4 sm:$0xff]   ;;  %v6067_v19 = vld [vmem:[%s6625_s7 + $0x90] ss:$12 sps:$4 sm:$0xff]  }
 0x6a2   :  { %1727 = vmatprep.subr.bf16.mxu0 %v5021_v36  ;;  %4486 = vmatprep.subr.bf16.mxu1 %v6666_v33  ;;  %v4776_v36 = vld [vmem:[%s6625_s7 + $0x98] ss:$12 sps:$4 sm:$0xff]  }
 0x6a5   :  { %1728 = vmatpush1.bf16.msra.mxu0 %v5022_v29  ;;  %4487 = vmatpush3.bf16.msra.mxu1 %v5023_v50  ;;  %v6075_v29 = vld [vmem:[%s6625_s7 + $0xac] ss:$12 sps:$4 sm:$0xff]   ;;  %v6083_v50 = vld [vmem:[%s6625_s7 + $0xa8] ss:$12 sps:$4 sm:$0xff]  }
 0x6a6   :  { %1729 = vmatprep.subr.bf16.mxu0 %v5024_v34  ;;  %4488 = vmatprep.subr.bf16.mxu1 %v6666_v33  ;;  %v4780_v34 = vld [vmem:[%s6625_s7 + $0xb0] ss:$12 sps:$4 sm:$0xff]  }
 0x6a9   :  { %1730 = vmatpush1.bf16.msra.mxu0 %v5025_v24  ;;  %4489 = vmatpush3.bf16.msra.mxu1 %v5026_v53 }
 0x6aa   :  { %4494 = vmatprep.subr.bf16.mxu1 %v6666_v33  ;;  %2000 = vmatprep.subr.bf16.mxu0 %v5968_v55 }
 0x75f   :  { %v1640_v32 = vpop.f32.mrb[56].mxu0  ;;  %v1681_v25 = vpop.f32.mrb[40].mxu1 }
 0x760   :  { %v1641_v26 = vadd.f32 %v1640_v32, %v5597_v56  ;;  %v1642_v35 = vpop.f32.mrb[57].mxu0  ;;  %v4472_v63 = vpop.f32.mrb[41].mxu1  ;;  %v1682_v14 = vadd.f32 %v1681_v25, %v5609_v8 }
 0x761   :  { %v1643_v28 = vadd.f32 %v1642_v35, %v5600_v51  ;;  %v1644_v48 = vpop.f32.mrb[58].mxu0  ;;  %v1684_v62 = vpop.f32.mrb[42].mxu1 }
 0x762   :  { %v1687_v4 = vadd.f32 %v1641_v26, %v6669_v40  ;;  %v1645_v37 = vpop.f32.mrb[59].mxu0  ;;  %v4473_v3 = vpop.f32.mrb[43].mxu1  ;;  %v6672_v48 = vld [vmem:[#allocation11_spill] sm:$0xff] }
 0x763   :  { %v1694_v6 = vadd.f32 %v1643_v28, %v6670_v5  ;;  %v6673_v37 = vld [vmem:[#allocation12_spill] sm:$0xff] }
 0x764   :  { %v3935_v7 = vmul.f32 -1.442695, %v1687_v4 }
 0x765   :  { %v3936_v9 = vmul.f32 -1.442695, %v1694_v6 }
 0x766   :  { %4913 = vpow2.f32 %v3935_v7 }
 0x767   :  { %4915 = vpow2.f32 %v3936_v9 }
 0x770   :  { %v4914_v10 = vpop.eup %4913 }
 0x771   :  { %v1691_v11 = vadd.f32 1.0, %v4914_v10  ;;  %v4916_v12 = vpop.eup %4915 }
 0x772   :  { %v1698_v13 = vadd.f32 1.0, %v4916_v12 }
 0x773   :  { %4917 = vrcp.f32 %v1691_v11 }
 0x774   :  { %4919 = vrcp.f32 %v1698_v13  ;;  %v6674_v13 = vld [vmem:[#allocation7_spill] sm:$0xff] }
 0x77d   :  { %v4918_v15 = vpop.eup %4917 }
 0x77e   :  { %v1701_v16 = vmul.f32 %v4918_v15, %v1682_v14  ;;  %v4920_v30 = vpop.eup %4919 }
 0x77f   :  { %v1704_v44 = vsub.f32 1.0, %v4920_v30  ;;  %v1706_v42 = vmul.f32 %v4920_v30, %v5881_v46  ;;  %v4760_v46 = vld [vmem:[%s6625_s7 + $0x38] ss:$12 sps:$4 sm:$0xff]  }
 0x780   :  { %v1702_v18 = vadd.f32 %v1701_v16, %v6671_v17 }
 0x782   :  { %4921 = vtanh.f32 %v1702_v18 }
 0x78c   :  { %v4922_v59 = vpop.eup %4921 }
 0x78d   :  { %v1705_v45 = vmul.f32 %v4922_v59, %v1704_v44 }
 0x78f   :  { %v5958_v39 = vadd.f32 %v1706_v42, %v1705_v45  ;;  %v4782_v45 = vld [vmem:[%s6625_s7 + $0x20] ss:$12 sps:$4 sm:$0xff]   ;;  %v4783_v42 = vld [vmem:[%s6625_s7 + $0x38] ss:$12 sps:$4 sm:$0xff]  }
 0x791   :  { %v1714_v54 = vpack.c.bf16 %v5958_v39, %v5958_v39 }
 0x793   :  { %1748 = vmatmul.mubr.bf16.vlgmr.msra.gmra.mrb[60].mxu0 %v1714_v54  ;;  %4491 = vmatmul.mubr.bf16.vlgmr.msra.gmra.mrb[44].mxu1 %v1714_v54  ;;  %v4785_v54 = vld [vmem:[%s6625_s7 + $0x68] ss:$12 sps:$4 sm:$0xff]  }
 0x794   :  { %2032 = vmatprep.mubr.bf16.mxu0 %v6667_v43  ;;  %4510 = vmatprep.mubr.msk.bf16.mxu1 %vm5030_vm0, %v6666_v33 }
 0x795   :  { %2001 = vmatpush1.bf16.msra.mxu0 %v5973_v57  ;;  %4495 = vmatpush3.bf16.msra.mxu1 %v4752_v2  ;;  %v4786_v2 = vld [vmem:[%s6625_s7 + $0x80] ss:$12 sps:$4 sm:$0xff]  }
 0x796   :  { %4496 = vmatprep.subr.bf16.mxu1 %v6666_v33  ;;  %2002 = vmatprep.subr.bf16.mxu0 %v5983_v58 }
 0x799   :  { %2003 = vmatpush1.bf16.msra.mxu0 %v5988_v60  ;;  %4497 = vmatpush3.bf16.msra.mxu1 %v4756_v22  ;;  %v4787_v22 = vld [vmem:[%s6625_s7 + $0x98] ss:$12 sps:$4 sm:$0xff]  }
 0x79a   :  { %4498 = vmatprep.subr.bf16.mxu1 %v6666_v33  ;;  %2004 = vmatprep.subr.bf16.mxu0 %v5999_v61 }
 0x79d   :  { %2005 = vmatpush1.bf16.msra.mxu0 %v6004_v0  ;;  %4499 = vmatpush3.bf16.msra.mxu1 %v4760_v46  ;;  %v4788_v46 = vld [vmem:[%s6625_s7 + $0xb0] ss:$12 sps:$4 sm:$0xff]  }
 0x79e   :  { %4500 = vmatprep.subr.bf16.mxu1 %v6666_v33  ;;  %2006 = vmatprep.subr.bf16.mxu0 %v6015_v21 }
 0x7a1   :  { %2007 = vmatpush1.bf16.msra.mxu0 %v6020_v27  ;;  %4501 = vmatpush3.bf16.msra.mxu1 %v4764_v47  ;;  %v1855_v47 = vld [vmem:[%s6626_s9] sm:$0x7] }
 0x7a2   :  { %4502 = vmatprep.subr.bf16.mxu1 %v6666_v33  ;;  %2008 = vmatprep.subr.bf16.mxu0 %v6031_v38 }
 0x7a5   :  { %2009 = vmatpush1.bf16.msra.mxu0 %v6036_v23  ;;  %4503 = vmatpush3.bf16.msra.mxu1 %v4768_v52  ;;  %v5027_v52 = vld [vmem:[%s6623_s8] sm:$0x7] }
 0x7a6   :  { %2010 = vmatprep.subr.bf16.mxu0 %v6046_v41  ;;  %4504 = vmatprep.subr.bf16.mxu1 %v6666_v33 }
 0x7a9   :  { %2011 = vmatpush1.bf16.msra.mxu0 %v6052_v49  ;;  %4505 = vmatpush3.bf16.msra.mxu1 %v4772_v20  ;;  %v6675_v20 = vld [vmem:[#allocation4_spill] sm:$0xff] }
 0x7aa   :  { %2012 = vmatprep.subr.bf16.mxu0 %v6061_v1  ;;  %4506 = vmatprep.subr.bf16.mxu1 %v6666_v33 }
 0x7ad   :  { %2013 = vmatpush1.bf16.msra.mxu0 %v6067_v19  ;;  %4507 = vmatpush3.bf16.msra.mxu1 %v4776_v36  ;;  %v6163_v36 = vrot.slane %v5027_v52, %v6675_v20 }
 0x7ae   :  { %2014 = vmatprep.subr.bf16.mxu0 %v6075_v29  ;;  %4508 = vmatprep.subr.bf16.mxu1 %v6666_v33 }
 0x7b1   :  { %2015 = vmatpush1.bf16.msra.mxu0 %v6083_v50  ;;  %4509 = vmatpush3.bf16.msra.mxu1 %v4780_v34  ;;  %v1860_v34 = vrot.slane %v1855_v47, %v6675_v20 }
 0x7b2   :  { %2286 = vmatprep.subr.bf16.mxu0 %v5968_v55  ;;  %4514 = vmatprep.subr.bf16.mxu1 %v6666_v33 }
 0x866   :  { %v1749_v24 = vpop.f32.mrb[60].mxu0  ;;  %v1790_v53 = vpop.f32.mrb[44].mxu1 }
 0x867   :  { %v1750_v32 = vadd.f32 %v1749_v24, %v5597_v56  ;;  %v1751_v25 = vpop.f32.mrb[61].mxu0  ;;  %v4492_v26 = vpop.f32.mrb[45].mxu1  ;;  %v1791_v11 = vadd.f32 %v1790_v53, %v5609_v8  ;;  %v4781_v8 = vld [vmem:[%s6625_s7 + $0x8] ss:$12 sps:$4 sm:$0xff]  }
 0x868   :  { %v1752_v35 = vadd.f32 %v1751_v25, %v5600_v51  ;;  %v1753_v63 = vpop.f32.mrb[62].mxu0  ;;  %v1793_v28 = vpop.f32.mrb[46].mxu1  ;;  %v6676_v24 = vld [vmem:[#allocation5_spill] sm:$0xff] }
 0x869   :  { %v1796_v62 = vadd.f32 %v1750_v32, %v6672_v48  ;;  %v1754_v40 = vpop.f32.mrb[63].mxu0  ;;  %v4493_v4 = vpop.f32.mrb[47].mxu1  ;;  %v6167_v53 = vrot.slane %v5027_v52, %v6676_v24  ;;  %v1864_v32 = vrot.slane %v1855_v47, %v6676_v24  ;;  %v4790_v52 = vld [vmem:[%s6625_s7 + $0x20] ss:$12 sps:$4 sm:$0xff]  }
 0x86a   :  { %v1803_v3 = vadd.f32 %v1752_v35, %v6673_v37  ;;  %v6677_v35 = vld [vmem:[#allocation13_spill] sm:$0xff]  ;;  %v6678_v40 = vld [vmem:[#allocation14_spill] sm:$0xff] }
 0x86b   :  { %v3937_v5 = vmul.f32 -1.442695, %v1796_v62  ;;  %v648_v63 = vadd.f32 %v6677_v35, %v6163_v36  ;;  %v650_v4 = vadd.f32 %v6678_v40, %v6167_v53  ;;  %v4795_v35 = vld [vmem:[%s6625_s7 + $0x98] ss:$12 sps:$4 sm:$0xff]  }
 0x86c   :  { %v3938_v6 = vmul.f32 -1.442695, %v1803_v3 }
 0x86d   :  { %4923 = vpow2.f32 %v3937_v5 }
 0x86e   :  { %4925 = vpow2.f32 %v3938_v6 }
 0x877   :  { %v4924_v7 = vpop.eup %4923 }
 0x878   :  { %v1800_v9 = vadd.f32 1.0, %v4924_v7  ;;  %v4926_v56 = vpop.eup %4925 }
 0x879   :  { %v1807_v10 = vadd.f32 1.0, %v4926_v56 }
 0x87a   :  { %4927 = vrcp.f32 %v1800_v9 }
 0x87b   :  { %4929 = vrcp.f32 %v1807_v10 }
 0x884   :  { %v4928_v51 = vpop.eup %4927 }
 0x885   :  { %v1810_v12 = vmul.f32 %v4928_v51, %v1791_v11  ;;  %v4930_v15 = vpop.eup %4929 }
 0x886   :  { %v1813_v16 = vsub.f32 1.0, %v4930_v15  ;;  %v1815_v30 = vmul.f32 %v4930_v15, %v5958_v39  ;;  %v4784_v39 = vld [vmem:[%s6625_s7 + $0x50] ss:$12 sps:$4 sm:$0xff]  }
 0x887   :  { %v1811_v14 = vadd.f32 %v1810_v12, %v6674_v13 }
 0x889   :  { %4931 = vtanh.f32 %v1811_v14  ;;  %v1868_v14 = vrot.slane %v1855_v47, %v5476_v31 }
 0x893   :  { %v4932_v17 = vpop.eup %4931 }
 0x894   :  { %v1814_v18 = vmul.f32 %v4932_v17, %v1813_v16 }
 0x896   :  { %v6101_v44 = vadd.f32 %v1815_v30, %v1814_v18  ;;  %v6679_v18 = vld [vmem:[#allocation17_spill] sm:$0xff]  ;;  %v6680_v30 = vld [vmem:[#allocation23_spill] sm:$0xff] }
 0x898   :  { %v1822_v59 = vpack.c.bf16 %v6101_v44, %v6101_v44 }
 0x89a   :  { %2033 = vmatmul.mubr.bf16.vlgmr.msra.gmra.mrb[64].mxu0 %v1822_v59  ;;  %4511 = vmatmul.mubr.bf16.vlgmr.msra.gmra.mrb[48].mxu1 %v1822_v59  ;;  %v719_v59 = vadd.f32 %v6680_v30, %v6679_v18 }
 0x89b   :  { %2287 = vmatpush1.bf16.msra.mxu0 %v5973_v57  ;;  %2318 = vmatprep.mubr.bf16.mxu0 %v6667_v43 }
 0x89c   :  { %2288 = vmatprep.subr.bf16.mxu0 %v5983_v58  ;;  %4530 = vmatprep.mubr.msk.bf16.mxu1 %vm5030_vm0, %v6666_v33 }
 0x89d   :  { %4515 = vmatpush3.bf16.msra.mxu1 %v4781_v8 }
 0x89e   :  { %4516 = vmatprep.subr.bf16.mxu1 %v6666_v33 }
 0x89f   :  { %2289 = vmatpush1.bf16.msra.mxu0 %v5988_v60 }
 0x8a0   :  { %2290 = vmatprep.subr.bf16.mxu0 %v5999_v61 }
 0x8a1   :  { %4517 = vmatpush3.bf16.msra.mxu1 %v4782_v45 }
 0x8a2   :  { %4518 = vmatprep.subr.bf16.mxu1 %v6666_v33 }
 0x8a3   :  { %2291 = vmatpush1.bf16.msra.mxu0 %v6004_v0 }
 0x8a4   :  { %2292 = vmatprep.subr.bf16.mxu0 %v6015_v21 }
 0x8a5   :  { %4519 = vmatpush3.bf16.msra.mxu1 %v4783_v42 }
 0x8a6   :  { %4520 = vmatprep.subr.bf16.mxu1 %v6666_v33 }
 0x8a7   :  { %2293 = vmatpush1.bf16.msra.mxu0 %v6020_v27 }
 0x8a8   :  { %2294 = vmatprep.subr.bf16.mxu0 %v6031_v38 }
 0x8a9   :  { %4521 = vmatpush3.bf16.msra.mxu1 %v4784_v39 }
 0x8aa   :  { %4522 = vmatprep.subr.bf16.mxu1 %v6666_v33 }
 0x8ab   :  { %2295 = vmatpush1.bf16.msra.mxu0 %v6036_v23 }
 0x8ac   :  { %2296 = vmatprep.subr.bf16.mxu0 %v6046_v41 }
 0x8ad   :  { %4523 = vmatpush3.bf16.msra.mxu1 %v4785_v54 }
 0x8ae   :  { %4524 = vmatprep.subr.bf16.mxu1 %v6666_v33 }
 0x8af   :  { %2297 = vmatpush1.bf16.msra.mxu0 %v6052_v49 }
 0x8b0   :  { %2298 = vmatprep.subr.bf16.mxu0 %v6061_v1 }
 0x8b1   :  { %4525 = vmatpush3.bf16.msra.mxu1 %v4786_v2 }
 0x8b2   :  { %4526 = vmatprep.subr.bf16.mxu1 %v6666_v33 }
 0x8b3   :  { %2299 = vmatpush1.bf16.msra.mxu0 %v6067_v19 }
 0x8b4   :  { %2300 = vmatprep.subr.bf16.mxu0 %v6075_v29 }
 0x8b5   :  { %4527 = vmatpush3.bf16.msra.mxu1 %v4787_v22 }
 0x8b6   :  { %4528 = vmatprep.subr.bf16.mxu1 %v6666_v33 }
 0x8b7   :  { %2301 = vmatpush1.bf16.msra.mxu0 %v6083_v50 }
 0x8b8   :  { %2573 = vmatprep.subr.bf16.mxu0 %v5968_v55 }
 0x8b9   :  { %4529 = vmatpush3.bf16.msra.mxu1 %v4788_v46 }
 0x8ba   :  { %4534 = vmatprep.subr.bf16.mxu1 %v6666_v33 }
 0x96d   :  { %v2034_v25 = vpop.f32.mrb[64].mxu0  ;;  %v2075_v26 = vpop.f32.mrb[48].mxu1 }
 0x96e   :  { %v2035_v28 = vadd.f32 %v2034_v25, %v1860_v34  ;;  %v2036_v48 = vpop.f32.mrb[65].mxu0  ;;  %v4512_v62 = vpop.f32.mrb[49].mxu1  ;;  %v2076_v16 = vadd.f32 %v2075_v26, %v1868_v14  ;;  %v4791_v34 = vld [vmem:[%s6625_s7 + $0x38] ss:$12 sps:$4 sm:$0xff]   ;;  %v4793_v25 = vld [vmem:[%s6625_s7 + $0x68] ss:$12 sps:$4 sm:$0xff]  }
 0x96f   :  { %v2037_v37 = vadd.f32 %v2036_v48, %v1864_v32  ;;  %v2038_v3 = vpop.f32.mrb[66].mxu0  ;;  %v2078_v5 = vpop.f32.mrb[50].mxu1  ;;  %v4792_v32 = vld [vmem:[%s6625_s7 + $0x50] ss:$12 sps:$4 sm:$0xff]   ;;  %v4794_v26 = vld [vmem:[%s6625_s7 + $0x80] ss:$12 sps:$4 sm:$0xff]  }
 0x970   :  { %v2081_v6 = vadd.f32 %v2035_v28, %v648_v63  ;;  %v2039_v7 = vpop.f32.mrb[67].mxu0  ;;  %v4513_v9 = vpop.f32.mrb[51].mxu1  ;;  %v4796_v63 = vld [vmem:[%s6625_s7 + $0xb0] ss:$12 sps:$4 sm:$0xff]   ;;  %v2141_v28 = vld [vmem:[%s6626_s9] sm:$0x7] }
 0x971   :  { %v2088_v56 = vadd.f32 %v2037_v37, %v650_v4  ;;  %v2146_v48 = vrot.slane %v2141_v28, %v6675_v20  ;;  %v2150_v62 = vrot.slane %v2141_v28, %v6676_v24  ;;  %v6681_v37 = vld [vmem:[#allocation15_spill] sm:$0xff]  ;;  %v6682_v9 = vld [vmem:[#allocation16_spill] sm:$0xff] }
 0x972   :  { %v3963_v10 = vmul.f32 -1.442695, %v2081_v6  ;;  %v652_v3 = vadd.f32 %v6681_v37, %v6163_v36 }
 0x973   :  { %v3964_v11 = vmul.f32 -1.442695, %v2088_v56  ;;  %v654_v56 = vadd.f32 %v6682_v9, %v6167_v53 }
 0x974   :  { %4933 = vpow2.f32 %v3963_v10 }
 0x975   :  { %4935 = vpow2.f32 %v3964_v11 }
 0x97e   :  { %v4934_v51 = vpop.eup %4933 }
 0x97f   :  { %v2085_v12 = vadd.f32 1.0, %v4934_v51  ;;  %v4936_v13 = vpop.eup %4935 }
 0x980   :  { %v2092_v15 = vadd.f32 1.0, %v4936_v13 }
 0x981   :  { %4937 = vrcp.f32 %v2085_v12 }
 0x982   :  { %4939 = vrcp.f32 %v2092_v15 }
 0x98b   :  { %v4938_v17 = vpop.eup %4937 }
 0x98c   :  { %v2095_v8 = vmul.f32 %v4938_v17, %v2076_v16  ;;  %v4940_v42 = vpop.eup %4939 }
 0x98d   :  { %v2098_v39 = vsub.f32 1.0, %v4940_v42  ;;  %v2100_v22 = vmul.f32 %v4940_v42, %v6101_v44  ;;  %v4789_v44 = vld [vmem:[%s6625_s7 + $0x8] ss:$12 sps:$4 sm:$0xff]  }
 0x98e   :  { %v2096_v45 = vadd.f32 %v2095_v8, %v719_v59  ;;  %v2154_v8 = vrot.slane %v2141_v28, %v5476_v31  ;;  %v4801_v28 = vld [vmem:[%s6625_s7 + $0x68] ss:$12 sps:$4 sm:$0xff]  }
 0x990   :  { %4941 = vtanh.f32 %v2096_v45 }
 0x99a   :  { %v4942_v54 = vpop.eup %4941 }
 0x99b   :  { %v2099_v2 = vmul.f32 %v4942_v54, %v2098_v39 }
 0x99d   :  { %v6178_v46 = vadd.f32 %v2100_v22, %v2099_v2  ;;  %v6683_v2 = vld [vmem:[#allocation25_spill] sm:$0xff] }
 0x99f   :  { %v2102_v47 = vpack.c.bf16 %v6178_v46, %v6178_v46 }
 0x9a1   :  { %2103 = vst [vmem:[%s6627_s10] sm:$0xf] %v2102_v47  ;;  %2319 = vmatmul.mubr.bf16.vlgmr.msra.gmra.mrb[68].mxu0 %v2102_v47  ;;  %4531 = vmatmul.mubr.bf16.vlgmr.msra.gmra.mrb[52].mxu1 %v2102_v47 }
 0x9a2   :  { %2574 = vmatpush1.bf16.msra.mxu0 %v5973_v57  ;;  %2605 = vmatprep.mubr.bf16.mxu0 %v6667_v43 }
 0x9a3   :  { %2575 = vmatprep.subr.bf16.mxu0 %v5983_v58  ;;  %4550 = vmatprep.mubr.msk.bf16.mxu1 %vm5030_vm0, %v6666_v33 }
 0x9a4   :  { %4535 = vmatpush3.bf16.msra.mxu1 %v4789_v44 }
 0x9a5   :  { %4536 = vmatprep.subr.bf16.mxu1 %v6666_v33 }
 0x9a6   :  { %2576 = vmatpush1.bf16.msra.mxu0 %v5988_v60 }
 0x9a7   :  { %2577 = vmatprep.subr.bf16.mxu0 %v5999_v61 }
 0x9a8   :  { %4537 = vmatpush3.bf16.msra.mxu1 %v4790_v52 }
 0x9a9   :  { %4538 = vmatprep.subr.bf16.mxu1 %v6666_v33 }
 0x9aa   :  { %2578 = vmatpush1.bf16.msra.mxu0 %v6004_v0 }
 0x9ab   :  { %2579 = vmatprep.subr.bf16.mxu0 %v6015_v21 }
 0x9ac   :  { %4539 = vmatpush3.bf16.msra.mxu1 %v4791_v34 }
 0x9ad   :  { %4540 = vmatprep.subr.bf16.mxu1 %v6666_v33 }
 0x9ae   :  { %2580 = vmatpush1.bf16.msra.mxu0 %v6020_v27 }
 0x9af   :  { %2581 = vmatprep.subr.bf16.mxu0 %v6031_v38 }
 0x9b0   :  { %4541 = vmatpush3.bf16.msra.mxu1 %v4792_v32 }
 0x9b1   :  { %4542 = vmatprep.subr.bf16.mxu1 %v6666_v33 }
 0x9b2   :  { %2582 = vmatpush1.bf16.msra.mxu0 %v6036_v23 }
 0x9b3   :  { %2583 = vmatprep.subr.bf16.mxu0 %v6046_v41 }
 0x9b4   :  { %4543 = vmatpush3.bf16.msra.mxu1 %v4793_v25 }
 0x9b5   :  { %4544 = vmatprep.subr.bf16.mxu1 %v6666_v33 }
 0x9b6   :  { %2584 = vmatpush1.bf16.msra.mxu0 %v6052_v49 }
 0x9b7   :  { %2585 = vmatprep.subr.bf16.mxu0 %v6061_v1 }
 0x9b8   :  { %4545 = vmatpush3.bf16.msra.mxu1 %v4794_v26 }
 0x9b9   :  { %4546 = vmatprep.subr.bf16.mxu1 %v6666_v33 }
 0x9ba   :  { %2586 = vmatpush1.bf16.msra.mxu0 %v6067_v19 }
 0x9bb   :  { %2587 = vmatprep.subr.bf16.mxu0 %v6075_v29 }
 0x9bc   :  { %4547 = vmatpush3.bf16.msra.mxu1 %v4795_v35  ;;  %v4798_v35 = vld [vmem:[%s6625_s7 + $0x20] ss:$12 sps:$4 sm:$0xff]  }
 0x9bd   :  { %4548 = vmatprep.subr.bf16.mxu1 %v6666_v33 }
 0x9be   :  { %2588 = vmatpush1.bf16.msra.mxu0 %v6083_v50 }
 0x9bf   :  { %2860 = vmatprep.subr.bf16.mxu0 %v5968_v55 }
 0x9c0   :  { %4549 = vmatpush3.bf16.msra.mxu1 %v4796_v63  ;;  %v4799_v63 = vld [vmem:[%s6625_s7 + $0x38] ss:$12 sps:$4 sm:$0xff]  }
 0x9c1   :  { %4554 = vmatprep.subr.bf16.mxu1 %v6666_v33 }
 0xa74   :  { %v2320_v40 = vpop.f32.mrb[68].mxu0  ;;  %v2361_v4 = vpop.f32.mrb[52].mxu1 }
 0xa75   :  { %v2321_v5 = vadd.f32 %v2320_v40, %v2146_v48  ;;  %v2322_v6 = vpop.f32.mrb[69].mxu0  ;;  %v4532_v7 = vpop.f32.mrb[53].mxu1  ;;  %v2362_v42 = vadd.f32 %v2361_v4, %v2154_v8  ;;  %v4802_v48 = vld [vmem:[%s6625_s7 + $0x80] ss:$12 sps:$4 sm:$0xff]   ;;  %v4804_v40 = vld [vmem:[%s6625_s7 + $0xb0] ss:$12 sps:$4 sm:$0xff]  }
 0xa76   :  { %v2323_v10 = vadd.f32 %v2322_v6, %v2150_v62  ;;  %v2324_v11 = vpop.f32.mrb[70].mxu0  ;;  %v2364_v51 = vpop.f32.mrb[54].mxu1  ;;  %v4803_v62 = vld [vmem:[%s6625_s7 + $0x98] ss:$12 sps:$4 sm:$0xff]   ;;  %v2428_v4 = vld [vmem:[%s6626_s9] sm:$0x7] }
 0xa77   :  { %v2367_v12 = vadd.f32 %v2321_v5, %v652_v3  ;;  %v2325_v13 = vpop.f32.mrb[71].mxu0  ;;  %v4533_v14 = vpop.f32.mrb[55].mxu1  ;;  %v2433_v37 = vrot.slane %v2428_v4, %v6675_v20  ;;  %v2437_v3 = vrot.slane %v2428_v4, %v6676_v24  ;;  %v6684_v7 = vld [vmem:[#allocation18_spill] sm:$0xff]  ;;  %v6685_v51 = vld [vmem:[#allocation19_spill] sm:$0xff] }
 0xa78   :  { %v2374_v15 = vadd.f32 %v2323_v10, %v654_v56  ;;  %v658_v9 = vadd.f32 %v6684_v7, %v6163_v36 }
 0xa79   :  { %v3989_v16 = vmul.f32 -1.442695, %v2367_v12  ;;  %v660_v12 = vadd.f32 %v6685_v51, %v6167_v53 }
 0xa7a   :  { %v3990_v17 = vmul.f32 -1.442695, %v2374_v15 }
 0xa7b   :  { %4943 = vpow2.f32 %v3989_v16 }
 0xa7c   :  { %4945 = vpow2.f32 %v3990_v17 }
 0xa85   :  { %v4944_v18 = vpop.eup %4943 }
 0xa86   :  { %v2371_v30 = vadd.f32 1.0, %v4944_v18  ;;  %v4946_v59 = vpop.eup %4945 }
 0xa87   :  { %v2378_v45 = vadd.f32 1.0, %v4946_v59 }
 0xa88   :  { %4947 = vrcp.f32 %v2371_v30 }
 0xa89   :  { %4949 = vrcp.f32 %v2378_v45 }
 0xa92   :  { %v4948_v39 = vpop.eup %4947 }
 0xa93   :  { %v2381_v54 = vmul.f32 %v4948_v39, %v2362_v42  ;;  %v4950_v47 = vpop.eup %4949 }
 0xa94   :  { %v2384_v44 = vsub.f32 1.0, %v4950_v47  ;;  %v2386_v32 = vmul.f32 %v4950_v47, %v6178_v46  ;;  %v4797_v46 = vld [vmem:[%s6625_s7 + $0x8] ss:$12 sps:$4 sm:$0xff]  }
 0xa95   :  { %v2382_v22 = vadd.f32 %v2381_v54, %v6683_v2  ;;  %v2441_v54 = vrot.slane %v2428_v4, %v5476_v31 }
 0xa97   :  { %4951 = vtanh.f32 %v2382_v22 }
 0xaa1   :  { %v4952_v52 = vpop.eup %4951 }
 0xaa2   :  { %v2385_v34 = vmul.f32 %v4952_v52, %v2384_v44  ;;  %v6686_v52 = vld [vmem:[#allocation22_spill] sm:$0xff] }
 0xaa4   :  { %v6248_v25 = vadd.f32 %v2386_v32, %v2385_v34 }
 0xaa6   :  { %v2388_v26 = vpack.c.bf16 %v6248_v25, %v6248_v25 }
 0xaa8   :  { %3991 = vst [vmem:[%s6627_s10 + $0x4] sm:$0xf] %v2388_v26  ;;  %2606 = vmatmul.mubr.bf16.vlgmr.msra.gmra.mrb[72].mxu0 %v2388_v26  ;;  %4551 = vmatmul.mubr.bf16.vlgmr.msra.gmra.mrb[56].mxu1 %v2388_v26 }
 0xaa9   :  { %2861 = vmatpush1.bf16.msra.mxu0 %v5973_v57  ;;  %2892 = vmatprep.mubr.bf16.mxu0 %v6667_v43 }
 0xaaa   :  { %2862 = vmatprep.subr.bf16.mxu0 %v5983_v58  ;;  %4570 = vmatprep.mubr.msk.bf16.mxu1 %vm5030_vm0, %v6666_v33 }
 0xaab   :  { %4555 = vmatpush3.bf16.msra.mxu1 %v4797_v46 }
 0xaac   :  { %4556 = vmatprep.subr.bf16.mxu1 %v6666_v33 }
 0xaad   :  { %2863 = vmatpush1.bf16.msra.mxu0 %v5988_v60 }
 0xaae   :  { %2864 = vmatprep.subr.bf16.mxu0 %v5999_v61 }
 0xaaf   :  { %4557 = vmatpush3.bf16.msra.mxu1 %v4798_v35 }
 0xab0   :  { %4558 = vmatprep.subr.bf16.mxu1 %v6666_v33 }
 0xab1   :  { %2865 = vmatpush1.bf16.msra.mxu0 %v6004_v0 }
 0xab2   :  { %2866 = vmatprep.subr.bf16.mxu0 %v6015_v21 }
 0xab3   :  { %4559 = vmatpush3.bf16.msra.mxu1 %v4799_v63 }
 0xab4   :  { %4560 = vmatprep.subr.bf16.mxu1 %v6666_v33 }
 0xab5   :  { %2867 = vmatpush1.bf16.msra.mxu0 %v6020_v27 }
 0xab6   :  { %2868 = vmatprep.subr.bf16.mxu0 %v6031_v38 }
 0xab9   :  { %2869 = vmatpush1.bf16.msra.mxu0 %v6036_v23 }
 0xaba   :  { %2870 = vmatprep.subr.bf16.mxu0 %v6046_v41 }
 0xabd   :  { %2871 = vmatpush1.bf16.msra.mxu0 %v6052_v49 }
 0xabe   :  { %2872 = vmatprep.subr.bf16.mxu0 %v6061_v1 }
 0xac1   :  { %2873 = vmatpush1.bf16.msra.mxu0 %v6067_v19 }
 0xac2   :  { %2874 = vmatprep.subr.bf16.mxu0 %v6075_v29 }
 0xac5   :  { %2875 = vmatpush1.bf16.msra.mxu0 %v6083_v50 }
 0xac6   :  { %3147 = vmatprep.subr.bf16.mxu0 %v5968_v55  ;;  %v4800_v55 = vld [vmem:[%s6625_s7 + $0x50] ss:$12 sps:$4 sm:$0xff]  }
 0xac7   :  { %4561 = vmatpush3.bf16.msra.mxu1 %v4800_v55 }
 0xac8   :  { %4562 = vmatprep.subr.bf16.mxu1 %v6666_v33 }
 0xacb   :  { %4563 = vmatpush3.bf16.msra.mxu1 %v4801_v28 }
 0xacc   :  { %4564 = vmatprep.subr.bf16.mxu1 %v6666_v33 }
 0xacf   :  { %4565 = vmatpush3.bf16.msra.mxu1 %v4802_v48 }
 0xad0   :  { %4566 = vmatprep.subr.bf16.mxu1 %v6666_v33 }
 0xad3   :  { %4567 = vmatpush3.bf16.msra.mxu1 %v4803_v62 }
 0xad4   :  { %4568 = vmatprep.subr.bf16.mxu1 %v6666_v33 }
 0xad7   :  { %4569 = vmatpush3.bf16.msra.mxu1 %v4804_v40  ;;  %v6688_v40 = vld [vmem:[#allocation21_spill] sm:$0xff] }
 0xad8   :  { %4574 = vmatprep.subr.bf16.mxu1 %v6666_v33  ;;  %v664_v4 = vadd.f32 %v6688_v40, %v6167_v53  ;;  %v6690_v40 = vld [vmem:[#allocation26_spill] sm:$0xff] }
 0xb7b   :  { %v2607_v5 = vpop.f32.mrb[72].mxu0  ;;  %v2648_v6 = vpop.f32.mrb[56].mxu1 }
 0xb7c   :  { %v2608_v56 = vadd.f32 %v2607_v5, %v2433_v37  ;;  %v2609_v10 = vpop.f32.mrb[73].mxu0  ;;  %v4552_v11 = vpop.f32.mrb[57].mxu1  ;;  %v2649_v22 = vadd.f32 %v2648_v6, %v2441_v54 }
 0xb7d   :  { %v2610_v13 = vadd.f32 %v2609_v10, %v2437_v3  ;;  %v2611_v14 = vpop.f32.mrb[74].mxu0  ;;  %v2651_v15 = vpop.f32.mrb[58].mxu1 }
 0xb7e   :  { %v2654_v16 = vadd.f32 %v2608_v56, %v658_v9  ;;  %v2612_v17 = vpop.f32.mrb[75].mxu0  ;;  %v4553_v18 = vpop.f32.mrb[59].mxu1 }
 0xb7f   :  { %v2661_v30 = vadd.f32 %v2610_v13, %v660_v12 }
 0xb80   :  { %v4016_v59 = vmul.f32 -1.442695, %v2654_v16 }
 0xb81   :  { %v4017_v8 = vmul.f32 -1.442695, %v2661_v30  ;;  %v6689_v30 = vld [vmem:[#allocation24_spill] sm:$0xff] }
 0xb82   :  { %4953 = vpow2.f32 %v4016_v59 }
 0xb83   :  { %4955 = vpow2.f32 %v4017_v8 }
 0xb8c   :  { %v4954_v45 = vpop.eup %4953 }
 0xb8d   :  { %v2658_v42 = vadd.f32 1.0, %v4954_v45  ;;  %v4956_v39 = vpop.eup %4955 }
 0xb8e   :  { %v2665_v2 = vadd.f32 1.0, %v4956_v39 }
 0xb8f   :  { %4957 = vrcp.f32 %v2658_v42 }
 0xb90   :  { %4959 = vrcp.f32 %v2665_v2 }
 0xb99   :  { %v4958_v47 = vpop.eup %4957 }
 0xb9a   :  { %v2668_v44 = vmul.f32 %v4958_v47, %v2649_v22  ;;  %v4960_v32 = vpop.eup %4959  ;;  %v4815_v47 = vld [vmem:[%s6625_s7 + $0x4] ss:$12 sps:$4 sm:$0xff]  }
 0xb9b   :  { %v2671_v26 = vsub.f32 1.0, %v4960_v32  ;;  %v2673_v63 = vmul.f32 %v4960_v32, %v6248_v25  ;;  %v6418_v32 = vld [vmem:[%s6625_s7 + $0x18] ss:$12 sps:$4 sm:$0xff]  }
 0xb9c   :  { %v2669_v34 = vadd.f32 %v2668_v44, %v6686_v52  ;;  %v6403_v44 = vld [vmem:[%s6625_s7] ss:$12 sps:$4 sm:$0xff]   ;;  %v4816_v52 = vld [vmem:[%s6625_s7 + $0x8] ss:$12 sps:$4 sm:$0xff]  }
 0xb9e   :  { %4961 = vtanh.f32 %v2669_v34  ;;  %v6412_v34 = vld [vmem:[%s6625_s7 + $0x1c] ss:$12 sps:$4 sm:$0xff]  }
 0xba8   :  { %v4962_v46 = vpop.eup %4961 }
 0xba9   :  { %v2672_v35 = vmul.f32 %v4962_v46, %v2671_v26  ;;  %v4820_v26 = vld [vmem:[%s6625_s7 + $0x20] ss:$12 sps:$4 sm:$0xff]  }
 0xbaa   :  { %v6428_v46 = vld [vmem:[%s6625_s7 + $0x34] ss:$12 sps:$4 sm:$0xff]  }
 0xbab   :  { %v6318_v55 = vadd.f32 %v2673_v63, %v2672_v35  ;;  %v6434_v35 = vld [vmem:[%s6625_s7 + $0x30] ss:$12 sps:$4 sm:$0xff]   ;;  %v4824_v63 = vld [vmem:[%s6625_s7 + $0x38] ss:$12 sps:$4 sm:$0xff]  }
 0xbad   :  { %v2675_v28 = vpack.c.bf16 %v6318_v55, %v6318_v55 }
 0xbaf   :  { %4018 = vst [vmem:[%s6627_s10 + $0x8] sm:$0xf] %v2675_v28  ;;  %2893 = vmatmul.mubr.bf16.vlgmr.msra.gmra.mrb[76].mxu0 %v2675_v28  ;;  %4571 = vmatmul.mubr.bf16.vlgmr.msra.gmra.mrb[60].mxu1 %v2675_v28  ;;  %v6450_v28 = vld [vmem:[%s6625_s7 + $0x48] ss:$12 sps:$4 sm:$0xff]  }
 0xbb0   :  { %3148 = vmatpush1.bf16.msra.mxu0 %v5973_v57  ;;  %3179 = vmatprep.mubr.bf16.mxu0 %v6667_v43  ;;  %v4805_v57 = vld [vmem:[%s6625_s7 + $0x8] ss:$12 sps:$4 sm:$0xff]  }
 0xbb1   :  { %3149 = vmatprep.subr.bf16.mxu0 %v5983_v58  ;;  %4590 = vmatprep.mubr.msk.bf16.mxu1 %vm5030_vm0, %v6666_v33  ;;  %v4806_v58 = vld [vmem:[%s6625_s7 + $0x20] ss:$12 sps:$4 sm:$0xff]  }
 0xbb2   :  { %4575 = vmatpush3.bf16.msra.mxu1 %v4805_v57  ;;  %v4828_v57 = vld [vmem:[%s6625_s7 + $0x50] ss:$12 sps:$4 sm:$0xff]  }
 0xbb3   :  { %4576 = vmatprep.subr.bf16.mxu1 %v6666_v33 }
 0xbb4   :  { %3150 = vmatpush1.bf16.msra.mxu0 %v5988_v60  ;;  %v4807_v60 = vld [vmem:[%s6625_s7 + $0x38] ss:$12 sps:$4 sm:$0xff]  }
 0xbb5   :  { %3151 = vmatprep.subr.bf16.mxu0 %v5999_v61  ;;  %v4808_v61 = vld [vmem:[%s6625_s7 + $0x50] ss:$12 sps:$4 sm:$0xff]  }
 0xbb6   :  { %4577 = vmatpush3.bf16.msra.mxu1 %v4806_v58  ;;  %v6460_v58 = vld [vmem:[%s6625_s7 + $0x64] ss:$12 sps:$4 sm:$0xff]  }
 0xbb7   :  { %4578 = vmatprep.subr.bf16.mxu1 %v6666_v33 }
 0xbb8   :  { %3152 = vmatpush1.bf16.msra.mxu0 %v6004_v0  ;;  %v4809_v0 = vld [vmem:[%s6625_s7 + $0x68] ss:$12 sps:$4 sm:$0xff]  }
 0xbb9   :  { %3153 = vmatprep.subr.bf16.mxu0 %v6015_v21  ;;  %v4810_v21 = vld [vmem:[%s6625_s7 + $0x80] ss:$12 sps:$4 sm:$0xff]  }
 0xbba   :  { %4579 = vmatpush3.bf16.msra.mxu1 %v4807_v60  ;;  %v6466_v60 = vld [vmem:[%s6625_s7 + $0x60] ss:$12 sps:$4 sm:$0xff]  }
 0xbbb   :  { %4580 = vmatprep.subr.bf16.mxu1 %v6666_v33 }
 0xbbc   :  { %3154 = vmatpush1.bf16.msra.mxu0 %v6020_v27  ;;  %v4811_v27 = vld [vmem:[%s6625_s7 + $0x98] ss:$12 sps:$4 sm:$0xff]  }
 0xbbd   :  { %3155 = vmatprep.subr.bf16.mxu0 %v6031_v38  ;;  %v4812_v38 = vld [vmem:[%s6625_s7 + $0xb0] ss:$12 sps:$4 sm:$0xff]  }
 0xbbe   :  { %4581 = vmatpush3.bf16.msra.mxu1 %v4808_v61  ;;  %v4832_v61 = vld [vmem:[%s6625_s7 + $0x68] ss:$12 sps:$4 sm:$0xff]  }
 0xbbf   :  { %4582 = vmatprep.subr.bf16.mxu1 %v6666_v33 }
 0xbc0   :  { %3156 = vmatpush1.bf16.msra.mxu0 %v6036_v23  ;;  %v2715_v23 = vld [vmem:[%s6626_s9] sm:$0x7] }
 0xbc1   :  { %3157 = vmatprep.subr.bf16.mxu0 %v6046_v41  ;;  %v2720_v41 = vrot.slane %v2715_v23, %v6675_v20  ;;  %v2728_v14 = vrot.slane %v2715_v23, %v5476_v31 }
 0xbc2   :  { %4583 = vmatpush3.bf16.msra.mxu1 %v4809_v0  ;;  %v6475_v0 = vld [vmem:[%s6625_s7 + $0x7c] ss:$12 sps:$4 sm:$0xff]  }
 0xbc3   :  { %4584 = vmatprep.subr.bf16.mxu1 %v6666_v33 }
 0xbc4   :  { %3158 = vmatpush1.bf16.msra.mxu0 %v6052_v49  ;;  %v2724_v49 = vrot.slane %v2715_v23, %v6676_v24  ;;  %v6497_v23 = vld [vmem:[%s6625_s7 + $0x90] ss:$12 sps:$4 sm:$0xff]  }
 0xbc5   :  { %3159 = vmatprep.subr.bf16.mxu0 %v6061_v1 }
 0xbc6   :  { %4585 = vmatpush3.bf16.msra.mxu1 %v4810_v21  ;;  %v6481_v21 = vld [vmem:[%s6625_s7 + $0x78] ss:$12 sps:$4 sm:$0xff]  }
 0xbc7   :  { %4586 = vmatprep.subr.bf16.mxu1 %v6666_v33 }
 0xbc8   :  { %3160 = vmatpush1.bf16.msra.mxu0 %v6067_v19 }
 0xbc9   :  { %3161 = vmatprep.subr.bf16.mxu0 %v6075_v29  ;;  %v6687_v29 = vld [vmem:[#allocation20_spill] sm:$0xff] }
 0xbca   :  { %4587 = vmatpush3.bf16.msra.mxu1 %v4811_v27  ;;  %v4836_v27 = vld [vmem:[%s6625_s7 + $0x80] ss:$12 sps:$4 sm:$0xff]  }
 0xbcb   :  { %4588 = vmatprep.subr.bf16.mxu1 %v6666_v33 }
 0xbcc   :  { %3162 = vmatpush1.bf16.msra.mxu0 %v6083_v50  ;;  %v662_v50 = vadd.f32 %v6687_v29, %v6163_v36  ;;  %v3002_v29 = vld [vmem:[%s6626_s9] sm:$0x7] }
 0xbcd   :  { %3434 = vmatprep.subr.bf16.mxu0 %v4815_v47 }
 0xbce   :  { %4589 = vmatpush3.bf16.msra.mxu1 %v4812_v38  ;;  %v6491_v38 = vld [vmem:[%s6625_s7 + $0x94] ss:$12 sps:$4 sm:$0xff]  }
 0xbcf   :  { %4594 = vmatprep.subr.bf16.mxu1 %v6666_v33 }
 0xc82   :  { %v2894_v1 = vpop.f32.mrb[76].mxu0  ;;  %v2935_v19 = vpop.f32.mrb[60].mxu1 }
 0xc83   :  { %v2895_v25 = vadd.f32 %v2894_v1, %v2720_v41  ;;  %v2896_v48 = vpop.f32.mrb[77].mxu0  ;;  %v4572_v62 = vpop.f32.mrb[61].mxu1  ;;  %v2936_v16 = vadd.f32 %v2935_v19, %v2728_v14  ;;  %v4840_v41 = vld [vmem:[%s6625_s7 + $0x98] ss:$12 sps:$4 sm:$0xff]   ;;  %v6513_v1 = vld [vmem:[%s6625_s7 + $0xa8] ss:$12 sps:$4 sm:$0xff]  }
 0xc84   :  { %v2897_v37 = vadd.f32 %v2896_v48, %v2724_v49  ;;  %v2898_v3 = vpop.f32.mrb[78].mxu0  ;;  %v2938_v5 = vpop.f32.mrb[62].mxu1  ;;  %v6507_v49 = vld [vmem:[%s6625_s7 + $0xac] ss:$12 sps:$4 sm:$0xff]   ;;  %v4844_v19 = vld [vmem:[%s6625_s7 + $0xb0] ss:$12 sps:$4 sm:$0xff]  }
 0xc85   :  { %v2941_v6 = vadd.f32 %v2895_v25, %v662_v50  ;;  %v2899_v7 = vpop.f32.mrb[79].mxu0  ;;  %v4573_v9 = vpop.f32.mrb[63].mxu1  ;;  %v3007_v50 = vrot.slane %v3002_v29, %v6675_v20  ;;  %v3011_v25 = vrot.slane %v3002_v29, %v6676_v24 }
 0xc86   :  { %v2948_v56 = vadd.f32 %v2897_v37, %v664_v4  ;;  %v668_v4 = vadd.f32 %v6690_v40, %v6163_v36 }
 0xc87   :  { %v4043_v10 = vmul.f32 -1.442695, %v2941_v6  ;;  %v6691_v6 = vld [vmem:[#allocation27_spill] sm:$0xff] }
 0xc88   :  { %v4044_v11 = vmul.f32 -1.442695, %v2948_v56  ;;  %v670_v7 = vadd.f32 %v6691_v6, %v6167_v53 }
 0xc89   :  { %4963 = vpow2.f32 %v4043_v10 }
 0xc8a   :  { %4965 = vpow2.f32 %v4044_v11 }
 0xc93   :  { %v4964_v51 = vpop.eup %4963 }
 0xc94   :  { %v2945_v12 = vadd.f32 1.0, %v4964_v51  ;;  %v4966_v13 = vpop.eup %4965 }
 0xc95   :  { %v2952_v15 = vadd.f32 1.0, %v4966_v13 }
 0xc96   :  { %4967 = vrcp.f32 %v2945_v12 }
 0xc97   :  { %4969 = vrcp.f32 %v2952_v15 }
 0xca0   :  { %v4968_v17 = vpop.eup %4967 }
 0xca1   :  { %v2955_v18 = vmul.f32 %v4968_v17, %v2936_v16  ;;  %v4970_v8 = vpop.eup %4969 }
 0xca2   :  { %v2958_v45 = vsub.f32 1.0, %v4970_v8  ;;  %v2960_v54 = vmul.f32 %v4970_v8, %v6318_v55  ;;  %v6444_v55 = vld [vmem:[%s6625_s7 + $0x4c] ss:$12 sps:$4 sm:$0xff]  }
 0xca3   :  { %v2956_v59 = vadd.f32 %v2955_v18, %v6689_v30  ;;  %v3015_v30 = vrot.slane %v3002_v29, %v5476_v31 }
 0xca5   :  { %4971 = vtanh.f32 %v2956_v59 }
 0xcaf   :  { %v4972_v42 = vpop.eup %4971 }
 0xcb0   :  { %v2959_v39 = vmul.f32 %v4972_v42, %v2958_v45 }
 0xcb2   :  { %v6387_v2 = vadd.f32 %v2960_v54, %v2959_v39  ;;  %v6692_v39 = vld [vmem:[#allocation31_spill] sm:$0xff] }
 0xcb4   :  { %v2962_v22 = vpack.c.bf16 %v6387_v2, %v6387_v2 }
 0xcb6   :  { %4045 = vst [vmem:[%s6627_s10 + $0xc] sm:$0xf] %v2962_v22  ;;  %3180 = vmatmul.mubr.bf16.vlgmr.msra.gmra.mrb[80].mxu0 %v2962_v22  ;;  %4591 = vmatmul.mubr.bf16.vlgmr.msra.gmra.mrb[64].mxu1 %v2962_v22 }
 0xcb7   :  { %3466 = vmatprep.mubr.bf16.mxu0 %v6667_v43  ;;  %4610 = vmatprep.mubr.msk.bf16.mxu1 %vm5030_vm0, %v6666_v33 }
 0xcb8   :  { %3435 = vmatpush1.bf16.msra.mxu0 %v6403_v44  ;;  %4595 = vmatpush3.bf16.msra.mxu1 %v4816_v52 }
 0xcb9   :  { %4596 = vmatprep.subr.bf16.mxu1 %v6666_v33  ;;  %3436 = vmatprep.subr.bf16.mxu0 %v6412_v34 }
 0xcbc   :  { %3437 = vmatpush1.bf16.msra.mxu0 %v6418_v32  ;;  %4597 = vmatpush3.bf16.msra.mxu1 %v4820_v26 }
 0xcbd   :  { %4598 = vmatprep.subr.bf16.mxu1 %v6666_v33  ;;  %3438 = vmatprep.subr.bf16.mxu0 %v6428_v46 }
 0xcc0   :  { %3439 = vmatpush1.bf16.msra.mxu0 %v6434_v35  ;;  %4599 = vmatpush3.bf16.msra.mxu1 %v4824_v63 }
 0xcc1   :  { %4600 = vmatprep.subr.bf16.mxu1 %v6666_v33  ;;  %3440 = vmatprep.subr.bf16.mxu0 %v6444_v55 }
 0xcc4   :  { %3441 = vmatpush1.bf16.msra.mxu0 %v6450_v28  ;;  %4601 = vmatpush3.bf16.msra.mxu1 %v4828_v57 }
 0xcc5   :  { %4602 = vmatprep.subr.bf16.mxu1 %v6666_v33  ;;  %3442 = vmatprep.subr.bf16.mxu0 %v6460_v58 }
 0xcc8   :  { %3443 = vmatpush1.bf16.msra.mxu0 %v6466_v60  ;;  %4603 = vmatpush3.bf16.msra.mxu1 %v4832_v61 }
 0xcc9   :  { %3444 = vmatprep.subr.bf16.mxu0 %v6475_v0  ;;  %4604 = vmatprep.subr.bf16.mxu1 %v6666_v33 }
 0xccc   :  { %3445 = vmatpush1.bf16.msra.mxu0 %v6481_v21  ;;  %4605 = vmatpush3.bf16.msra.mxu1 %v4836_v27  ;;  %v6693_v27 = vld [vmem:[#allocation28_spill] sm:$0xff] }
 0xccd   :  { %3446 = vmatprep.subr.bf16.mxu0 %v6491_v38  ;;  %4606 = vmatprep.subr.bf16.mxu1 %v6666_v33 }
 0xcd0   :  { %3447 = vmatpush1.bf16.msra.mxu0 %v6497_v23  ;;  %4607 = vmatpush3.bf16.msra.mxu1 %v4840_v41 }
 0xcd1   :  { %3448 = vmatprep.subr.bf16.mxu0 %v6507_v49  ;;  %4608 = vmatprep.subr.bf16.mxu1 %v6666_v33 }
 0xcd4   :  { %3449 = vmatpush1.bf16.msra.mxu0 %v6513_v1  ;;  %4609 = vmatpush3.bf16.msra.mxu1 %v4844_v19 }
 0xcd5   :  { %3721 = vmatprep.subr.bf16.mxu0 %v4815_v47  ;;  %4614 = vmatprep.subr.bf16.mxu1 %v6666_v33 }
 0xd89   :  { %v3181_v48 = vpop.f32.mrb[80].mxu0  ;;  %v3222_v62 = vpop.f32.mrb[64].mxu1 }
 0xd8a   :  { %v3182_v37 = vadd.f32 %v3181_v48, %v3007_v50  ;;  %v3183_v3 = vpop.f32.mrb[81].mxu0  ;;  %v4592_v5 = vpop.f32.mrb[65].mxu1  ;;  %v3223_v8 = vadd.f32 %v3222_v62, %v3015_v30 }
 0xd8b   :  { %v3184_v9 = vadd.f32 %v3183_v3, %v3011_v25  ;;  %v3185_v56 = vpop.f32.mrb[82].mxu0  ;;  %v3225_v10 = vpop.f32.mrb[66].mxu1 }
 0xd8c   :  { %v3228_v11 = vadd.f32 %v3182_v37, %v668_v4  ;;  %v3186_v51 = vpop.f32.mrb[83].mxu0  ;;  %v4593_v12 = vpop.f32.mrb[67].mxu1 }
 0xd8d   :  { %v3235_v13 = vadd.f32 %v3184_v9, %v670_v7  ;;  %v6695_v51 = vld [vmem:[#allocation32_spill] sm:$0xff] }
 0xd8e   :  { %v4070_v14 = vmul.f32 -1.442695, %v3228_v11 }
 0xd8f   :  { %v4071_v15 = vmul.f32 -1.442695, %v3235_v13 }
 0xd90   :  { %4973 = vpow2.f32 %v4070_v14 }
 0xd91   :  { %4975 = vpow2.f32 %v4071_v15 }
 0xd9a   :  { %v4974_v16 = vpop.eup %4973 }
 0xd9b   :  { %v3232_v17 = vadd.f32 1.0, %v4974_v16  ;;  %v4976_v18 = vpop.eup %4975 }
 0xd9c   :  { %v3239_v59 = vadd.f32 1.0, %v4976_v18 }
 0xd9d   :  { %4977 = vrcp.f32 %v3232_v17 }
 0xd9e   :  { %4979 = vrcp.f32 %v3239_v59  ;;  %v3576_v59 = vld [vmem:[%s6626_s9] sm:$0x7] }
 0xda7   :  { %v4978_v45 = vpop.eup %4977 }
 0xda8   :  { %v3242_v42 = vmul.f32 %v4978_v45, %v3223_v8  ;;  %v4980_v22 = vpop.eup %4979  ;;  %v3581_v8 = vrot.slane %v3576_v59, %v6675_v20  ;;  %v3585_v45 = vrot.slane %v3576_v59, %v6676_v24 }
 0xda9   :  { %v3245_v47 = vsub.f32 1.0, %v4980_v22  ;;  %v3247_v63 = vmul.f32 %v4980_v22, %v6387_v2  ;;  %v4846_v2 = vld [vmem:[%s6625_s7 + $0x20] ss:$12 sps:$4 sm:$0xff]  }
 0xdaa   :  { %v3243_v54 = vadd.f32 %v3242_v42, %v6692_v39  ;;  %v4634_v42 = vadd.f32 %v3581_v8, %v6163_v36  ;;  %v4636_v22 = vadd.f32 %v3585_v45, %v6167_v53 }
 0xdac   :  { %4981 = vtanh.f32 %v3243_v54 }
 0xdb6   :  { %v4982_v52 = vpop.eup %4981 }
 0xdb7   :  { %v3246_v26 = vmul.f32 %v4982_v52, %v3245_v47 }
 0xdb9   :  { %v6534_v57 = vadd.f32 %v3247_v63, %v3246_v26 }
 0xdbb   :  { %v3249_v61 = vpack.c.bf16 %v6534_v57, %v6534_v57 }
 0xdbd   :  { %4072 = vst [vmem:[%s6627_s10 + $0x10] sm:$0xf] %v3249_v61  ;;  %3467 = vmatmul.mubr.bf16.vlgmr.msra.gmra.mrb[84].mxu0 %v3249_v61  ;;  %4611 = vmatmul.mubr.bf16.vlgmr.msra.gmra.mrb[68].mxu1 %v3249_v61 }
 0xdbe   :  { %3722 = vmatpush1.bf16.msra.mxu0 %v6403_v44  ;;  %3753 = vmatprep.mubr.bf16.mxu0 %v6667_v43  ;;  %v4845_v43 = vld [vmem:[%s6625_s7 + $0x8] ss:$12 sps:$4 sm:$0xff]   ;;  %v4847_v44 = vld [vmem:[%s6625_s7 + $0x38] ss:$12 sps:$4 sm:$0xff]  }
 0xdbf   :  { %3723 = vmatprep.subr.bf16.mxu0 %v6412_v34  ;;  %4630 = vmatprep.mubr.msk.bf16.mxu1 %vm5030_vm0, %v6666_v33  ;;  %v4848_v34 = vld [vmem:[%s6625_s7 + $0x50] ss:$12 sps:$4 sm:$0xff]  }
 0xdc0   :  { %4615 = vmatpush3.bf16.msra.mxu1 %v4845_v43 }
 0xdc1   :  { %4616 = vmatprep.subr.bf16.mxu1 %v6666_v33 }
 0xdc2   :  { %3724 = vmatpush1.bf16.msra.mxu0 %v6418_v32  ;;  %v4849_v32 = vld [vmem:[%s6625_s7 + $0x68] ss:$12 sps:$4 sm:$0xff]  }
 0xdc3   :  { %3725 = vmatprep.subr.bf16.mxu0 %v6428_v46  ;;  %v4850_v46 = vld [vmem:[%s6625_s7 + $0x80] ss:$12 sps:$4 sm:$0xff]  }
 0xdc4   :  { %4617 = vmatpush3.bf16.msra.mxu1 %v4846_v2 }
 0xdc5   :  { %4618 = vmatprep.subr.bf16.mxu1 %v6666_v33 }
 0xdc6   :  { %3726 = vmatpush1.bf16.msra.mxu0 %v6434_v35  ;;  %v4851_v35 = vld [vmem:[%s6625_s7 + $0x98] ss:$12 sps:$4 sm:$0xff]  }
 0xdc7   :  { %3727 = vmatprep.subr.bf16.mxu0 %v6444_v55  ;;  %v4852_v55 = vld [vmem:[%s6625_s7 + $0xb0] ss:$12 sps:$4 sm:$0xff]  }
 0xdc8   :  { %4619 = vmatpush3.bf16.msra.mxu1 %v4847_v44 }
 0xdc9   :  { %4620 = vmatprep.subr.bf16.mxu1 %v6666_v33 }
 0xdca   :  { %3728 = vmatpush1.bf16.msra.mxu0 %v6450_v28  ;;  %v3289_v28 = vld [vmem:[%s6626_s9] sm:$0x7] }
 0xdcb   :  { %3729 = vmatprep.subr.bf16.mxu0 %v6460_v58  ;;  %v3294_v58 = vrot.slane %v3289_v28, %v6675_v20  ;;  %v3302_v7 = vrot.slane %v3289_v28, %v5476_v31 }
 0xdcc   :  { %4621 = vmatpush3.bf16.msra.mxu1 %v4848_v34 }
 0xdcd   :  { %4622 = vmatprep.subr.bf16.mxu1 %v6666_v33 }
 0xdce   :  { %3730 = vmatpush1.bf16.msra.mxu0 %v6466_v60  ;;  %v3298_v60 = vrot.slane %v3289_v28, %v6676_v24  ;;  %v6696_v28 = vld [vmem:[#allocation30_spill] sm:$0xff] }
 0xdcf   :  { %3731 = vmatprep.subr.bf16.mxu0 %v6475_v0 }
 0xdd0   :  { %4623 = vmatpush3.bf16.msra.mxu1 %v4849_v32  ;;  %v3589_v32 = vrot.slane %v3576_v59, %v5476_v31 }
 0xdd1   :  { %4624 = vmatprep.subr.bf16.mxu1 %v6666_v33 }
 0xdd2   :  { %3732 = vmatpush1.bf16.msra.mxu0 %v6481_v21 }
 0xdd3   :  { %3733 = vmatprep.subr.bf16.mxu0 %v6491_v38  ;;  %v672_v38 = vadd.f32 %v6693_v27, %v6163_v36 }
 0xdd4   :  { %4625 = vmatpush3.bf16.msra.mxu1 %v4850_v46 }
 0xdd5   :  { %4626 = vmatprep.subr.bf16.mxu1 %v6666_v33 }
 0xdd6   :  { %3734 = vmatpush1.bf16.msra.mxu0 %v6497_v23 }
 0xdd7   :  { %3735 = vmatprep.subr.bf16.mxu0 %v6507_v49 }
 0xdd8   :  { %4627 = vmatpush3.bf16.msra.mxu1 %v4851_v35 }
 0xdd9   :  { %4628 = vmatprep.subr.bf16.mxu1 %v6666_v33 }
 0xdda   :  { %3736 = vmatpush1.bf16.msra.mxu0 %v6513_v1  ;;  %v6694_v1 = vld [vmem:[#allocation29_spill] sm:$0xff] }
 0xddb   :  { %v674_v33 = vadd.f32 %v6694_v1, %v6167_v53 }
 0xddc   :  { %4629 = vmatpush3.bf16.msra.mxu1 %v4852_v55 }
 0xe90   :  { %v3468_v0 = vpop.f32.mrb[84].mxu0  ;;  %v3509_v21 = vpop.f32.mrb[68].mxu1 }
 0xe91   :  { %v3469_v23 = vadd.f32 %v3468_v0, %v3294_v58  ;;  %v3470_v41 = vpop.f32.mrb[85].mxu0  ;;  %v4612_v49 = vpop.f32.mrb[69].mxu1  ;;  %v3510_v56 = vadd.f32 %v3509_v21, %v3302_v7 }
 0xe92   :  { %v3471_v19 = vadd.f32 %v3470_v41, %v3298_v60  ;;  %v3472_v29 = vpop.f32.mrb[86].mxu0  ;;  %v3512_v50 = vpop.f32.mrb[70].mxu1 }
 0xe93   :  { %v3515_v25 = vadd.f32 %v3469_v23, %v672_v38  ;;  %v3473_v48 = vpop.f32.mrb[87].mxu0  ;;  %v4613_v62 = vpop.f32.mrb[71].mxu1 }
 0xe94   :  { %v3522_v40 = vadd.f32 %v3471_v19, %v674_v33 }
 0xe95   :  { %v4097_v4 = vmul.f32 -1.442695, %v3515_v25 }
 0xe96   :  { %v4098_v37 = vmul.f32 -1.442695, %v3522_v40 }
 0xe97   :  { %4983 = vpow2.f32 %v4097_v4 }
 0xe98   :  { %4985 = vpow2.f32 %v4098_v37 }
 0xea1   :  { %v4984_v3 = vpop.eup %4983 }
 0xea2   :  { %v3519_v5 = vadd.f32 1.0, %v4984_v3  ;;  %v4986_v6 = vpop.eup %4985 }
 0xea3   :  { %v3526_v9 = vadd.f32 1.0, %v4986_v6 }
 0xea4   :  { %4987 = vrcp.f32 %v3519_v5 }
 0xea5   :  { %4989 = vrcp.f32 %v3526_v9 }
 0xeae   :  { %v4988_v10 = vpop.eup %4987 }
 0xeaf   :  { %v3529_v11 = vmul.f32 %v4988_v10, %v3510_v56  ;;  %v4990_v13 = vpop.eup %4989 }
 0xeb0   :  { %v3532_v14 = vsub.f32 1.0, %v4990_v13  ;;  %v3534_v17 = vmul.f32 %v4990_v13, %v6534_v57 }
 0xeb1   :  { %v3530_v12 = vadd.f32 %v3529_v11, %v6695_v51 }
 0xeb3   :  { %4991 = vtanh.f32 %v3530_v12 }
 0xebd   :  { %v4992_v15 = vpop.eup %4991 }
 0xebe   :  { %v3533_v16 = vmul.f32 %v4992_v15, %v3532_v14 }
 0xec0   :  { %v3535_v18 = vadd.f32 %v3534_v17, %v3533_v16 }
 0xec2   :  { %v3536_v30 = vpack.c.bf16 %v3535_v18, %v3535_v18 }
 0xec4   :  { %4099 = vst [vmem:[%s6627_s10 + $0x14] sm:$0xf] %v3536_v30  ;;  %3754 = vmatmul.mubr.bf16.vlgmr.msra.gmra.mrb[28].mxu0 %v3536_v30  ;;  %4631 = vmatmul.mubr.bf16.vlgmr.msra.gmra.mrb[72].mxu1 %v3536_v30 }
 0xf97   :  { %v3755_v39 = vpop.f32.mrb[28].mxu0  ;;  %v3796_v54 = vpop.f32.mrb[72].mxu1 }
 0xf98   :  { %v4635_v47 = vadd.f32 %v4634_v42, %v3755_v39  ;;  %v3757_v52 = vpop.f32.mrb[29].mxu0  ;;  %v4632_v26 = vpop.f32.mrb[73].mxu1  ;;  %v3797_v53 = vadd.f32 %v3796_v54, %v3589_v32 }
 0xf99   :  { %v3759_v63 = vpop.f32.mrb[30].mxu0  ;;  %v3799_v57 = vpop.f32.mrb[74].mxu1  ;;  %v4637_v44 = vadd.f32 %v4636_v22, %v3757_v52 }
 0xf9a   :  { %v4124_v61 = vmul.f32 -1.442695, %v4635_v47  ;;  %v3760_v43 = vpop.f32.mrb[31].mxu0  ;;  %v4633_v2 = vpop.f32.mrb[75].mxu1 }
 0xf9b   :  { %v4125_v34 = vmul.f32 -1.442695, %v4637_v44 }
 0xf9c   :  { %4993 = vpow2.f32 %v4124_v61 }
 0xf9d   :  { %4995 = vpow2.f32 %v4125_v34 }
 0xfa6   :  { %v4994_v20 = vpop.eup %4993 }
 0xfa7   :  { %v3806_v24 = vadd.f32 1.0, %v4994_v20  ;;  %v4996_v36 = vpop.eup %4995 }
 0xfa8   :  { %v3813_v46 = vadd.f32 1.0, %v4996_v36 }
 0xfa9   :  { %4997 = vrcp.f32 %v3806_v24 }
 0xfaa   :  { %4999 = vrcp.f32 %v3813_v46 }
 0xfb3   :  { %v4998_v35 = vpop.eup %4997 }
 0xfb4   :  { %v3816_v55 = vmul.f32 %v4998_v35, %v3797_v53  ;;  %v5000_v60 = vpop.eup %4999 }
 0xfb5   :  { %v3819_v0 = vsub.f32 1.0, %v5000_v60  ;;  %v3821_v38 = vmul.f32 %v5000_v60, %v3535_v18 }
 0xfb6   :  { %v3817_v58 = vadd.f32 %v3816_v55, %v6696_v28 }
 0xfb8   :  { %5001 = vtanh.f32 %v3817_v58 }
 0xfc2   :  { %v5002_v21 = vpop.eup %5001 }
 0xfc3   :  { %v3820_v27 = vmul.f32 %v5002_v21, %v3819_v0 }
 0xfc5   :  { %v3822_v23 = vadd.f32 %v3821_v38, %v3820_v27 }
 0xfc7   :  { %v3823_v41 = vpack.c.bf16 %v3822_v23, %v3822_v23 }
 0xfc9   :  { %4126 = vst [vmem:[%s6627_s10 + $0x18] sm:$0xf] %v3823_v41 }

</bundles_post_ra>
